<compile_context>
chip_gen: v5e
topology: v5e:2x2
jax: 0.10.0
libtpu: 0.0.40
codegen_flags: <defaults>
</compile_context>

<pallas_src>
import numpy as np
import jax
import jax.numpy as jnp
from jax import lax
from jax.experimental import pallas as pl
from jax.experimental.pallas import tpu as pltpu


# ----------------------------------------------------------------------------
# Pallas kernels
# ----------------------------------------------------------------------------

def _dw_branch_kernel(ph_ref, w_ref, b_ref, out_ref, buf1, buf2):
    """Three fused depthwise 3x3 convs (+ folded BN), strides (2, 1, 1).

    ph_ref : (1, 4, C, Hp2, Wp2)  even/odd phase planes of the padded input
    w_ref  : (3, C, 1, 9)         depthwise weights, BN scale folded in
    b_ref  : (3, C, 1, 1)         folded BN bias per layer
    out_ref: (1, C, Ho, Wo)
    buf1/2 : (C, Ho+2, Wo+2)      zero-padded VMEM intermediates
    """
    _, C, Ho, Wo = out_ref.shape

    def wtap(layer, t):
        # (C, 1, 1) per-channel scalar for tap t of `layer`
        return w_ref[layer, :, :, pl.ds(t, 1)]

    # ---- layer 0: stride 2; taps come from the 4 phase planes (unit-stride) --
    acc = None
    for dy in range(3):
        for dx in range(3):
            pidx = (dy % 2) * 2 + (dx % 2)
            tap = ph_ref[0, pidx, :, pl.ds(dy // 2, Ho), pl.ds(dx // 2, Wo)]
            term = tap * wtap(0, 3 * dy + dx)
            acc = term if acc is None else acc + term
    buf1[...] = jnp.zeros_like(buf1)
    buf1[:, pl.ds(1, Ho), pl.ds(1, Wo)] = acc + b_ref[0]

    # ---- layer 1: stride 1 on the zero-padded VMEM intermediate -------------
    acc = None
    for dy in range(3):
        for dx in range(3):
            tap = buf1[:, pl.ds(dy, Ho), pl.ds(dx, Wo)]
            term = tap * wtap(1, 3 * dy + dx)
            acc = term if acc is None else acc + term
    buf2[...] = jnp.zeros_like(buf2)
    buf2[:, pl.ds(1, Ho), pl.ds(1, Wo)] = acc + b_ref[1]

    # ---- layer 2: stride 1, write straight to the output block --------------
    acc = None
    for dy in range(3):
        for dx in range(3):
            tap = buf2[:, pl.ds(dy, Ho), pl.ds(dx, Wo)]
            term = tap * wtap(2, 3 * dy + dx)
            acc = term if acc is None else acc + term
    out_ref[0] = acc + b_ref[2]


def _sgcn_kernel(x_ref, k_ref, wcat_ref, bcat_ref, wgo_ref, bgo_ref, out_ref):
    """SpatialGCN core, channel-major (C on sublanes, spatial N on lanes).

    x_ref : (1, Cx, N)  localfeat
    k_ref : (1, c,  N)  localtoken
    wcat  : (3c, Cx), bcat: (3c, 1)   -- [node_v ; node_q ; folded-xpre]
    wgo   : (c, c),   bgo : (c, 1)    -- folded conv_wg+BN -> outdecode+BN
    """
    f32 = jnp.float32
    c = k_ref.shape[1]
    X = x_ref[0]                                                     # (Cx, N)
    K = k_ref[0]                                                     # (c,  N)

    # node_v / node_q / xpre in ONE matmul
    Y = jnp.dot(wcat_ref[...], X, preferred_element_type=f32) + bcat_ref[...]
    V = Y[0:c]                                                       # (c, N)
    Q = Y[c:2 * c]                                                   # (c, N)
    X2 = Y[2 * c:3 * c]                                              # (c, N)

    # AV = node_q @ node_v^T  (contract over spatial N)
    A = lax.dot_general(Q, V, (((1,), (1,)), ((), ())),
                        preferred_element_type=f32)                  # (c, c)
    A = A - jnp.max(A, axis=-1, keepdims=True)
    E = jnp.exp(A)
    P = E * pl.reciprocal(jnp.sum(E, axis=-1, keepdims=True), approx=True)

    # (node_k @ AV)^T  ==  AV^T @ K   (contract over lhs axis 0)
    AVt = lax.dot_general(P, K, (((0,), (0,)), ((), ())),
                          preferred_element_type=f32)                # (c, N)

    OUT1 = jnp.dot(wgo_ref[...], AVt, preferred_element_type=f32) + bgo_ref[...]
    out_ref[0] = jnp.maximum(OUT1 + X2, 0.0)


def _upfuse_kernel(loc_ref, m_ref, fd_ref, out_ref):
    """Bilinear upsample (kron matmul) fused with featdecode*up + featdecode."""
    up = jnp.dot(loc_ref[0], m_ref[...], preferred_element_type=jnp.float32)
    fd = fd_ref[0]
    out_ref[0] = fd * up + fd


# ----------------------------------------------------------------------------
# Wrappers around pallas_call
# ----------------------------------------------------------------------------

def dw_branch(x, w, b):
    """Fused (dwconv3x3 s2 + BN) -> (dwconv3x3 s1 + BN) x2.  x: (B, C, H, W)."""
    B, C, H, W = x.shape
    assert H % 2 == 0 and W % 2 == 0, "even spatial dims expected"
    Ho, Wo = H // 2, W // 2
    Hp2, Wp2 = Ho + 1, Wo + 1
    xpad = jnp.pad(x, ((0, 0), (0, 0), (1, 1), (1, 1)))
    # 4 even/odd phase planes of the padded input: lets the kernel read the
    # stride-2 taps with unit-stride slices (no 9x taps materialization).
    phases = jnp.stack(
        [xpad[:, :, py::2, px::2] for py in (0, 1) for px in (0, 1)], axis=1)

    return pl.pallas_call(
        _dw_branch_kernel,
        out_shape=jax.ShapeDtypeStruct((B, C, Ho, Wo), jnp.float32),
        grid=(B,),
        in_specs=[
            pl.BlockSpec((1, 4, C, Hp2, Wp2), lambda bb: (bb, 0, 0, 0, 0)),
            pl.BlockSpec((3, C, 1, 9), lambda bb: (0, 0, 0, 0)),
            pl.BlockSpec((3, C, 1, 1), lambda bb: (0, 0, 0, 0)),
        ],
        out_specs=pl.BlockSpec((1, C, Ho, Wo), lambda bb: (bb, 0, 0, 0)),
        scratch_shapes=[pltpu.VMEM((C, Ho + 2, Wo + 2), jnp.float32),
                        pltpu.VMEM((C, Ho + 2, Wo + 2), jnp.float32)],
        compiler_params=pltpu.CompilerParams(dimension_semantics=("parallel",)),
    )(phases, w, b)


def spatial_gcn(localfeat, localtoken, p):
    """localfeat: (B, Cx, h, w), localtoken: (B, c, h, w) -> (B, c, h*w)."""
    B, Cx, h, w = localfeat.shape
    c = localtoken.shape[1]
    N = h * w
    xf = localfeat.reshape(B, Cx, N)
    kf = localtoken.reshape(B, c, N)
    return pl.pallas_call(
        _sgcn_kernel,
        out_shape=jax.ShapeDtypeStruct((B, c, N), jnp.float32),
        grid=(B,),
        in_specs=[
            pl.BlockSpec((1, Cx, N), lambda bb: (bb, 0, 0)),
            pl.BlockSpec((1, c, N), lambda bb: (bb, 0, 0)),
            pl.BlockSpec((3 * c, Cx), lambda bb: (0, 0)),
            pl.BlockSpec((3 * c, 1), lambda bb: (0, 0)),
            pl.BlockSpec((c, c), lambda bb: (0, 0)),
            pl.BlockSpec((c, 1), lambda bb: (0, 0)),
        ],
        out_specs=pl.BlockSpec((1, c, N), lambda bb: (bb, 0, 0)),
        compiler_params=pltpu.CompilerParams(dimension_semantics=("parallel",)),
    )(xf, kf, p['wcat'], p['bcat'], p['wgo'], p['bgo'])


def upsample_fuse(local_flat, m2t, featdecode):
    """local_flat: (B, c, h*w), m2t: (h*w, H*W), featdecode: (B, c, H, W)."""
    B, c, n2 = local_flat.shape
    H, W = featdecode.shape[2], featdecode.shape[3]
    HW = H * W
    fdf = featdecode.reshape(B, c, HW)
    out = pl.pallas_call(
        _upfuse_kernel,
        out_shape=jax.ShapeDtypeStruct((B, c, HW), jnp.float32),
        grid=(B,),
        in_specs=[
            pl.BlockSpec((1, c, n2), lambda bb: (bb, 0, 0)),
            pl.BlockSpec((n2, HW), lambda bb: (0, 0)),
            pl.BlockSpec((1, c, HW), lambda bb: (bb, 0, 0)),
        ],
        out_specs=pl.BlockSpec((1, c, HW), lambda bb: (bb, 0, 0)),
        input_output_aliases={2: 0},   # reuse the flattened featdecode buffer
        compiler_params=pltpu.CompilerParams(dimension_semantics=("parallel",)),
    )(local_flat, m2t, fdf)
    return out.reshape(B, c, H, W)


def interp_matrix(out_size, in_size):
    """1-D bilinear interpolation matrix, align_corners=True (numpy, host)."""
    if out_size == 1 or in_size == 1:
        M = np.zeros((out_size, in_size), np.float64)
        M[:, 0] = 1.0
        return M
    i = np.arange(out_size, dtype=np.float64)
    src = i * (in_size - 1) / (out_size - 1)
    i0 = np.clip(np.floor(src).astype(np.int64), 0, in_size - 1)
    i1 = np.clip(i0 + 1, 0, in_size - 1)
    frac = src - i0
    M = np.zeros((out_size, in_size), np.float64)
    M[np.arange(out_size), i0] += (1.0 - frac)
    M[np.arange(out_size), i1] += frac
    return M


def bilinear_kron_t(H, W, h2, w2):
    """Transposed separable bilinear matrix: (h2*w2, H*W), align_corners=True."""
    M2 = np.kron(interp_matrix(H, h2), interp_matrix(W, w2))   # (H*W, h2*w2)
    return jnp.asarray(M2.T.astype(np.float32))


# ----------------------------------------------------------------------------
# Parameter initialization (deterministic, synthetic, BN folded at init)
# ----------------------------------------------------------------------------

def bn_affine(key, C, eps=1e-5):
    k1, k2, k3, k4 = jax.random.split(key, 4)
    gamma = 1.0 + 0.1 * jax.random.normal(k1, (C,), jnp.float32)
    beta = 0.1 * jax.random.normal(k2, (C,), jnp.float32)
    mean = 0.1 * jax.random.normal(k3, (C,), jnp.float32)
    var = 1.0 + 0.1 * jax.random.uniform(k4, (C,), jnp.float32)
    scale = gamma / jnp.sqrt(var + eps)
    shift = beta - mean * scale
    return scale, shift


def init_dw_branch(key, C):
    """3x (depthwise 3x3 conv, no bias) + BN; BN folded into (weight, bias)."""
    ks = jax.random.split(key, 6)
    ws, bs = [], []
    for i in range(3):
        w9 = 0.1 * jax.random.normal(ks[2 * i], (C, 9), jnp.float32)
        scale, shift = bn_affine(ks[2 * i + 1], C)
        ws.append(w9 * scale[:, None])      # fold BN scale into the dw weight
        bs.append(shift)                    # folded BN bias
    w = jnp.stack(ws, 0).reshape(3, C, 1, 9)
    b = jnp.stack(bs, 0).reshape(3, C, 1, 1)
    return w, b


def init_sgcn(key, planes):
    """SpatialGCN(planes//2) params, channel-major (out, in), BN folded, chains fused."""
    c = planes // 2       # SpatialGCN 'plane'
    Cx = planes           # input channels of x (= plane * 2)
    ks = jax.random.split(key, 16)

    def wmat(k, co, ci):
        return 0.1 * jax.random.normal(k, (co, ci), jnp.float32)

    wv = wmat(ks[0], c, Cx)
    bv = 0.1 * jax.random.normal(ks[1], (c,), jnp.float32)
    wq = wmat(ks[2], c, Cx)
    bq = 0.1 * jax.random.normal(ks[3], (c,), jnp.float32)

    # conv_wg_decode (no bias) + bn_wg_decode
    sg, tg = bn_affine(ks[5], c)
    wg = sg[:, None] * wmat(ks[4], c, c)
    bg = tg
    # outdecode: conv(bias) + BN2d
    so, to = bn_affine(ks[8], c)
    wod = so[:, None] * wmat(ks[6], c, c)
    bod = so * (0.1 * jax.random.normal(ks[7], (c,), jnp.float32)) + to
    # fold: outdecode( bn_wg(conv_wg(.)) )  (no activation in between)
    wgo = wod @ wg
    bgo = wod @ bg + bod

    # xpre: conv(Cx->c)+BN, conv(c->c)+BN  (no activation in between -> fold)
    s1, t1 = bn_affine(ks[11], c)
    wx1 = s1[:, None] * wmat(ks[9], c, Cx)
    bx1 = s1 * (0.1 * jax.random.normal(ks[10], (c,), jnp.float32)) + t1
    s2, t2 = bn_affine(ks[14], c)
    wx2 = s2[:, None] * wmat(ks[12], c, c)
    bx2 = s2 * (0.1 * jax.random.normal(ks[13], (c,), jnp.float32)) + t2
    wx = wx2 @ wx1
    bx = wx2 @ bx1 + bx2

    wcat = jnp.concatenate([wv, wq, wx], axis=0)                  # (3c, Cx)
    bcat = jnp.concatenate([bv, bq, bx], axis=0).reshape(3 * c, 1)
    return dict(wcat=wcat, bcat=bcat, wgo=wgo, bgo=bgo.reshape(c, 1))


def init_params(key, planes):
    k1, k2, k3 = jax.random.split(key, 3)
    lw, lb = init_dw_branch(k1, planes)
    dw, db = init_dw_branch(k2, planes // 2)
    return dict(local_w=lw, local_b=lb, dec_w=dw, dec_b=db,
                sgcn=init_sgcn(k3, planes))
    # TODO(synk): cpeencode / cpedecode / finaldecode exist in __init__ but are
    # unused by forward(), so they are not materialized here.


# ----------------------------------------------------------------------------
# Forward pass
# ----------------------------------------------------------------------------

def hierarchical_spatial_graph(feat, featdecode, params):
    """feat: (B, planes, H, W), featdecode: (B, planes//2, H, W)  [NCHW]."""
    localfeat = dw_branch(feat, params['local_w'], params['local_b'])       # (B, planes, H/2, W/2)
    localtoken = dw_branch(featdecode, params['dec_w'], params['dec_b'])    # (B, planes//2, H/2, W/2)

    local = spatial_gcn(localfeat, localtoken, params['sgcn'])              # (B, planes//2, (H/2)*(W/2))

    H, W = featdecode.shape[2], featdecode.shape[3]
    h2, w2 = localfeat.shape[2], localfeat.shape[3]
    m2t = bilinear_kron_t(H, W, h2, w2)                                     # ((H/2)*(W/2), H*W)

    # spatial_local_feat = featdecode * interpolate(local) + featdecode
    return upsample_fuse(local, m2t, featdecode)


# ----------------------------------------------------------------------------
# Demo
# ----------------------------------------------------------------------------

if __name__ == "__main__":
    planes = 8
    B, H, W = 2, 16, 16

    key = jax.random.PRNGKey(0)
    kf, kd, kp = jax.random.split(key, 3)
    feat = jax.random.normal(kf, (B, planes, H, W), jnp.float32)            # NCHW
    featdecode = jax.random.normal(kd, (B, planes // 2, H, W), jnp.float32) # NCHW
    params = init_params(kp, planes)

    fwd = jax.jit(hierarchical_spatial_graph)
    out = jax.block_until_ready(fwd(feat, featdecode, params))

    assert out.shape == (B, planes // 2, H, W), out.shape
    assert bool(jnp.all(jnp.isfinite(out)))
    print("KERNEL_OK")
</pallas_src>

<mosaic_0001>
module attributes {stable_mosaic.version = 11 : i64} {
  func.func @_dw_branch_kernel(%arg0: i32, %arg1: memref<1x4x8x9x9xf32, #tpu.memory_space<vmem>>, %arg2: memref<3x8x1x9xf32, #tpu.memory_space<vmem>>, %arg3: memref<3x8x1x1xf32, #tpu.memory_space<vmem>>, %arg4: memref<1x8x8x8xf32, #tpu.memory_space<vmem>>, %arg5: memref<8x10x10xf32, #tpu.memory_space<vmem>>, %arg6: memref<8x10x10xf32, #tpu.memory_space<vmem>>) attributes {dimension_semantics = [#tpu.dimension_semantics<parallel>], iteration_bounds = array<i64: 2>, scalar_prefetch = 0 : i64, scratch_operands = 2 : i64, tpu.core_type = #tpu.core_type<tc>, window_params = [{transform_indices = @transform_0, window_bounds = array<i64: 1, 4, 8, 9, 9>}, {pipeline_mode = #tpu.pipeline_mode<synchronous>, transform_indices = @transform_1, window_bounds = array<i64: 3, 8, 1, 9>}, {pipeline_mode = #tpu.pipeline_mode<synchronous>, transform_indices = @transform_2, window_bounds = array<i64: 3, 8, 1, 1>}, {transform_indices = @transform_3, window_bounds = array<i64: 1, 8, 8, 8>}]} {
    %c0 = arith.constant 0 : index
    %c0_0 = arith.constant 0 : index
    %c0_1 = arith.constant 0 : index
    %c0_2 = arith.constant 0 : index
    %c0_3 = arith.constant 0 : index
    %0 = vector.load %arg1[%c0, %c0_0, %c0_1, %c0_2, %c0_3] : memref<1x4x8x9x9xf32, #tpu.memory_space<vmem>>, vector<1x1x8x8x8xf32>
    %1 = vector.shape_cast %0 : vector<1x1x8x8x8xf32> to vector<8x8x8xf32>
    %c0_4 = arith.constant 0 : index
    %c0_5 = arith.constant 0 : index
    %c0_6 = arith.constant 0 : index
    %c0_7 = arith.constant 0 : index
    %2 = vector.load %arg2[%c0_4, %c0_5, %c0_6, %c0_7] : memref<3x8x1x9xf32, #tpu.memory_space<vmem>>, vector<1x8x1x1xf32>
    %3 = vector.shape_cast %2 : vector<1x8x1x1xf32> to vector<8x1x1xf32>
    %4 = vector.broadcast %3 : vector<8x1x1xf32> to vector<8x8x8xf32>
    %5 = arith.mulf %1, %4 : vector<8x8x8xf32>
    %c0_8 = arith.constant 0 : index
    %c1 = arith.constant 1 : index
    %c0_9 = arith.constant 0 : index
    %c0_10 = arith.constant 0 : index
    %c0_11 = arith.constant 0 : index
    %6 = vector.load %arg1[%c0_8, %c1, %c0_9, %c0_10, %c0_11] : memref<1x4x8x9x9xf32, #tpu.memory_space<vmem>>, vector<1x1x8x8x8xf32>
    %7 = vector.shape_cast %6 : vector<1x1x8x8x8xf32> to vector<8x8x8xf32>
    %c0_12 = arith.constant 0 : index
    %c0_13 = arith.constant 0 : index
    %c0_14 = arith.constant 0 : index
    %c1_15 = arith.constant 1 : index
    %8 = vector.load %arg2[%c0_12, %c0_13, %c0_14, %c1_15] : memref<3x8x1x9xf32, #tpu.memory_space<vmem>>, vector<1x8x1x1xf32>
    %9 = vector.shape_cast %8 : vector<1x8x1x1xf32> to vector<8x1x1xf32>
    %10 = vector.broadcast %9 : vector<8x1x1xf32> to vector<8x8x8xf32>
    %11 = arith.mulf %7, %10 : vector<8x8x8xf32>
    %12 = arith.addf %5, %11 : vector<8x8x8xf32>
    %c0_16 = arith.constant 0 : index
    %c0_17 = arith.constant 0 : index
    %c0_18 = arith.constant 0 : index
    %c0_19 = arith.constant 0 : index
    %c1_20 = arith.constant 1 : index
    %13 = vector.load %arg1[%c0_16, %c0_17, %c0_18, %c0_19, %c1_20] : memref<1x4x8x9x9xf32, #tpu.memory_space<vmem>>, vector<1x1x8x8x8xf32>
    %14 = vector.shape_cast %13 : vector<1x1x8x8x8xf32> to vector<8x8x8xf32>
    %c0_21 = arith.constant 0 : index
    %c0_22 = arith.constant 0 : index
    %c0_23 = arith.constant 0 : index
    %c2 = arith.constant 2 : index
    %15 = vector.load %arg2[%c0_21, %c0_22, %c0_23, %c2] : memref<3x8x1x9xf32, #tpu.memory_space<vmem>>, vector<1x8x1x1xf32>
    %16 = vector.shape_cast %15 : vector<1x8x1x1xf32> to vector<8x1x1xf32>
    %17 = vector.broadcast %16 : vector<8x1x1xf32> to vector<8x8x8xf32>
    %18 = arith.mulf %14, %17 : vector<8x8x8xf32>
    %19 = arith.addf %12, %18 : vector<8x8x8xf32>
    %c0_24 = arith.constant 0 : index
    %c2_25 = arith.constant 2 : index
    %c0_26 = arith.constant 0 : index
    %c0_27 = arith.constant 0 : index
    %c0_28 = arith.constant 0 : index
    %20 = vector.load %arg1[%c0_24, %c2_25, %c0_26, %c0_27, %c0_28] : memref<1x4x8x9x9xf32, #tpu.memory_space<vmem>>, vector<1x1x8x8x8xf32>
    %21 = vector.shape_cast %20 : vector<1x1x8x8x8xf32> to vector<8x8x8xf32>
    %c0_29 = arith.constant 0 : index
    %c0_30 = arith.constant 0 : index
    %c0_31 = arith.constant 0 : index
    %c3 = arith.constant 3 : index
    %22 = vector.load %arg2[%c0_29, %c0_30, %c0_31, %c3] : memref<3x8x1x9xf32, #tpu.memory_space<vmem>>, vector<1x8x1x1xf32>
    %23 = vector.shape_cast %22 : vector<1x8x1x1xf32> to vector<8x1x1xf32>
    %24 = vector.broadcast %23 : vector<8x1x1xf32> to vector<8x8x8xf32>
    %25 = arith.mulf %21, %24 : vector<8x8x8xf32>
    %26 = arith.addf %19, %25 : vector<8x8x8xf32>
    %c0_32 = arith.constant 0 : index
    %c3_33 = arith.constant 3 : index
    %c0_34 = arith.constant 0 : index
    %c0_35 = arith.constant 0 : index
    %c0_36 = arith.constant 0 : index
    %27 = vector.load %arg1[%c0_32, %c3_33, %c0_34, %c0_35, %c0_36] : memref<1x4x8x9x9xf32, #tpu.memory_space<vmem>>, vector<1x1x8x8x8xf32>
    %28 = vector.shape_cast %27 : vector<1x1x8x8x8xf32> to vector<8x8x8xf32>
    %c0_37 = arith.constant 0 : index
    %c0_38 = arith.constant 0 : index
    %c0_39 = arith.constant 0 : index
    %c4 = arith.constant 4 : index
    %29 = vector.load %arg2[%c0_37, %c0_38, %c0_39, %c4] : memref<3x8x1x9xf32, #tpu.memory_space<vmem>>, vector<1x8x1x1xf32>
    %30 = vector.shape_cast %29 : vector<1x8x1x1xf32> to vector<8x1x1xf32>
    %31 = vector.broadcast %30 : vector<8x1x1xf32> to vector<8x8x8xf32>
    %32 = arith.mulf %28, %31 : vector<8x8x8xf32>
    %33 = arith.addf %26, %32 : vector<8x8x8xf32>
    %c0_40 = arith.constant 0 : index
    %c2_41 = arith.constant 2 : index
    %c0_42 = arith.constant 0 : index
    %c0_43 = arith.constant 0 : index
    %c1_44 = arith.constant 1 : index
    %34 = vector.load %arg1[%c0_40, %c2_41, %c0_42, %c0_43, %c1_44] : memref<1x4x8x9x9xf32, #tpu.memory_space<vmem>>, vector<1x1x8x8x8xf32>
    %35 = vector.shape_cast %34 : vector<1x1x8x8x8xf32> to vector<8x8x8xf32>
    %c0_45 = arith.constant 0 : index
    %c0_46 = arith.constant 0 : index
    %c0_47 = arith.constant 0 : index
    %c5 = arith.constant 5 : index
    %36 = vector.load %arg2[%c0_45, %c0_46, %c0_47, %c5] : memref<3x8x1x9xf32, #tpu.memory_space<vmem>>, vector<1x8x1x1xf32>
    %37 = vector.shape_cast %36 : vector<1x8x1x1xf32> to vector<8x1x1xf32>
    %38 = vector.broadcast %37 : vector<8x1x1xf32> to vector<8x8x8xf32>
    %39 = arith.mulf %35, %38 : vector<8x8x8xf32>
    %40 = arith.addf %33, %39 : vector<8x8x8xf32>
    %c0_48 = arith.constant 0 : index
    %c0_49 = arith.constant 0 : index
    %c0_50 = arith.constant 0 : index
    %c1_51 = arith.constant 1 : index
    %c0_52 = arith.constant 0 : index
    %41 = vector.load %arg1[%c0_48, %c0_49, %c0_50, %c1_51, %c0_52] : memref<1x4x8x9x9xf32, #tpu.memory_space<vmem>>, vector<1x1x8x8x8xf32>
    %42 = vector.shape_cast %41 : vector<1x1x8x8x8xf32> to vector<8x8x8xf32>
    %c0_53 = arith.constant 0 : index
    %c0_54 = arith.constant 0 : index
    %c0_55 = arith.constant 0 : index
    %c6 = arith.constant 6 : index
    %43 = vector.load %arg2[%c0_53, %c0_54, %c0_55, %c6] : memref<3x8x1x9xf32, #tpu.memory_space<vmem>>, vector<1x8x1x1xf32>
    %44 = vector.shape_cast %43 : vector<1x8x1x1xf32> to vector<8x1x1xf32>
    %45 = vector.broadcast %44 : vector<8x1x1xf32> to vector<8x8x8xf32>
    %46 = arith.mulf %42, %45 : vector<8x8x8xf32>
    %47 = arith.addf %40, %46 : vector<8x8x8xf32>
    %c0_56 = arith.constant 0 : index
    %c1_57 = arith.constant 1 : index
    %c0_58 = arith.constant 0 : index
    %c1_59 = arith.constant 1 : index
    %c0_60 = arith.constant 0 : index
    %48 = vector.load %arg1[%c0_56, %c1_57, %c0_58, %c1_59, %c0_60] : memref<1x4x8x9x9xf32, #tpu.memory_space<vmem>>, vector<1x1x8x8x8xf32>
    %49 = vector.shape_cast %48 : vector<1x1x8x8x8xf32> to vector<8x8x8xf32>
    %c0_61 = arith.constant 0 : index
    %c0_62 = arith.constant 0 : index
    %c0_63 = arith.constant 0 : index
    %c7 = arith.constant 7 : index
    %50 = vector.load %arg2[%c0_61, %c0_62, %c0_63, %c7] : memref<3x8x1x9xf32, #tpu.memory_space<vmem>>, vector<1x8x1x1xf32>
    %51 = vector.shape_cast %50 : vector<1x8x1x1xf32> to vector<8x1x1xf32>
    %52 = vector.broadcast %51 : vector<8x1x1xf32> to vector<8x8x8xf32>
    %53 = arith.mulf %49, %52 : vector<8x8x8xf32>
    %54 = arith.addf %47, %53 : vector<8x8x8xf32>
    %c0_64 = arith.constant 0 : index
    %c0_65 = arith.constant 0 : index
    %c0_66 = arith.constant 0 : index
    %c1_67 = arith.constant 1 : index
    %c1_68 = arith.constant 1 : index
    %55 = vector.load %arg1[%c0_64, %c0_65, %c0_66, %c1_67, %c1_68] : memref<1x4x8x9x9xf32, #tpu.memory_space<vmem>>, vector<1x1x8x8x8xf32>
    %56 = vector.shape_cast %55 : vector<1x1x8x8x8xf32> to vector<8x8x8xf32>
    %c0_69 = arith.constant 0 : index
    %c0_70 = arith.constant 0 : index
    %c0_71 = arith.constant 0 : index
    %c8 = arith.constant 8 : index
    %57 = vector.load %arg2[%c0_69, %c0_70, %c0_71, %c8] : memref<3x8x1x9xf32, #tpu.memory_space<vmem>>, vector<1x8x1x1xf32>
    %58 = vector.shape_cast %57 : vector<1x8x1x1xf32> to vector<8x1x1xf32>
    %59 = vector.broadcast %58 : vector<8x1x1xf32> to vector<8x8x8xf32>
    %60 = arith.mulf %56, %59 : vector<8x8x8xf32>
    %61 = arith.addf %54, %60 : vector<8x8x8xf32>
    %cst = arith.constant 0.000000e+00 : f32
    %62 = vector.broadcast %cst : f32 to vector<8x10x10xf32>
    %c0_72 = arith.constant 0 : index
    %c0_73 = arith.constant 0 : index
    %c0_74 = arith.constant 0 : index
    %63 = vector.load %arg5[%c0_72, %c0_73, %c0_74] : memref<8x10x10xf32, #tpu.memory_space<vmem>>, vector<8x10x10xf32>
    tpu.vector_store %arg5[%c0_72, %c0_73, %c0_74], %62 {strides = array<i32>} : memref<8x10x10xf32, #tpu.memory_space<vmem>>, vector<8x10x10xf32>,
    %c0_75 = arith.constant 0 : index
    %c0_76 = arith.constant 0 : index
    %c0_77 = arith.constant 0 : index
    %c0_78 = arith.constant 0 : index
    %64 = vector.load %arg3[%c0_75, %c0_76, %c0_77, %c0_78] : memref<3x8x1x1xf32, #tpu.memory_space<vmem>>, vector<1x8x1x1xf32>
    %65 = vector.shape_cast %64 : vector<1x8x1x1xf32> to vector<8x1x1xf32>
    %66 = vector.broadcast %65 : vector<8x1x1xf32> to vector<8x8x8xf32>
    %67 = arith.addf %61, %66 : vector<8x8x8xf32>
    %c0_79 = arith.constant 0 : index
    %c1_80 = arith.constant 1 : index
    %c1_81 = arith.constant 1 : index
    %68 = vector.load %arg5[%c0_79, %c1_80, %c1_81] : memref<8x10x10xf32, #tpu.memory_space<vmem>>, vector<8x8x8xf32>
    tpu.vector_store %arg5[%c0_79, %c1_80, %c1_81], %67 {strides = array<i32>} : memref<8x10x10xf32, #tpu.memory_space<vmem>>, vector<8x8x8xf32>,
    %c0_82 = arith.constant 0 : index
    %c0_83 = arith.constant 0 : index
    %c0_84 = arith.constant 0 : index
    %69 = vector.load %arg5[%c0_82, %c0_83, %c0_84] : memref<8x10x10xf32, #tpu.memory_space<vmem>>, vector<8x8x8xf32>
    %c1_85 = arith.constant 1 : index
    %c0_86 = arith.constant 0 : index
    %c0_87 = arith.constant 0 : index
    %c0_88 = arith.constant 0 : index
    %70 = vector.load %arg2[%c1_85, %c0_86, %c0_87, %c0_88] : memref<3x8x1x9xf32, #tpu.memory_space<vmem>>, vector<1x8x1x1xf32>
    %71 = vector.shape_cast %70 : vector<1x8x1x1xf32> to vector<8x1x1xf32>
    %72 = vector.broadcast %71 : vector<8x1x1xf32> to vector<8x8x8xf32>
    %73 = arith.mulf %69, %72 : vector<8x8x8xf32>
    %c0_89 = arith.constant 0 : index
    %c0_90 = arith.constant 0 : index
    %c1_91 = arith.constant 1 : index
    %74 = vector.load %arg5[%c0_89, %c0_90, %c1_91] : memref<8x10x10xf32, #tpu.memory_space<vmem>>, vector<8x8x8xf32>
    %c1_92 = arith.constant 1 : index
    %c0_93 = arith.constant 0 : index
    %c0_94 = arith.constant 0 : index
    %c1_95 = arith.constant 1 : index
    %75 = vector.load %arg2[%c1_92, %c0_93, %c0_94, %c1_95] : memref<3x8x1x9xf32, #tpu.memory_space<vmem>>, vector<1x8x1x1xf32>
    %76 = vector.shape_cast %75 : vector<1x8x1x1xf32> to vector<8x1x1xf32>
    %77 = vector.broadcast %76 : vector<8x1x1xf32> to vector<8x8x8xf32>
    %78 = arith.mulf %74, %77 : vector<8x8x8xf32>
    %79 = arith.addf %73, %78 : vector<8x8x8xf32>
    %c0_96 = arith.constant 0 : index
    %c0_97 = arith.constant 0 : index
    %c2_98 = arith.constant 2 : index
    %80 = vector.load %arg5[%c0_96, %c0_97, %c2_98] : memref<8x10x10xf32, #tpu.memory_space<vmem>>, vector<8x8x8xf32>
    %c1_99 = arith.constant 1 : index
    %c0_100 = arith.constant 0 : index
    %c0_101 = arith.constant 0 : index
    %c2_102 = arith.constant 2 : index
    %81 = vector.load %arg2[%c1_99, %c0_100, %c0_101, %c2_102] : memref<3x8x1x9xf32, #tpu.memory_space<vmem>>, vector<1x8x1x1xf32>
    %82 = vector.shape_cast %81 : vector<1x8x1x1xf32> to vector<8x1x1xf32>
    %83 = vector.broadcast %82 : vector<8x1x1xf32> to vector<8x8x8xf32>
    %84 = arith.mulf %80, %83 : vector<8x8x8xf32>
    %85 = arith.addf %79, %84 : vector<8x8x8xf32>
    %c0_103 = arith.constant 0 : index
    %c1_104 = arith.constant 1 : index
    %c0_105 = arith.constant 0 : index
    %86 = vector.load %arg5[%c0_103, %c1_104, %c0_105] : memref<8x10x10xf32, #tpu.memory_space<vmem>>, vector<8x8x8xf32>
    %c1_106 = arith.constant 1 : index
    %c0_107 = arith.constant 0 : index
    %c0_108 = arith.constant 0 : index
    %c3_109 = arith.constant 3 : index
    %87 = vector.load %arg2[%c1_106, %c0_107, %c0_108, %c3_109] : memref<3x8x1x9xf32, #tpu.memory_space<vmem>>, vector<1x8x1x1xf32>
    %88 = vector.shape_cast %87 : vector<1x8x1x1xf32> to vector<8x1x1xf32>
    %89 = vector.broadcast %88 : vector<8x1x1xf32> to vector<8x8x8xf32>
    %90 = arith.mulf %86, %89 : vector<8x8x8xf32>
    %91 = arith.addf %85, %90 : vector<8x8x8xf32>
    %c0_110 = arith.constant 0 : index
    %c1_111 = arith.constant 1 : index
    %c1_112 = arith.constant 1 : index
    %92 = vector.load %arg5[%c0_110, %c1_111, %c1_112] : memref<8x10x10xf32, #tpu.memory_space<vmem>>, vector<8x8x8xf32>
    %c1_113 = arith.constant 1 : index
    %c0_114 = arith.constant 0 : index
    %c0_115 = arith.constant 0 : index
    %c4_116 = arith.constant 4 : index
    %93 = vector.load %arg2[%c1_113, %c0_114, %c0_115, %c4_116] : memref<3x8x1x9xf32, #tpu.memory_space<vmem>>, vector<1x8x1x1xf32>
    %94 = vector.shape_cast %93 : vector<1x8x1x1xf32> to vector<8x1x1xf32>
    %95 = vector.broadcast %94 : vector<8x1x1xf32> to vector<8x8x8xf32>
    %96 = arith.mulf %92, %95 : vector<8x8x8xf32>
    %97 = arith.addf %91, %96 : vector<8x8x8xf32>
    %c0_117 = arith.constant 0 : index
    %c1_118 = arith.constant 1 : index
    %c2_119 = arith.constant 2 : index
    %98 = vector.load %arg5[%c0_117, %c1_118, %c2_119] : memref<8x10x10xf32, #tpu.memory_space<vmem>>, vector<8x8x8xf32>
    %c1_120 = arith.constant 1 : index
    %c0_121 = arith.constant 0 : index
    %c0_122 = arith.constant 0 : index
    %c5_123 = arith.constant 5 : index
    %99 = vector.load %arg2[%c1_120, %c0_121, %c0_122, %c5_123] : memref<3x8x1x9xf32, #tpu.memory_space<vmem>>, vector<1x8x1x1xf32>
    %100 = vector.shape_cast %99 : vector<1x8x1x1xf32> to vector<8x1x1xf32>
    %101 = vector.broadcast %100 : vector<8x1x1xf32> to vector<8x8x8xf32>
    %102 = arith.mulf %98, %101 : vector<8x8x8xf32>
    %103 = arith.addf %97, %102 : vector<8x8x8xf32>
    %c0_124 = arith.constant 0 : index
    %c2_125 = arith.constant 2 : index
    %c0_126 = arith.constant 0 : index
    %104 = vector.load %arg5[%c0_124, %c2_125, %c0_126] : memref<8x10x10xf32, #tpu.memory_space<vmem>>, vector<8x8x8xf32>
    %c1_127 = arith.constant 1 : index
    %c0_128 = arith.constant 0 : index
    %c0_129 = arith.constant 0 : index
    %c6_130 = arith.constant 6 : index
    %105 = vector.load %arg2[%c1_127, %c0_128, %c0_129, %c6_130] : memref<3x8x1x9xf32, #tpu.memory_space<vmem>>, vector<1x8x1x1xf32>
    %106 = vector.shape_cast %105 : vector<1x8x1x1xf32> to vector<8x1x1xf32>
    %107 = vector.broadcast %106 : vector<8x1x1xf32> to vector<8x8x8xf32>
    %108 = arith.mulf %104, %107 : vector<8x8x8xf32>
    %109 = arith.addf %103, %108 : vector<8x8x8xf32>
    %c0_131 = arith.constant 0 : index
    %c2_132 = arith.constant 2 : index
    %c1_133 = arith.constant 1 : index
    %110 = vector.load %arg5[%c0_131, %c2_132, %c1_133] : memref<8x10x10xf32, #tpu.memory_space<vmem>>, vector<8x8x8xf32>
    %c1_134 = arith.constant 1 : index
    %c0_135 = arith.constant 0 : index
    %c0_136 = arith.constant 0 : index
    %c7_137 = arith.constant 7 : index
    %111 = vector.load %arg2[%c1_134, %c0_135, %c0_136, %c7_137] : memref<3x8x1x9xf32, #tpu.memory_space<vmem>>, vector<1x8x1x1xf32>
    %112 = vector.shape_cast %111 : vector<1x8x1x1xf32> to vector<8x1x1xf32>
    %113 = vector.broadcast %112 : vector<8x1x1xf32> to vector<8x8x8xf32>
    %114 = arith.mulf %110, %113 : vector<8x8x8xf32>
    %115 = arith.addf %109, %114 : vector<8x8x8xf32>
    %c0_138 = arith.constant 0 : index
    %c2_139 = arith.constant 2 : index
    %c2_140 = arith.constant 2 : index
    %116 = vector.load %arg5[%c0_138, %c2_139, %c2_140] : memref<8x10x10xf32, #tpu.memory_space<vmem>>, vector<8x8x8xf32>
    %c1_141 = arith.constant 1 : index
    %c0_142 = arith.constant 0 : index
    %c0_143 = arith.constant 0 : index
    %c8_144 = arith.constant 8 : index
    %117 = vector.load %arg2[%c1_141, %c0_142, %c0_143, %c8_144] : memref<3x8x1x9xf32, #tpu.memory_space<vmem>>, vector<1x8x1x1xf32>
    %118 = vector.shape_cast %117 : vector<1x8x1x1xf32> to vector<8x1x1xf32>
    %119 = vector.broadcast %118 : vector<8x1x1xf32> to vector<8x8x8xf32>
    %120 = arith.mulf %116, %119 : vector<8x8x8xf32>
    %121 = arith.addf %115, %120 : vector<8x8x8xf32>
    %cst_145 = arith.constant 0.000000e+00 : f32
    %122 = vector.broadcast %cst_145 : f32 to vector<8x10x10xf32>
    %c0_146 = arith.constant 0 : index
    %c0_147 = arith.constant 0 : index
    %c0_148 = arith.constant 0 : index
    %123 = vector.load %arg6[%c0_146, %c0_147, %c0_148] : memref<8x10x10xf32, #tpu.memory_space<vmem>>, vector<8x10x10xf32>
    tpu.vector_store %arg6[%c0_146, %c0_147, %c0_148], %122 {strides = array<i32>} : memref<8x10x10xf32, #tpu.memory_space<vmem>>, vector<8x10x10xf32>,
    %c1_149 = arith.constant 1 : index
    %c0_150 = arith.constant 0 : index
    %c0_151 = arith.constant 0 : index
    %c0_152 = arith.constant 0 : index
    %124 = vector.load %arg3[%c1_149, %c0_150, %c0_151, %c0_152] : memref<3x8x1x1xf32, #tpu.memory_space<vmem>>, vector<1x8x1x1xf32>
    %125 = vector.shape_cast %124 : vector<1x8x1x1xf32> to vector<8x1x1xf32>
    %126 = vector.broadcast %125 : vector<8x1x1xf32> to vector<8x8x8xf32>
    %127 = arith.addf %121, %126 : vector<8x8x8xf32>
    %c0_153 = arith.constant 0 : index
    %c1_154 = arith.constant 1 : index
    %c1_155 = arith.constant 1 : index
    %128 = vector.load %arg6[%c0_153, %c1_154, %c1_155] : memref<8x10x10xf32, #tpu.memory_space<vmem>>, vector<8x8x8xf32>
    tpu.vector_store %arg6[%c0_153, %c1_154, %c1_155], %127 {strides = array<i32>} : memref<8x10x10xf32, #tpu.memory_space<vmem>>, vector<8x8x8xf32>,
    %c0_156 = arith.constant 0 : index
    %c0_157 = arith.constant 0 : index
    %c0_158 = arith.constant 0 : index
    %129 = vector.load %arg6[%c0_156, %c0_157, %c0_158] : memref<8x10x10xf32, #tpu.memory_space<vmem>>, vector<8x8x8xf32>
    %c2_159 = arith.constant 2 : index
    %c0_160 = arith.constant 0 : index
    %c0_161 = arith.constant 0 : index
    %c0_162 = arith.constant 0 : index
    %130 = vector.load %arg2[%c2_159, %c0_160, %c0_161, %c0_162] : memref<3x8x1x9xf32, #tpu.memory_space<vmem>>, vector<1x8x1x1xf32>
    %131 = vector.shape_cast %130 : vector<1x8x1x1xf32> to vector<8x1x1xf32>
    %132 = vector.broadcast %131 : vector<8x1x1xf32> to vector<8x8x8xf32>
    %133 = arith.mulf %129, %132 : vector<8x8x8xf32>
    %c0_163 = arith.constant 0 : index
    %c0_164 = arith.constant 0 : index
    %c1_165 = arith.constant 1 : index
    %134 = vector.load %arg6[%c0_163, %c0_164, %c1_165] : memref<8x10x10xf32, #tpu.memory_space<vmem>>, vector<8x8x8xf32>
    %c2_166 = arith.constant 2 : index
    %c0_167 = arith.constant 0 : index
    %c0_168 = arith.constant 0 : index
    %c1_169 = arith.constant 1 : index
    %135 = vector.load %arg2[%c2_166, %c0_167, %c0_168, %c1_169] : memref<3x8x1x9xf32, #tpu.memory_space<vmem>>, vector<1x8x1x1xf32>
    %136 = vector.shape_cast %135 : vector<1x8x1x1xf32> to vector<8x1x1xf32>
    %137 = vector.broadcast %136 : vector<8x1x1xf32> to vector<8x8x8xf32>
    %138 = arith.mulf %134, %137 : vector<8x8x8xf32>
    %139 = arith.addf %133, %138 : vector<8x8x8xf32>
    %c0_170 = arith.constant 0 : index
    %c0_171 = arith.constant 0 : index
    %c2_172 = arith.constant 2 : index
    %140 = vector.load %arg6[%c0_170, %c0_171, %c2_172] : memref<8x10x10xf32, #tpu.memory_space<vmem>>, vector<8x8x8xf32>
    %c2_173 = arith.constant 2 : index
    %c0_174 = arith.constant 0 : index
    %c0_175 = arith.constant 0 : index
    %c2_176 = arith.constant 2 : index
    %141 = vector.load %arg2[%c2_173, %c0_174, %c0_175, %c2_176] : memref<3x8x1x9xf32, #tpu.memory_space<vmem>>, vector<1x8x1x1xf32>
    %142 = vector.shape_cast %141 : vector<1x8x1x1xf32> to vector<8x1x1xf32>
    %143 = vector.broadcast %142 : vector<8x1x1xf32> to vector<8x8x8xf32>
    %144 = arith.mulf %140, %143 : vector<8x8x8xf32>
    %145 = arith.addf %139, %144 : vector<8x8x8xf32>
    %c0_177 = arith.constant 0 : index
    %c1_178 = arith.constant 1 : index
    %c0_179 = arith.constant 0 : index
    %146 = vector.load %arg6[%c0_177, %c1_178, %c0_179] : memref<8x10x10xf32, #tpu.memory_space<vmem>>, vector<8x8x8xf32>
    %c2_180 = arith.constant 2 : index
    %c0_181 = arith.constant 0 : index
    %c0_182 = arith.constant 0 : index
    %c3_183 = arith.constant 3 : index
    %147 = vector.load %arg2[%c2_180, %c0_181, %c0_182, %c3_183] : memref<3x8x1x9xf32, #tpu.memory_space<vmem>>, vector<1x8x1x1xf32>
    %148 = vector.shape_cast %147 : vector<1x8x1x1xf32> to vector<8x1x1xf32>
    %149 = vector.broadcast %148 : vector<8x1x1xf32> to vector<8x8x8xf32>
    %150 = arith.mulf %146, %149 : vector<8x8x8xf32>
    %151 = arith.addf %145, %150 : vector<8x8x8xf32>
    %c0_184 = arith.constant 0 : index
    %c1_185 = arith.constant 1 : index
    %c1_186 = arith.constant 1 : index
    %152 = vector.load %arg6[%c0_184, %c1_185, %c1_186] : memref<8x10x10xf32, #tpu.memory_space<vmem>>, vector<8x8x8xf32>
    %c2_187 = arith.constant 2 : index
    %c0_188 = arith.constant 0 : index
    %c0_189 = arith.constant 0 : index
    %c4_190 = arith.constant 4 : index
    %153 = vector.load %arg2[%c2_187, %c0_188, %c0_189, %c4_190] : memref<3x8x1x9xf32, #tpu.memory_space<vmem>>, vector<1x8x1x1xf32>
    %154 = vector.shape_cast %153 : vector<1x8x1x1xf32> to vector<8x1x1xf32>
    %155 = vector.broadcast %154 : vector<8x1x1xf32> to vector<8x8x8xf32>
    %156 = arith.mulf %152, %155 : vector<8x8x8xf32>
    %157 = arith.addf %151, %156 : vector<8x8x8xf32>
    %c0_191 = arith.constant 0 : index
    %c1_192 = arith.constant 1 : index
    %c2_193 = arith.constant 2 : index
    %158 = vector.load %arg6[%c0_191, %c1_192, %c2_193] : memref<8x10x10xf32, #tpu.memory_space<vmem>>, vector<8x8x8xf32>
    %c2_194 = arith.constant 2 : index
    %c0_195 = arith.constant 0 : index
    %c0_196 = arith.constant 0 : index
    %c5_197 = arith.constant 5 : index
    %159 = vector.load %arg2[%c2_194, %c0_195, %c0_196, %c5_197] : memref<3x8x1x9xf32, #tpu.memory_space<vmem>>, vector<1x8x1x1xf32>
    %160 = vector.shape_cast %159 : vector<1x8x1x1xf32> to vector<8x1x1xf32>
    %161 = vector.broadcast %160 : vector<8x1x1xf32> to vector<8x8x8xf32>
    %162 = arith.mulf %158, %161 : vector<8x8x8xf32>
    %163 = arith.addf %157, %162 : vector<8x8x8xf32>
    %c0_198 = arith.constant 0 : index
    %c2_199 = arith.constant 2 : index
    %c0_200 = arith.constant 0 : index
    %164 = vector.load %arg6[%c0_198, %c2_199, %c0_200] : memref<8x10x10xf32, #tpu.memory_space<vmem>>, vector<8x8x8xf32>
    %c2_201 = arith.constant 2 : index
    %c0_202 = arith.constant 0 : index
    %c0_203 = arith.constant 0 : index
    %c6_204 = arith.constant 6 : index
    %165 = vector.load %arg2[%c2_201, %c0_202, %c0_203, %c6_204] : memref<3x8x1x9xf32, #tpu.memory_space<vmem>>, vector<1x8x1x1xf32>
    %166 = vector.shape_cast %165 : vector<1x8x1x1xf32> to vector<8x1x1xf32>
    %167 = vector.broadcast %166 : vector<8x1x1xf32> to vector<8x8x8xf32>
    %168 = arith.mulf %164, %167 : vector<8x8x8xf32>
    %169 = arith.addf %163, %168 : vector<8x8x8xf32>
    %c0_205 = arith.constant 0 : index
    %c2_206 = arith.constant 2 : index
    %c1_207 = arith.constant 1 : index
    %170 = vector.load %arg6[%c0_205, %c2_206, %c1_207] : memref<8x10x10xf32, #tpu.memory_space<vmem>>, vector<8x8x8xf32>
    %c2_208 = arith.constant 2 : index
    %c0_209 = arith.constant 0 : index
    %c0_210 = arith.constant 0 : index
    %c7_211 = arith.constant 7 : index
    %171 = vector.load %arg2[%c2_208, %c0_209, %c0_210, %c7_211] : memref<3x8x1x9xf32, #tpu.memory_space<vmem>>, vector<1x8x1x1xf32>
    %172 = vector.shape_cast %171 : vector<1x8x1x1xf32> to vector<8x1x1xf32>
    %173 = vector.broadcast %172 : vector<8x1x1xf32> to vector<8x8x8xf32>
    %174 = arith.mulf %170, %173 : vector<8x8x8xf32>
    %175 = arith.addf %169, %174 : vector<8x8x8xf32>
    %c0_212 = arith.constant 0 : index
    %c2_213 = arith.constant 2 : index
    %c2_214 = arith.constant 2 : index
    %176 = vector.load %arg6[%c0_212, %c2_213, %c2_214] : memref<8x10x10xf32, #tpu.memory_space<vmem>>, vector<8x8x8xf32>
    %c2_215 = arith.constant 2 : index
    %c0_216 = arith.constant 0 : index
    %c0_217 = arith.constant 0 : index
    %c8_218 = arith.constant 8 : index
    %177 = vector.load %arg2[%c2_215, %c0_216, %c0_217, %c8_218] : memref<3x8x1x9xf32, #tpu.memory_space<vmem>>, vector<1x8x1x1xf32>
    %178 = vector.shape_cast %177 : vector<1x8x1x1xf32> to vector<8x1x1xf32>
    %179 = vector.broadcast %178 : vector<8x1x1xf32> to vector<8x8x8xf32>
    %180 = arith.mulf %176, %179 : vector<8x8x8xf32>
    %181 = arith.addf %175, %180 : vector<8x8x8xf32>
    %c2_219 = arith.constant 2 : index
    %c0_220 = arith.constant 0 : index
    %c0_221 = arith.constant 0 : index
    %c0_222 = arith.constant 0 : index
    %182 = vector.load %arg3[%c2_219, %c0_220, %c0_221, %c0_222] : memref<3x8x1x1xf32, #tpu.memory_space<vmem>>, vector<1x8x1x1xf32>
    %183 = vector.shape_cast %182 : vector<1x8x1x1xf32> to vector<8x1x1xf32>
    %184 = vector.broadcast %183 : vector<8x1x1xf32> to vector<8x8x8xf32>
    %185 = arith.addf %181, %184 : vector<8x8x8xf32>
    %c0_223 = arith.constant 0 : index
    %c0_224 = arith.constant 0 : index
    %c0_225 = arith.constant 0 : index
    %c0_226 = arith.constant 0 : index
    %186 = vector.load %arg4[%c0_223, %c0_224, %c0_225, %c0_226] : memref<1x8x8x8xf32, #tpu.memory_space<vmem>>, vector<1x8x8x8xf32>
    %187 = vector.shape_cast %186 : vector<1x8x8x8xf32> to vector<8x8x8xf32>
    %188 = vector.shape_cast %185 : vector<8x8x8xf32> to vector<1x8x8x8xf32>
    tpu.vector_store %arg4[%c0_223, %c0_224, %c0_225, %c0_226], %188 {strides = array<i32>} : memref<1x8x8x8xf32, #tpu.memory_space<vmem>>, vector<1x8x8x8xf32>,
    return
  }
  func.func @transform_0(%arg0: i32) -> (i32, i32, i32, i32, i32) {
    %c0_i32 = arith.constant 0 : i32
    %c0_i32_0 = arith.constant 0 : i32
    %c0_i32_1 = arith.constant 0 : i32
    %c0_i32_2 = arith.constant 0 : i32
    %c0_i32_3 = arith.constant 0 : i32
    return %arg0, %c0_i32, %c0_i32_0, %c0_i32_1, %c0_i32_2 : i32, i32, i32, i32, i32
  }
  func.func @transform_1(%arg0: i32) -> (i32, i32, i32, i32) {
    %c0_i32 = arith.constant 0 : i32
    %c0_i32_0 = arith.constant 0 : i32
    %c0_i32_1 = arith.constant 0 : i32
    %c0_i32_2 = arith.constant 0 : i32
    %c0_i32_3 = arith.constant 0 : i32
    return %c0_i32, %c0_i32_0, %c0_i32_1, %c0_i32_2 : i32, i32, i32, i32
  }
  func.func @transform_2(%arg0: i32) -> (i32, i32, i32, i32) {
    %c0_i32 = arith.constant 0 : i32
    %c0_i32_0 = arith.constant 0 : i32
    %c0_i32_1 = arith.constant 0 : i32
    %c0_i32_2 = arith.constant 0 : i32
    %c0_i32_3 = arith.constant 0 : i32
    return %c0_i32, %c0_i32_0, %c0_i32_1, %c0_i32_2 : i32, i32, i32, i32
  }
  func.func @transform_3(%arg0: i32) -> (i32, i32, i32, i32) {
    %c0_i32 = arith.constant 0 : i32
    %c0_i32_0 = arith.constant 0 : i32
    %c0_i32_1 = arith.constant 0 : i32
    %c0_i32_2 = arith.constant 0 : i32
    return %arg0, %c0_i32, %c0_i32_0, %c0_i32_1 : i32, i32, i32, i32
  }
}

module attributes {stable_mosaic.version = 11 : i64} {
  func.func @_dw_branch_kernel(%arg0: i32, %arg1: memref<1x4x4x9x9xf32, #tpu.memory_space<vmem>>, %arg2: memref<3x4x1x9xf32, #tpu.memory_space<vmem>>, %arg3: memref<3x4x1x1xf32, #tpu.memory_space<vmem>>, %arg4: memref<1x4x8x8xf32, #tpu.memory_space<vmem>>, %arg5: memref<4x10x10xf32, #tpu.memory_space<vmem>>, %arg6: memref<4x10x10xf32, #tpu.memory_space<vmem>>) attributes {dimension_semantics = [#tpu.dimension_semantics<parallel>], iteration_bounds = array<i64: 2>, scalar_prefetch = 0 : i64, scratch_operands = 2 : i64, tpu.core_type = #tpu.core_type<tc>, window_params = [{transform_indices = @transform_0, window_bounds = array<i64: 1, 4, 4, 9, 9>}, {pipeline_mode = #tpu.pipeline_mode<synchronous>, transform_indices = @transform_1, window_bounds = array<i64: 3, 4, 1, 9>}, {pipeline_mode = #tpu.pipeline_mode<synchronous>, transform_indices = @transform_2, window_bounds = array<i64: 3, 4, 1, 1>}, {transform_indices = @transform_3, window_bounds = array<i64: 1, 4, 8, 8>}]} {
    %c0 = arith.constant 0 : index
    %c0_0 = arith.constant 0 : index
    %c0_1 = arith.constant 0 : index
    %c0_2 = arith.constant 0 : index
    %c0_3 = arith.constant 0 : index
    %0 = vector.load %arg1[%c0, %c0_0, %c0_1, %c0_2, %c0_3] : memref<1x4x4x9x9xf32, #tpu.memory_space<vmem>>, vector<1x1x4x8x8xf32>
    %1 = vector.shape_cast %0 : vector<1x1x4x8x8xf32> to vector<4x8x8xf32>
    %c0_4 = arith.constant 0 : index
    %c0_5 = arith.constant 0 : index
    %c0_6 = arith.constant 0 : index
    %c0_7 = arith.constant 0 : index
    %2 = vector.load %arg2[%c0_4, %c0_5, %c0_6, %c0_7] : memref<3x4x1x9xf32, #tpu.memory_space<vmem>>, vector<1x4x1x1xf32>
    %3 = vector.shape_cast %2 : vector<1x4x1x1xf32> to vector<4x1x1xf32>
    %4 = vector.broadcast %3 : vector<4x1x1xf32> to vector<4x8x8xf32>
    %5 = arith.mulf %1, %4 : vector<4x8x8xf32>
    %c0_8 = arith.constant 0 : index
    %c1 = arith.constant 1 : index
    %c0_9 = arith.constant 0 : index
    %c0_10 = arith.constant 0 : index
    %c0_11 = arith.constant 0 : index
    %6 = vector.load %arg1[%c0_8, %c1, %c0_9, %c0_10, %c0_11] : memref<1x4x4x9x9xf32, #tpu.memory_space<vmem>>, vector<1x1x4x8x8xf32>
    %7 = vector.shape_cast %6 : vector<1x1x4x8x8xf32> to vector<4x8x8xf32>
    %c0_12 = arith.constant 0 : index
    %c0_13 = arith.constant 0 : index
    %c0_14 = arith.constant 0 : index
    %c1_15 = arith.constant 1 : index
    %8 = vector.load %arg2[%c0_12, %c0_13, %c0_14, %c1_15] : memref<3x4x1x9xf32, #tpu.memory_space<vmem>>, vector<1x4x1x1xf32>
    %9 = vector.shape_cast %8 : vector<1x4x1x1xf32> to vector<4x1x1xf32>
    %10 = vector.broadcast %9 : vector<4x1x1xf32> to vector<4x8x8xf32>
    %11 = arith.mulf %7, %10 : vector<4x8x8xf32>
    %12 = arith.addf %5, %11 : vector<4x8x8xf32>
    %c0_16 = arith.constant 0 : index
    %c0_17 = arith.constant 0 : index
    %c0_18 = arith.constant 0 : index
    %c0_19 = arith.constant 0 : index
    %c1_20 = arith.constant 1 : index
    %13 = vector.load %arg1[%c0_16, %c0_17, %c0_18, %c0_19, %c1_20] : memref<1x4x4x9x9xf32, #tpu.memory_space<vmem>>, vector<1x1x4x8x8xf32>
    %14 = vector.shape_cast %13 : vector<1x1x4x8x8xf32> to vector<4x8x8xf32>
    %c0_21 = arith.constant 0 : index
    %c0_22 = arith.constant 0 : index
    %c0_23 = arith.constant 0 : index
    %c2 = arith.constant 2 : index
    %15 = vector.load %arg2[%c0_21, %c0_22, %c0_23, %c2] : memref<3x4x1x9xf32, #tpu.memory_space<vmem>>, vector<1x4x1x1xf32>
    %16 = vector.shape_cast %15 : vector<1x4x1x1xf32> to vector<4x1x1xf32>
    %17 = vector.broadcast %16 : vector<4x1x1xf32> to vector<4x8x8xf32>
    %18 = arith.mulf %14, %17 : vector<4x8x8xf32>
    %19 = arith.addf %12, %18 : vector<4x8x8xf32>
    %c0_24 = arith.constant 0 : index
    %c2_25 = arith.constant 2 : index
    %c0_26 = arith.constant 0 : index
    %c0_27 = arith.constant 0 : index
    %c0_28 = arith.constant 0 : index
    %20 = vector.load %arg1[%c0_24, %c2_25, %c0_26, %c0_27, %c0_28] : memref<1x4x4x9x9xf32, #tpu.memory_space<vmem>>, vector<1x1x4x8x8xf32>
    %21 = vector.shape_cast %20 : vector<1x1x4x8x8xf32> to vector<4x8x8xf32>
    %c0_29 = arith.constant 0 : index
    %c0_30 = arith.constant 0 : index
    %c0_31 = arith.constant 0 : index
    %c3 = arith.constant 3 : index
    %22 = vector.load %arg2[%c0_29, %c0_30, %c0_31, %c3] : memref<3x4x1x9xf32, #tpu.memory_space<vmem>>, vector<1x4x1x1xf32>
    %23 = vector.shape_cast %22 : vector<1x4x1x1xf32> to vector<4x1x1xf32>
    %24 = vector.broadcast %23 : vector<4x1x1xf32> to vector<4x8x8xf32>
    %25 = arith.mulf %21, %24 : vector<4x8x8xf32>
    %26 = arith.addf %19, %25 : vector<4x8x8xf32>
    %c0_32 = arith.constant 0 : index
    %c3_33 = arith.constant 3 : index
    %c0_34 = arith.constant 0 : index
    %c0_35 = arith.constant 0 : index
    %c0_36 = arith.constant 0 : index
    %27 = vector.load %arg1[%c0_32, %c3_33, %c0_34, %c0_35, %c0_36] : memref<1x4x4x9x9xf32, #tpu.memory_space<vmem>>, vector<1x1x4x8x8xf32>
    %28 = vector.shape_cast %27 : vector<1x1x4x8x8xf32> to vector<4x8x8xf32>
    %c0_37 = arith.constant 0 : index
    %c0_38 = arith.constant 0 : index
    %c0_39 = arith.constant 0 : index
    %c4 = arith.constant 4 : index
    %29 = vector.load %arg2[%c0_37, %c0_38, %c0_39, %c4] : memref<3x4x1x9xf32, #tpu.memory_space<vmem>>, vector<1x4x1x1xf32>
    %30 = vector.shape_cast %29 : vector<1x4x1x1xf32> to vector<4x1x1xf32>
    %31 = vector.broadcast %30 : vector<4x1x1xf32> to vector<4x8x8xf32>
    %32 = arith.mulf %28, %31 : vector<4x8x8xf32>
    %33 = arith.addf %26, %32 : vector<4x8x8xf32>
    %c0_40 = arith.constant 0 : index
    %c2_41 = arith.constant 2 : index
    %c0_42 = arith.constant 0 : index
    %c0_43 = arith.constant 0 : index
    %c1_44 = arith.constant 1 : index
    %34 = vector.load %arg1[%c0_40, %c2_41, %c0_42, %c0_43, %c1_44] : memref<1x4x4x9x9xf32, #tpu.memory_space<vmem>>, vector<1x1x4x8x8xf32>
    %35 = vector.shape_cast %34 : vector<1x1x4x8x8xf32> to vector<4x8x8xf32>
    %c0_45 = arith.constant 0 : index
    %c0_46 = arith.constant 0 : index
    %c0_47 = arith.constant 0 : index
    %c5 = arith.constant 5 : index
    %36 = vector.load %arg2[%c0_45, %c0_46, %c0_47, %c5] : memref<3x4x1x9xf32, #tpu.memory_space<vmem>>, vector<1x4x1x1xf32>
    %37 = vector.shape_cast %36 : vector<1x4x1x1xf32> to vector<4x1x1xf32>
    %38 = vector.broadcast %37 : vector<4x1x1xf32> to vector<4x8x8xf32>
    %39 = arith.mulf %35, %38 : vector<4x8x8xf32>
    %40 = arith.addf %33, %39 : vector<4x8x8xf32>
    %c0_48 = arith.constant 0 : index
    %c0_49 = arith.constant 0 : index
    %c0_50 = arith.constant 0 : index
    %c1_51 = arith.constant 1 : index
    %c0_52 = arith.constant 0 : index
    %41 = vector.load %arg1[%c0_48, %c0_49, %c0_50, %c1_51, %c0_52] : memref<1x4x4x9x9xf32, #tpu.memory_space<vmem>>, vector<1x1x4x8x8xf32>
    %42 = vector.shape_cast %41 : vector<1x1x4x8x8xf32> to vector<4x8x8xf32>
    %c0_53 = arith.constant 0 : index
    %c0_54 = arith.constant 0 : index
    %c0_55 = arith.constant 0 : index
    %c6 = arith.constant 6 : index
    %43 = vector.load %arg2[%c0_53, %c0_54, %c0_55, %c6] : memref<3x4x1x9xf32, #tpu.memory_space<vmem>>, vector<1x4x1x1xf32>
    %44 = vector.shape_cast %43 : vector<1x4x1x1xf32> to vector<4x1x1xf32>
    %45 = vector.broadcast %44 : vector<4x1x1xf32> to vector<4x8x8xf32>
    %46 = arith.mulf %42, %45 : vector<4x8x8xf32>
    %47 = arith.addf %40, %46 : vector<4x8x8xf32>
    %c0_56 = arith.constant 0 : index
    %c1_57 = arith.constant 1 : index
    %c0_58 = arith.constant 0 : index
    %c1_59 = arith.constant 1 : index
    %c0_60 = arith.constant 0 : index
    %48 = vector.load %arg1[%c0_56, %c1_57, %c0_58, %c1_59, %c0_60] : memref<1x4x4x9x9xf32, #tpu.memory_space<vmem>>, vector<1x1x4x8x8xf32>
    %49 = vector.shape_cast %48 : vector<1x1x4x8x8xf32> to vector<4x8x8xf32>
    %c0_61 = arith.constant 0 : index
    %c0_62 = arith.constant 0 : index
    %c0_63 = arith.constant 0 : index
    %c7 = arith.constant 7 : index
    %50 = vector.load %arg2[%c0_61, %c0_62, %c0_63, %c7] : memref<3x4x1x9xf32, #tpu.memory_space<vmem>>, vector<1x4x1x1xf32>
    %51 = vector.shape_cast %50 : vector<1x4x1x1xf32> to vector<4x1x1xf32>
    %52 = vector.broadcast %51 : vector<4x1x1xf32> to vector<4x8x8xf32>
    %53 = arith.mulf %49, %52 : vector<4x8x8xf32>
    %54 = arith.addf %47, %53 : vector<4x8x8xf32>
    %c0_64 = arith.constant 0 : index
    %c0_65 = arith.constant 0 : index
    %c0_66 = arith.constant 0 : index
    %c1_67 = arith.constant 1 : index
    %c1_68 = arith.constant 1 : index
    %55 = vector.load %arg1[%c0_64, %c0_65, %c0_66, %c1_67, %c1_68] : memref<1x4x4x9x9xf32, #tpu.memory_space<vmem>>, vector<1x1x4x8x8xf32>
    %56 = vector.shape_cast %55 : vector<1x1x4x8x8xf32> to vector<4x8x8xf32>
    %c0_69 = arith.constant 0 : index
    %c0_70 = arith.constant 0 : index
    %c0_71 = arith.constant 0 : index
    %c8 = arith.constant 8 : index
    %57 = vector.load %arg2[%c0_69, %c0_70, %c0_71, %c8] : memref<3x4x1x9xf32, #tpu.memory_space<vmem>>, vector<1x4x1x1xf32>
    %58 = vector.shape_cast %57 : vector<1x4x1x1xf32> to vector<4x1x1xf32>
    %59 = vector.broadcast %58 : vector<4x1x1xf32> to vector<4x8x8xf32>
    %60 = arith.mulf %56, %59 : vector<4x8x8xf32>
    %61 = arith.addf %54, %60 : vector<4x8x8xf32>
    %cst = arith.constant 0.000000e+00 : f32
    %62 = vector.broadcast %cst : f32 to vector<4x10x10xf32>
    %c0_72 = arith.constant 0 : index
    %c0_73 = arith.constant 0 : index
    %c0_74 = arith.constant 0 : index
    %63 = vector.load %arg5[%c0_72, %c0_73, %c0_74] : memref<4x10x10xf32, #tpu.memory_space<vmem>>, vector<4x10x10xf32>
    tpu.vector_store %arg5[%c0_72, %c0_73, %c0_74], %62 {strides = array<i32>} : memref<4x10x10xf32, #tpu.memory_space<vmem>>, vector<4x10x10xf32>,
    %c0_75 = arith.constant 0 : index
    %c0_76 = arith.constant 0 : index
    %c0_77 = arith.constant 0 : index
    %c0_78 = arith.constant 0 : index
    %64 = vector.load %arg3[%c0_75, %c0_76, %c0_77, %c0_78] : memref<3x4x1x1xf32, #tpu.memory_space<vmem>>, vector<1x4x1x1xf32>
    %65 = vector.shape_cast %64 : vector<1x4x1x1xf32> to vector<4x1x1xf32>
    %66 = vector.broadcast %65 : vector<4x1x1xf32> to vector<4x8x8xf32>
    %67 = arith.addf %61, %66 : vector<4x8x8xf32>
    %c0_79 = arith.constant 0 : index
    %c1_80 = arith.constant 1 : index
    %c1_81 = arith.constant 1 : index
    %68 = vector.load %arg5[%c0_79, %c1_80, %c1_81] : memref<4x10x10xf32, #tpu.memory_space<vmem>>, vector<4x8x8xf32>
    tpu.vector_store %arg5[%c0_79, %c1_80, %c1_81], %67 {strides = array<i32>} : memref<4x10x10xf32, #tpu.memory_space<vmem>>, vector<4x8x8xf32>,
    %c0_82 = arith.constant 0 : index
    %c0_83 = arith.constant 0 : index
    %c0_84 = arith.constant 0 : index
    %69 = vector.load %arg5[%c0_82, %c0_83, %c0_84] : memref<4x10x10xf32, #tpu.memory_space<vmem>>, vector<4x8x8xf32>
    %c1_85 = arith.constant 1 : index
    %c0_86 = arith.constant 0 : index
    %c0_87 = arith.constant 0 : index
    %c0_88 = arith.constant 0 : index
    %70 = vector.load %arg2[%c1_85, %c0_86, %c0_87, %c0_88] : memref<3x4x1x9xf32, #tpu.memory_space<vmem>>, vector<1x4x1x1xf32>
    %71 = vector.shape_cast %70 : vector<1x4x1x1xf32> to vector<4x1x1xf32>
    %72 = vector.broadcast %71 : vector<4x1x1xf32> to vector<4x8x8xf32>
    %73 = arith.mulf %69, %72 : vector<4x8x8xf32>
    %c0_89 = arith.constant 0 : index
    %c0_90 = arith.constant 0 : index
    %c1_91 = arith.constant 1 : index
    %74 = vector.load %arg5[%c0_89, %c0_90, %c1_91] : memref<4x10x10xf32, #tpu.memory_space<vmem>>, vector<4x8x8xf32>
    %c1_92 = arith.constant 1 : index
    %c0_93 = arith.constant 0 : index
    %c0_94 = arith.constant 0 : index
    %c1_95 = arith.constant 1 : index
    %75 = vector.load %arg2[%c1_92, %c0_93, %c0_94, %c1_95] : memref<3x4x1x9xf32, #tpu.memory_space<vmem>>, vector<1x4x1x1xf32>
    %76 = vector.shape_cast %75 : vector<1x4x1x1xf32> to vector<4x1x1xf32>
    %77 = vector.broadcast %76 : vector<4x1x1xf32> to vector<4x8x8xf32>
    %78 = arith.mulf %74, %77 : vector<4x8x8xf32>
    %79 = arith.addf %73, %78 : vector<4x8x8xf32>
    %c0_96 = arith.constant 0 : index
    %c0_97 = arith.constant 0 : index
    %c2_98 = arith.constant 2 : index
    %80 = vector.load %arg5[%c0_96, %c0_97, %c2_98] : memref<4x10x10xf32, #tpu.memory_space<vmem>>, vector<4x8x8xf32>
    %c1_99 = arith.constant 1 : index
    %c0_100 = arith.constant 0 : index
    %c0_101 = arith.constant 0 : index
    %c2_102 = arith.constant 2 : index
    %81 = vector.load %arg2[%c1_99, %c0_100, %c0_101, %c2_102] : memref<3x4x1x9xf32, #tpu.memory_space<vmem>>, vector<1x4x1x1xf32>
    %82 = vector.shape_cast %81 : vector<1x4x1x1xf32> to vector<4x1x1xf32>
    %83 = vector.broadcast %82 : vector<4x1x1xf32> to vector<4x8x8xf32>
    %84 = arith.mulf %80, %83 : vector<4x8x8xf32>
    %85 = arith.addf %79, %84 : vector<4x8x8xf32>
    %c0_103 = arith.constant 0 : index
    %c1_104 = arith.constant 1 : index
    %c0_105 = arith.constant 0 : index
    %86 = vector.load %arg5[%c0_103, %c1_104, %c0_105] : memref<4x10x10xf32, #tpu.memory_space<vmem>>, vector<4x8x8xf32>
    %c1_106 = arith.constant 1 : index
    %c0_107 = arith.constant 0 : index
    %c0_108 = arith.constant 0 : index
    %c3_109 = arith.constant 3 : index
    %87 = vector.load %arg2[%c1_106, %c0_107, %c0_108, %c3_109] : memref<3x4x1x9xf32, #tpu.memory_space<vmem>>, vector<1x4x1x1xf32>
    %88 = vector.shape_cast %87 : vector<1x4x1x1xf32> to vector<4x1x1xf32>
    %89 = vector.broadcast %88 : vector<4x1x1xf32> to vector<4x8x8xf32>
    %90 = arith.mulf %86, %89 : vector<4x8x8xf32>
    %91 = arith.addf %85, %90 : vector<4x8x8xf32>
    %c0_110 = arith.constant 0 : index
    %c1_111 = arith.constant 1 : index
    %c1_112 = arith.constant 1 : index
    %92 = vector.load %arg5[%c0_110, %c1_111, %c1_112] : memref<4x10x10xf32, #tpu.memory_space<vmem>>, vector<4x8x8xf32>
    %c1_113 = arith.constant 1 : index
    %c0_114 = arith.constant 0 : index
    %c0_115 = arith.constant 0 : index
    %c4_116 = arith.constant 4 : index
    %93 = vector.load %arg2[%c1_113, %c0_114, %c0_115, %c4_116] : memref<3x4x1x9xf32, #tpu.memory_space<vmem>>, vector<1x4x1x1xf32>
    %94 = vector.shape_cast %93 : vector<1x4x1x1xf32> to vector<4x1x1xf32>
    %95 = vector.broadcast %94 : vector<4x1x1xf32> to vector<4x8x8xf32>
    %96 = arith.mulf %92, %95 : vector<4x8x8xf32>
    %97 = arith.addf %91, %96 : vector<4x8x8xf32>
    %c0_117 = arith.constant 0 : index
    %c1_118 = arith.constant 1 : index
    %c2_119 = arith.constant 2 : index
    %98 = vector.load %arg5[%c0_117, %c1_118, %c2_119] : memref<4x10x10xf32, #tpu.memory_space<vmem>>, vector<4x8x8xf32>
    %c1_120 = arith.constant 1 : index
    %c0_121 = arith.constant 0 : index
    %c0_122 = arith.constant 0 : index
    %c5_123 = arith.constant 5 : index
    %99 = vector.load %arg2[%c1_120, %c0_121, %c0_122, %c5_123] : memref<3x4x1x9xf32, #tpu.memory_space<vmem>>, vector<1x4x1x1xf32>
    %100 = vector.shape_cast %99 : vector<1x4x1x1xf32> to vector<4x1x1xf32>
    %101 = vector.broadcast %100 : vector<4x1x1xf32> to vector<4x8x8xf32>
    %102 = arith.mulf %98, %101 : vector<4x8x8xf32>
    %103 = arith.addf %97, %102 : vector<4x8x8xf32>
    %c0_124 = arith.constant 0 : index
    %c2_125 = arith.constant 2 : index
    %c0_126 = arith.constant 0 : index
    %104 = vector.load %arg5[%c0_124, %c2_125, %c0_126] : memref<4x10x10xf32, #tpu.memory_space<vmem>>, vector<4x8x8xf32>
    %c1_127 = arith.constant 1 : index
    %c0_128 = arith.constant 0 : index
    %c0_129 = arith.constant 0 : index
    %c6_130 = arith.constant 6 : index
    %105 = vector.load %arg2[%c1_127, %c0_128, %c0_129, %c6_130] : memref<3x4x1x9xf32, #tpu.memory_space<vmem>>, vector<1x4x1x1xf32>
    %106 = vector.shape_cast %105 : vector<1x4x1x1xf32> to vector<4x1x1xf32>
    %107 = vector.broadcast %106 : vector<4x1x1xf32> to vector<4x8x8xf32>
    %108 = arith.mulf %104, %107 : vector<4x8x8xf32>
    %109 = arith.addf %103, %108 : vector<4x8x8xf32>
    %c0_131 = arith.constant 0 : index
    %c2_132 = arith.constant 2 : index
    %c1_133 = arith.constant 1 : index
    %110 = vector.load %arg5[%c0_131, %c2_132, %c1_133] : memref<4x10x10xf32, #tpu.memory_space<vmem>>, vector<4x8x8xf32>
    %c1_134 = arith.constant 1 : index
    %c0_135 = arith.constant 0 : index
    %c0_136 = arith.constant 0 : index
    %c7_137 = arith.constant 7 : index
    %111 = vector.load %arg2[%c1_134, %c0_135, %c0_136, %c7_137] : memref<3x4x1x9xf32, #tpu.memory_space<vmem>>, vector<1x4x1x1xf32>
    %112 = vector.shape_cast %111 : vector<1x4x1x1xf32> to vector<4x1x1xf32>
    %113 = vector.broadcast %112 : vector<4x1x1xf32> to vector<4x8x8xf32>
    %114 = arith.mulf %110, %113 : vector<4x8x8xf32>
    %115 = arith.addf %109, %114 : vector<4x8x8xf32>
    %c0_138 = arith.constant 0 : index
    %c2_139 = arith.constant 2 : index
    %c2_140 = arith.constant 2 : index
    %116 = vector.load %arg5[%c0_138, %c2_139, %c2_140] : memref<4x10x10xf32, #tpu.memory_space<vmem>>, vector<4x8x8xf32>
    %c1_141 = arith.constant 1 : index
    %c0_142 = arith.constant 0 : index
    %c0_143 = arith.constant 0 : index
    %c8_144 = arith.constant 8 : index
    %117 = vector.load %arg2[%c1_141, %c0_142, %c0_143, %c8_144] : memref<3x4x1x9xf32, #tpu.memory_space<vmem>>, vector<1x4x1x1xf32>
    %118 = vector.shape_cast %117 : vector<1x4x1x1xf32> to vector<4x1x1xf32>
    %119 = vector.broadcast %118 : vector<4x1x1xf32> to vector<4x8x8xf32>
    %120 = arith.mulf %116, %119 : vector<4x8x8xf32>
    %121 = arith.addf %115, %120 : vector<4x8x8xf32>
    %cst_145 = arith.constant 0.000000e+00 : f32
    %122 = vector.broadcast %cst_145 : f32 to vector<4x10x10xf32>
    %c0_146 = arith.constant 0 : index
    %c0_147 = arith.constant 0 : index
    %c0_148 = arith.constant 0 : index
    %123 = vector.load %arg6[%c0_146, %c0_147, %c0_148] : memref<4x10x10xf32, #tpu.memory_space<vmem>>, vector<4x10x10xf32>
    tpu.vector_store %arg6[%c0_146, %c0_147, %c0_148], %122 {strides = array<i32>} : memref<4x10x10xf32, #tpu.memory_space<vmem>>, vector<4x10x10xf32>,
    %c1_149 = arith.constant 1 : index
    %c0_150 = arith.constant 0 : index
    %c0_151 = arith.constant 0 : index
    %c0_152 = arith.constant 0 : index
    %124 = vector.load %arg3[%c1_149, %c0_150, %c0_151, %c0_152] : memref<3x4x1x1xf32, #tpu.memory_space<vmem>>, vector<1x4x1x1xf32>
    %125 = vector.shape_cast %124 : vector<1x4x1x1xf32> to vector<4x1x1xf32>
    %126 = vector.broadcast %125 : vector<4x1x1xf32> to vector<4x8x8xf32>
    %127 = arith.addf %121, %126 : vector<4x8x8xf32>
    %c0_153 = arith.constant 0 : index
    %c1_154 = arith.constant 1 : index
    %c1_155 = arith.constant 1 : index
    %128 = vector.load %arg6[%c0_153, %c1_154, %c1_155] : memref<4x10x10xf32, #tpu.memory_space<vmem>>, vector<4x8x8xf32>
    tpu.vector_store %arg6[%c0_153, %c1_154, %c1_155], %127 {strides = array<i32>} : memref<4x10x10xf32, #tpu.memory_space<vmem>>, vector<4x8x8xf32>,
    %c0_156 = arith.constant 0 : index
    %c0_157 = arith.constant 0 : index
    %c0_158 = arith.constant 0 : index
    %129 = vector.load %arg6[%c0_156, %c0_157, %c0_158] : memref<4x10x10xf32, #tpu.memory_space<vmem>>, vector<4x8x8xf32>
    %c2_159 = arith.constant 2 : index
    %c0_160 = arith.constant 0 : index
    %c0_161 = arith.constant 0 : index
    %c0_162 = arith.constant 0 : index
    %130 = vector.load %arg2[%c2_159, %c0_160, %c0_161, %c0_162] : memref<3x4x1x9xf32, #tpu.memory_space<vmem>>, vector<1x4x1x1xf32>
    %131 = vector.shape_cast %130 : vector<1x4x1x1xf32> to vector<4x1x1xf32>
    %132 = vector.broadcast %131 : vector<4x1x1xf32> to vector<4x8x8xf32>
    %133 = arith.mulf %129, %132 : vector<4x8x8xf32>
    %c0_163 = arith.constant 0 : index
    %c0_164 = arith.constant 0 : index
    %c1_165 = arith.constant 1 : index
    %134 = vector.load %arg6[%c0_163, %c0_164, %c1_165] : memref<4x10x10xf32, #tpu.memory_space<vmem>>, vector<4x8x8xf32>
    %c2_166 = arith.constant 2 : index
    %c0_167 = arith.constant 0 : index
    %c0_168 = arith.constant 0 : index
    %c1_169 = arith.constant 1 : index
    %135 = vector.load %arg2[%c2_166, %c0_167, %c0_168, %c1_169] : memref<3x4x1x9xf32, #tpu.memory_space<vmem>>, vector<1x4x1x1xf32>
    %136 = vector.shape_cast %135 : vector<1x4x1x1xf32> to vector<4x1x1xf32>
    %137 = vector.broadcast %136 : vector<4x1x1xf32> to vector<4x8x8xf32>
    %138 = arith.mulf %134, %137 : vector<4x8x8xf32>
    %139 = arith.addf %133, %138 : vector<4x8x8xf32>
    %c0_170 = arith.constant 0 : index
    %c0_171 = arith.constant 0 : index
    %c2_172 = arith.constant 2 : index
    %140 = vector.load %arg6[%c0_170, %c0_171, %c2_172] : memref<4x10x10xf32, #tpu.memory_space<vmem>>, vector<4x8x8xf32>
    %c2_173 = arith.constant 2 : index
    %c0_174 = arith.constant 0 : index
    %c0_175 = arith.constant 0 : index
    %c2_176 = arith.constant 2 : index
    %141 = vector.load %arg2[%c2_173, %c0_174, %c0_175, %c2_176] : memref<3x4x1x9xf32, #tpu.memory_space<vmem>>, vector<1x4x1x1xf32>
    %142 = vector.shape_cast %141 : vector<1x4x1x1xf32> to vector<4x1x1xf32>
    %143 = vector.broadcast %142 : vector<4x1x1xf32> to vector<4x8x8xf32>
    %144 = arith.mulf %140, %143 : vector<4x8x8xf32>
    %145 = arith.addf %139, %144 : vector<4x8x8xf32>
    %c0_177 = arith.constant 0 : index
    %c1_178 = arith.constant 1 : index
    %c0_179 = arith.constant 0 : index
    %146 = vector.load %arg6[%c0_177, %c1_178, %c0_179] : memref<4x10x10xf32, #tpu.memory_space<vmem>>, vector<4x8x8xf32>
    %c2_180 = arith.constant 2 : index
    %c0_181 = arith.constant 0 : index
    %c0_182 = arith.constant 0 : index
    %c3_183 = arith.constant 3 : index
    %147 = vector.load %arg2[%c2_180, %c0_181, %c0_182, %c3_183] : memref<3x4x1x9xf32, #tpu.memory_space<vmem>>, vector<1x4x1x1xf32>
    %148 = vector.shape_cast %147 : vector<1x4x1x1xf32> to vector<4x1x1xf32>
    %149 = vector.broadcast %148 : vector<4x1x1xf32> to vector<4x8x8xf32>
    %150 = arith.mulf %146, %149 : vector<4x8x8xf32>
    %151 = arith.addf %145, %150 : vector<4x8x8xf32>
    %c0_184 = arith.constant 0 : index
    %c1_185 = arith.constant 1 : index
    %c1_186 = arith.constant 1 : index
    %152 = vector.load %arg6[%c0_184, %c1_185, %c1_186] : memref<4x10x10xf32, #tpu.memory_space<vmem>>, vector<4x8x8xf32>
    %c2_187 = arith.constant 2 : index
    %c0_188 = arith.constant 0 : index
    %c0_189 = arith.constant 0 : index
    %c4_190 = arith.constant 4 : index
    %153 = vector.load %arg2[%c2_187, %c0_188, %c0_189, %c4_190] : memref<3x4x1x9xf32, #tpu.memory_space<vmem>>, vector<1x4x1x1xf32>
    %154 = vector.shape_cast %153 : vector<1x4x1x1xf32> to vector<4x1x1xf32>
    %155 = vector.broadcast %154 : vector<4x1x1xf32> to vector<4x8x8xf32>
    %156 = arith.mulf %152, %155 : vector<4x8x8xf32>
    %157 = arith.addf %151, %156 : vector<4x8x8xf32>
    %c0_191 = arith.constant 0 : index
    %c1_192 = arith.constant 1 : index
    %c2_193 = arith.constant 2 : index
    %158 = vector.load %arg6[%c0_191, %c1_192, %c2_193] : memref<4x10x10xf32, #tpu.memory_space<vmem>>, vector<4x8x8xf32>
    %c2_194 = arith.constant 2 : index
    %c0_195 = arith.constant 0 : index
    %c0_196 = arith.constant 0 : index
    %c5_197 = arith.constant 5 : index
    %159 = vector.load %arg2[%c2_194, %c0_195, %c0_196, %c5_197] : memref<3x4x1x9xf32, #tpu.memory_space<vmem>>, vector<1x4x1x1xf32>
    %160 = vector.shape_cast %159 : vector<1x4x1x1xf32> to vector<4x1x1xf32>
    %161 = vector.broadcast %160 : vector<4x1x1xf32> to vector<4x8x8xf32>
    %162 = arith.mulf %158, %161 : vector<4x8x8xf32>
    %163 = arith.addf %157, %162 : vector<4x8x8xf32>
    %c0_198 = arith.constant 0 : index
    %c2_199 = arith.constant 2 : index
    %c0_200 = arith.constant 0 : index
    %164 = vector.load %arg6[%c0_198, %c2_199, %c0_200] : memref<4x10x10xf32, #tpu.memory_space<vmem>>, vector<4x8x8xf32>
    %c2_201 = arith.constant 2 : index
    %c0_202 = arith.constant 0 : index
    %c0_203 = arith.constant 0 : index
    %c6_204 = arith.constant 6 : index
    %165 = vector.load %arg2[%c2_201, %c0_202, %c0_203, %c6_204] : memref<3x4x1x9xf32, #tpu.memory_space<vmem>>, vector<1x4x1x1xf32>
    %166 = vector.shape_cast %165 : vector<1x4x1x1xf32> to vector<4x1x1xf32>
    %167 = vector.broadcast %166 : vector<4x1x1xf32> to vector<4x8x8xf32>
    %168 = arith.mulf %164, %167 : vector<4x8x8xf32>
    %169 = arith.addf %163, %168 : vector<4x8x8xf32>
    %c0_205 = arith.constant 0 : index
    %c2_206 = arith.constant 2 : index
    %c1_207 = arith.constant 1 : index
    %170 = vector.load %arg6[%c0_205, %c2_206, %c1_207] : memref<4x10x10xf32, #tpu.memory_space<vmem>>, vector<4x8x8xf32>
    %c2_208 = arith.constant 2 : index
    %c0_209 = arith.constant 0 : index
    %c0_210 = arith.constant 0 : index
    %c7_211 = arith.constant 7 : index
    %171 = vector.load %arg2[%c2_208, %c0_209, %c0_210, %c7_211] : memref<3x4x1x9xf32, #tpu.memory_space<vmem>>, vector<1x4x1x1xf32>
    %172 = vector.shape_cast %171 : vector<1x4x1x1xf32> to vector<4x1x1xf32>
    %173 = vector.broadcast %172 : vector<4x1x1xf32> to vector<4x8x8xf32>
    %174 = arith.mulf %170, %173 : vector<4x8x8xf32>
    %175 = arith.addf %169, %174 : vector<4x8x8xf32>
    %c0_212 = arith.constant 0 : index
    %c2_213 = arith.constant 2 : index
    %c2_214 = arith.constant 2 : index
    %176 = vector.load %arg6[%c0_212, %c2_213, %c2_214] : memref<4x10x10xf32, #tpu.memory_space<vmem>>, vector<4x8x8xf32>
    %c2_215 = arith.constant 2 : index
    %c0_216 = arith.constant 0 : index
    %c0_217 = arith.constant 0 : index
    %c8_218 = arith.constant 8 : index
    %177 = vector.load %arg2[%c2_215, %c0_216, %c0_217, %c8_218] : memref<3x4x1x9xf32, #tpu.memory_space<vmem>>, vector<1x4x1x1xf32>
    %178 = vector.shape_cast %177 : vector<1x4x1x1xf32> to vector<4x1x1xf32>
    %179 = vector.broadcast %178 : vector<4x1x1xf32> to vector<4x8x8xf32>
    %180 = arith.mulf %176, %179 : vector<4x8x8xf32>
    %181 = arith.addf %175, %180 : vector<4x8x8xf32>
    %c2_219 = arith.constant 2 : index
    %c0_220 = arith.constant 0 : index
    %c0_221 = arith.constant 0 : index
    %c0_222 = arith.constant 0 : index
    %182 = vector.load %arg3[%c2_219, %c0_220, %c0_221, %c0_222] : memref<3x4x1x1xf32, #tpu.memory_space<vmem>>, vector<1x4x1x1xf32>
    %183 = vector.shape_cast %182 : vector<1x4x1x1xf32> to vector<4x1x1xf32>
    %184 = vector.broadcast %183 : vector<4x1x1xf32> to vector<4x8x8xf32>
    %185 = arith.addf %181, %184 : vector<4x8x8xf32>
    %c0_223 = arith.constant 0 : index
    %c0_224 = arith.constant 0 : index
    %c0_225 = arith.constant 0 : index
    %c0_226 = arith.constant 0 : index
    %186 = vector.load %arg4[%c0_223, %c0_224, %c0_225, %c0_226] : memref<1x4x8x8xf32, #tpu.memory_space<vmem>>, vector<1x4x8x8xf32>
    %187 = vector.shape_cast %186 : vector<1x4x8x8xf32> to vector<4x8x8xf32>
    %188 = vector.shape_cast %185 : vector<4x8x8xf32> to vector<1x4x8x8xf32>
    tpu.vector_store %arg4[%c0_223, %c0_224, %c0_225, %c0_226], %188 {strides = array<i32>} : memref<1x4x8x8xf32, #tpu.memory_space<vmem>>, vector<1x4x8x8xf32>,
    return
  }
  func.func @transform_0(%arg0: i32) -> (i32, i32, i32, i32, i32) {
    %c0_i32 = arith.constant 0 : i32
    %c0_i32_0 = arith.constant 0 : i32
    %c0_i32_1 = arith.constant 0 : i32
    %c0_i32_2 = arith.constant 0 : i32
    %c0_i32_3 = arith.constant 0 : i32
    return %arg0, %c0_i32, %c0_i32_0, %c0_i32_1, %c0_i32_2 : i32, i32, i32, i32, i32
  }
  func.func @transform_1(%arg0: i32) -> (i32, i32, i32, i32) {
    %c0_i32 = arith.constant 0 : i32
    %c0_i32_0 = arith.constant 0 : i32
    %c0_i32_1 = arith.constant 0 : i32
    %c0_i32_2 = arith.constant 0 : i32
    %c0_i32_3 = arith.constant 0 : i32
    return %c0_i32, %c0_i32_0, %c0_i32_1, %c0_i32_2 : i32, i32, i32, i32
  }
  func.func @transform_2(%arg0: i32) -> (i32, i32, i32, i32) {
    %c0_i32 = arith.constant 0 : i32
    %c0_i32_0 = arith.constant 0 : i32
    %c0_i32_1 = arith.constant 0 : i32
    %c0_i32_2 = arith.constant 0 : i32
    %c0_i32_3 = arith.constant 0 : i32
    return %c0_i32, %c0_i32_0, %c0_i32_1, %c0_i32_2 : i32, i32, i32, i32
  }
  func.func @transform_3(%arg0: i32) -> (i32, i32, i32, i32) {
    %c0_i32 = arith.constant 0 : i32
    %c0_i32_0 = arith.constant 0 : i32
    %c0_i32_1 = arith.constant 0 : i32
    %c0_i32_2 = arith.constant 0 : i32
    return %arg0, %c0_i32, %c0_i32_0, %c0_i32_1 : i32, i32, i32, i32
  }
}

module attributes {stable_mosaic.version = 11 : i64} {
  func.func @_sgcn_kernel(%arg0: i32, %arg1: memref<1x8x64xf32, #tpu.memory_space<vmem>>, %arg2: memref<1x4x64xf32, #tpu.memory_space<vmem>>, %arg3: memref<12x8xf32, #tpu.memory_space<vmem>>, %arg4: memref<12x1xf32, #tpu.memory_space<vmem>>, %arg5: memref<4x4xf32, #tpu.memory_space<vmem>>, %arg6: memref<4x1xf32, #tpu.memory_space<vmem>>, %arg7: memref<1x4x64xf32, #tpu.memory_space<vmem>>) attributes {dimension_semantics = [#tpu.dimension_semantics<parallel>], iteration_bounds = array<i64: 2>, scalar_prefetch = 0 : i64, scratch_operands = 0 : i64, tpu.core_type = #tpu.core_type<tc>, window_params = [{transform_indices = @transform_0, window_bounds = array<i64: 1, 8, 64>}, {transform_indices = @transform_1, window_bounds = array<i64: 1, 4, 64>}, {pipeline_mode = #tpu.pipeline_mode<synchronous>, transform_indices = @transform_2, window_bounds = array<i64: 12, 8>}, {pipeline_mode = #tpu.pipeline_mode<synchronous>, transform_indices = @transform_3, window_bounds = array<i64: 12, 1>}, {pipeline_mode = #tpu.pipeline_mode<synchronous>, transform_indices = @transform_4, window_bounds = array<i64: 4, 4>}, {pipeline_mode = #tpu.pipeline_mode<synchronous>, transform_indices = @transform_5, window_bounds = array<i64: 4, 1>}, {transform_indices = @transform_6, window_bounds = array<i64: 1, 4, 64>}]} {
    %c0 = arith.constant 0 : index
    %c0_0 = arith.constant 0 : index
    %c0_1 = arith.constant 0 : index
    %0 = vector.load %arg1[%c0, %c0_0, %c0_1] : memref<1x8x64xf32, #tpu.memory_space<vmem>>, vector<1x8x64xf32>
    %1 = vector.shape_cast %0 : vector<1x8x64xf32> to vector<8x64xf32>
    %c0_2 = arith.constant 0 : index
    %c0_3 = arith.constant 0 : index
    %c0_4 = arith.constant 0 : index
    %2 = vector.load %arg2[%c0_2, %c0_3, %c0_4] : memref<1x4x64xf32, #tpu.memory_space<vmem>>, vector<1x4x64xf32>
    %3 = vector.shape_cast %2 : vector<1x4x64xf32> to vector<4x64xf32>
    %c0_5 = arith.constant 0 : index
    %c0_6 = arith.constant 0 : index
    %4 = vector.load %arg3[%c0_5, %c0_6] : memref<12x8xf32, #tpu.memory_space<vmem>>, vector<12x8xf32>
    %cst = arith.constant dense<0.000000e+00> : vector<12x64xf32>
    %5 = tpu.matmul %4, %1, %cst {dimension_numbers = #tpu.dot_dimension_numbers<[1], [0], [0], [1], [0, 0, 1, 1], [], []>} : vector<12x8xf32>, vector<8x64xf32>, vector<12x64xf32> -> vector<12x64xf32>
    %c0_7 = arith.constant 0 : index
    %c0_8 = arith.constant 0 : index
    %6 = vector.load %arg4[%c0_7, %c0_8] : memref<12x1xf32, #tpu.memory_space<vmem>>, vector<12x1xf32>
    %7 = vector.broadcast %6 : vector<12x1xf32> to vector<12x64xf32>
    %8 = arith.addf %5, %7 : vector<12x64xf32>
    %9 = vector.extract_strided_slice %8 {offsets = [0, 0], sizes = [4, 64], strides = [1, 1]} : vector<12x64xf32> to vector<4x64xf32>
    %10 = vector.extract_strided_slice %8 {offsets = [4, 0], sizes = [4, 64], strides = [1, 1]} : vector<12x64xf32> to vector<4x64xf32>
    %11 = vector.extract_strided_slice %8 {offsets = [8, 0], sizes = [4, 64], strides = [1, 1]} : vector<12x64xf32> to vector<4x64xf32>
    %cst_9 = arith.constant dense<0.000000e+00> : vector<4x4xf32>
    %12 = tpu.matmul %10, %9, %cst_9 {dimension_numbers = #tpu.dot_dimension_numbers<[1], [1], [0], [0], [0, 0, 1, 0], [], []>} : vector<4x64xf32>, vector<4x64xf32>, vector<4x4xf32> -> vector<4x4xf32>
    %cst_10 = arith.constant dense<0xFF800000> : vector<4xf32>
    %13 = vector.multi_reduction <maximumf>, %12, %cst_10 [1] : vector<4x4xf32> to vector<4xf32>
    %14 = vector.shape_cast %13 : vector<4xf32> to vector<4x1xf32>
    %15 = vector.broadcast %14 : vector<4x1xf32> to vector<4x4xf32>
    %16 = arith.subf %12, %15 : vector<4x4xf32>
    %17 = math.exp %16 : vector<4x4xf32>
    %cst_11 = arith.constant dense<0.000000e+00> : vector<4xf32>
    %18 = vector.multi_reduction <add>, %17, %cst_11 [1] : vector<4x4xf32> to vector<4xf32>
    %19 = vector.shape_cast %18 : vector<4xf32> to vector<4x1xf32>
    %20 = tpu.reciprocal %19 {approx = true} : vector<4x1xf32> -> vector<4x1xf32>
    %21 = vector.broadcast %20 : vector<4x1xf32> to vector<4x4xf32>
    %22 = arith.mulf %17, %21 : vector<4x4xf32>
    %cst_12 = arith.constant dense<0.000000e+00> : vector<4x64xf32>
    %23 = tpu.matmul %22, %3, %cst_12 {dimension_numbers = #tpu.dot_dimension_numbers<[0], [0], [1], [1], [0, 1, 1, 1], [], []>} : vector<4x4xf32>, vector<4x64xf32>, vector<4x64xf32> -> vector<4x64xf32>
    %c0_13 = arith.constant 0 : index
    %c0_14 = arith.constant 0 : index
    %24 = vector.load %arg5[%c0_13, %c0_14] : memref<4x4xf32, #tpu.memory_space<vmem>>, vector<4x4xf32>
    %cst_15 = arith.constant dense<0.000000e+00> : vector<4x64xf32>
    %25 = tpu.matmul %24, %23, %cst_15 {dimension_numbers = #tpu.dot_dimension_numbers<[1], [0], [0], [1], [0, 0, 1, 1], [], []>} : vector<4x4xf32>, vector<4x64xf32>, vector<4x64xf32> -> vector<4x64xf32>
    %c0_16 = arith.constant 0 : index
    %c0_17 = arith.constant 0 : index
    %26 = vector.load %arg6[%c0_16, %c0_17] : memref<4x1xf32, #tpu.memory_space<vmem>>, vector<4x1xf32>
    %27 = vector.broadcast %26 : vector<4x1xf32> to vector<4x64xf32>
    %28 = arith.addf %25, %27 : vector<4x64xf32>
    %29 = arith.addf %28, %11 : vector<4x64xf32>
    %cst_18 = arith.constant 0.000000e+00 : f32
    %30 = vector.broadcast %cst_18 : f32 to vector<4x64xf32>
    %31 = arith.maximumf %29, %30 : vector<4x64xf32>
    %c0_19 = arith.constant 0 : index
    %c0_20 = arith.constant 0 : index
    %c0_21 = arith.constant 0 : index
    %32 = vector.load %arg7[%c0_19, %c0_20, %c0_21] : memref<1x4x64xf32, #tpu.memory_space<vmem>>, vector<1x4x64xf32>
    %33 = vector.shape_cast %32 : vector<1x4x64xf32> to vector<4x64xf32>
    %34 = vector.shape_cast %31 : vector<4x64xf32> to vector<1x4x64xf32>
    tpu.vector_store %arg7[%c0_19, %c0_20, %c0_21], %34 {strides = array<i32>} : memref<1x4x64xf32, #tpu.memory_space<vmem>>, vector<1x4x64xf32>,
    return
  }
  func.func @transform_0(%arg0: i32) -> (i32, i32, i32) {
    %c0_i32 = arith.constant 0 : i32
    %c0_i32_0 = arith.constant 0 : i32
    %c0_i32_1 = arith.constant 0 : i32
    return %arg0, %c0_i32, %c0_i32_0 : i32, i32, i32
  }
  func.func @transform_1(%arg0: i32) -> (i32, i32, i32) {
    %c0_i32 = arith.constant 0 : i32
    %c0_i32_0 = arith.constant 0 : i32
    %c0_i32_1 = arith.constant 0 : i32
    return %arg0, %c0_i32, %c0_i32_0 : i32, i32, i32
  }
  func.func @transform_2(%arg0: i32) -> (i32, i32) {
    %c0_i32 = arith.constant 0 : i32
    %c0_i32_0 = arith.constant 0 : i32
    %c0_i32_1 = arith.constant 0 : i32
    return %c0_i32, %c0_i32_0 : i32, i32
  }
  func.func @transform_3(%arg0: i32) -> (i32, i32) {
    %c0_i32 = arith.constant 0 : i32
    %c0_i32_0 = arith.constant 0 : i32
    %c0_i32_1 = arith.constant 0 : i32
    return %c0_i32, %c0_i32_0 : i32, i32
  }
  func.func @transform_4(%arg0: i32) -> (i32, i32) {
    %c0_i32 = arith.constant 0 : i32
    %c0_i32_0 = arith.constant 0 : i32
    %c0_i32_1 = arith.constant 0 : i32
    return %c0_i32, %c0_i32_0 : i32, i32
  }
  func.func @transform_5(%arg0: i32) -> (i32, i32) {
    %c0_i32 = arith.constant 0 : i32
    %c0_i32_0 = arith.constant 0 : i32
    %c0_i32_1 = arith.constant 0 : i32
    return %c0_i32, %c0_i32_0 : i32, i32
  }
  func.func @transform_6(%arg0: i32) -> (i32, i32, i32) {
    %c0_i32 = arith.constant 0 : i32
    %c0_i32_0 = arith.constant 0 : i32
    %c0_i32_1 = arith.constant 0 : i32
    return %arg0, %c0_i32, %c0_i32_0 : i32, i32, i32
  }
}

module attributes {stable_mosaic.version = 11 : i64} {
  func.func @_upfuse_kernel(%arg0: i32, %arg1: memref<1x4x64xf32, #tpu.memory_space<vmem>>, %arg2: memref<64x256xf32, #tpu.memory_space<vmem>>, %arg3: memref<1x4x256xf32, #tpu.memory_space<vmem>>, %arg4: memref<1x4x256xf32, #tpu.memory_space<vmem>>) attributes {dimension_semantics = [#tpu.dimension_semantics<parallel>], iteration_bounds = array<i64: 2>, scalar_prefetch = 0 : i64, scratch_operands = 0 : i64, tpu.core_type = #tpu.core_type<tc>, window_params = [{transform_indices = @transform_0, window_bounds = array<i64: 1, 4, 64>}, {pipeline_mode = #tpu.pipeline_mode<synchronous>, transform_indices = @transform_1, window_bounds = array<i64: 64, 256>}, {transform_indices = @transform_2, window_bounds = array<i64: 1, 4, 256>}, {transform_indices = @transform_3, window_bounds = array<i64: 1, 4, 256>}]} {
    %c0 = arith.constant 0 : index
    %c0_0 = arith.constant 0 : index
    %c0_1 = arith.constant 0 : index
    %0 = vector.load %arg1[%c0, %c0_0, %c0_1] : memref<1x4x64xf32, #tpu.memory_space<vmem>>, vector<1x4x64xf32>
    %1 = vector.shape_cast %0 : vector<1x4x64xf32> to vector<4x64xf32>
    %c0_2 = arith.constant 0 : index
    %c0_3 = arith.constant 0 : index
    %2 = vector.load %arg2[%c0_2, %c0_3] : memref<64x256xf32, #tpu.memory_space<vmem>>, vector<64x256xf32>
    %cst = arith.constant dense<0.000000e+00> : vector<4x256xf32>
    %3 = tpu.matmul %1, %2, %cst {dimension_numbers = #tpu.dot_dimension_numbers<[1], [0], [0], [1], [0, 0, 1, 1], [], []>} : vector<4x64xf32>, vector<64x256xf32>, vector<4x256xf32> -> vector<4x256xf32>
    %c0_4 = arith.constant 0 : index
    %c0_5 = arith.constant 0 : index
    %c0_6 = arith.constant 0 : index
    %4 = vector.load %arg3[%c0_4, %c0_5, %c0_6] : memref<1x4x256xf32, #tpu.memory_space<vmem>>, vector<1x4x256xf32>
    %5 = vector.shape_cast %4 : vector<1x4x256xf32> to vector<4x256xf32>
    %6 = arith.mulf %5, %3 : vector<4x256xf32>
    %7 = arith.addf %6, %5 : vector<4x256xf32>
    %c0_7 = arith.constant 0 : index
    %c0_8 = arith.constant 0 : index
    %c0_9 = arith.constant 0 : index
    %8 = vector.load %arg4[%c0_7, %c0_8, %c0_9] : memref<1x4x256xf32, #tpu.memory_space<vmem>>, vector<1x4x256xf32>
    %9 = vector.shape_cast %8 : vector<1x4x256xf32> to vector<4x256xf32>
    %10 = vector.shape_cast %7 : vector<4x256xf32> to vector<1x4x256xf32>
    tpu.vector_store %arg4[%c0_7, %c0_8, %c0_9], %10 {strides = array<i32>} : memref<1x4x256xf32, #tpu.memory_space<vmem>>, vector<1x4x256xf32>,
    return
  }
  func.func @transform_0(%arg0: i32) -> (i32, i32, i32) {
    %c0_i32 = arith.constant 0 : i32
    %c0_i32_0 = arith.constant 0 : i32
    %c0_i32_1 = arith.constant 0 : i32
    return %arg0, %c0_i32, %c0_i32_0 : i32, i32, i32
  }
  func.func @transform_1(%arg0: i32) -> (i32, i32) {
    %c0_i32 = arith.constant 0 : i32
    %c0_i32_0 = arith.constant 0 : i32
    %c0_i32_1 = arith.constant 0 : i32
    return %c0_i32, %c0_i32_0 : i32, i32
  }
  func.func @transform_2(%arg0: i32) -> (i32, i32, i32) {
    %c0_i32 = arith.constant 0 : i32
    %c0_i32_0 = arith.constant 0 : i32
    %c0_i32_1 = arith.constant 0 : i32
    return %arg0, %c0_i32, %c0_i32_0 : i32, i32, i32
  }
  func.func @transform_3(%arg0: i32) -> (i32, i32, i32) {
    %c0_i32 = arith.constant 0 : i32
    %c0_i32_0 = arith.constant 0 : i32
    %c0_i32_1 = arith.constant 0 : i32
    return %arg0, %c0_i32, %c0_i32_0 : i32, i32, i32
  }
}

</mosaic_0001>

<bundles_post_ra>
// kernel: hierarchical_spatial_graph.4
= control target key start
LH: loop header
LB: loop body
LE: loop exit
PB: predicated region body
PF: predicated region fallthrough
CT: control target
= control target key end

     0   :  { %s2738_s12 = smov 0   ;;  %s4316_s0 = inlined_call_operand.vmem [shape: f32[2,4,8,9,9], index: 0, kind: input, shape index: {}]   ;;  %s4317_s1 = inlined_call_operand.vmem [shape: f32[3,8,1,9], index: 1, kind: input, shape index: {}]   ;;  %s4318_s2 = inlined_call_operand.vmem [shape: f32[3,8,1,1], index: 2, kind: input, shape index: {}]   ;;  %s4319_s3 = inlined_call_operand.vmem [shape: f32[2,8,8,8], index: 3, kind: output, shape index: {}]  }
   0x1 LB: > { %s2469_s13 = sadd.s32 4294967295, %s2703_s12   ;;  %p2473_p0 = scmp.ge.s32.totalorder %s2703_s12, 1  ;;  %s2703_s12 = sphi %s2738_s12, %s13_s12  }
   0x2   : > { %p137_p1 = scmp.lt.s32.totalorder %s2703_s12, 3 }
   0x4   : > { %p138_p2 = pnand %p2473_p0, %p137_p1 }
   0x6   : > { %141 = sbr.rel (%p138_p2) target bundleno = 2765 (0xacd), region = 32 }
   0xb   : > { %v2749_v0 = vld [vmem:[%s4317_s1 + $0x4] ss:$0 sm:$0xff]  ;;  %v4332_v1 = vmov 0   ;;  %v2756_v2 = vld [vmem:[%s4317_s1 + $0x2] ss:$0 sm:$0xff]  ;;  %v4328_v3 = vmov 2  }
   0xc   : > { %2568 = vset.pattern.permute.xlu2 %v4332_v1  ;;  %2567 = vset.pattern.permute.xlu1 %v4332_v1  ;;  %v2764_v4 = vld [vmem:[%s4317_s1 + $0x1] ss:$0 sm:$0xff]  ;;  %v2769_v5 = vld [vmem:[%s4317_s1 + $0x5] ss:$0 sm:$0xff]  ;;  %v2774_v6 = vld [vmem:[%s4317_s1 + $0x3] ss:$0 sm:$0xff] }
   0xd   : > { %220 = vperm.xlu2 %2568, %v2749_v0   ;;  %212 = vperm.xlu1 %2567, %v2756_v2   ;;  %v2780_v7 = vld [vmem:[%s4317_s1 + $0x6] ss:$0 sm:$0xff]  ;;  %v2787_v8 = vld [vmem:[%s4317_s1 + $0x7] ss:$0 sm:$0xff]  ;;  %v2792_v9 = vld [vmem:[%s4317_s1] ss:$0 sm:$0xff] }
   0xe   : > { %2572 = vset.pattern.permute.xlu0 %v4328_v3  ;;  %v4330_v10 = vmov 1   ;;  %v4326_v11 = vmov 3   ;;  %v4324_v12 = vmov 4   ;;  %p161_p3 = scmp.lt.s32.totalorder %s2469_s13, 1  ;;  %s2710_s7 = smov 127   ;;  %v4320_v40 = vmov 5  }
   0xf   : > { %305 = vperm.xlu0 %2572, %v2764_v4   ;;  %s2715_s26 = smov 1   ;;  %vm766_vm0 = vcmask 80896   ;;  %vm768_vm1 = vcmask 74752   ;;  %vm880_vm2 = vcmask 72712   ;;  %s2717_s19 = smov 126   ;;  %vm2405_vm3 = vcmask 64512  }
  0x10   : > { %s4449_s13 = smov (!%p161_p3, %s2469_s13), 1 }
  0x11   : > { %s2544_s30 = sshll.u32 %s4449_s13, 9  ;;  %s2545_s21 = sshll.u32 %s4449_s13, 6 }
  0x12   : > { %s2851_s6 = scalar_lea.vmem %s4316_s0, %s2544_s30  ;;  %s4290_s23 = scalar_lea.vmem %s4319_s3, %s2545_s21 }
  0x13   : > { %v2854_v18 = vld [vmem:[%s2851_s6 + $0x10] sm:$0xff]  ;;  %v2863_v23 = vld [vmem:[%s2851_s6] sm:$0xff] }
  0x14   : > { %v2870_v27 = vld [vmem:[%s2851_s6 + $0x30] sm:$0xff]  ;;  %v2877_v32 = vld [vmem:[%s2851_s6 + $0x60] sm:$0xff] }
  0x15   : > { %224 = vperm.xlu2 %2568, %v2769_v5   ;;  %216 = vperm.xlu1 %2567, %v2774_v6   ;;  %v2887_v36 = vld [vmem:[%s2851_s6 + $0x20] sm:$0xff]  ;;  %v2897_v42 = vld [vmem:[%s2851_s6 + $0x50] sm:$0xff] }
  0x16   : > { %v2894_v41 = vld [vmem:[%s2851_s6 + $0x40] sm:$0xff]  ;;  %v2922_v51 = vld [vmem:[%s2851_s6 + $0x70] sm:$0xff] }
  0x17   : > { %325 = vperm.xlu0 %2572, %v2780_v7   ;;  %v2946_v62 = vld [vmem:[%s2851_s6 + $0x110] sm:$0xff] }
  0x1d   : > { %2569 = vset.pattern.permute.xlu2 %v4330_v10  ;;  %232 = vperm.xlu1 %2567, %v2787_v8  }
  0x1e   : > { %253 = vperm.xlu2 %2569, %v2792_v9  }
  0x1f   : > { %2576 = vset.pattern.permute.xlu0 %v4326_v11 }
  0x20   : > { %398 = vperm.xlu0 %2576, %v2756_v2  }
  0x25   : > { %2570 = vset.pattern.permute.xlu1 %v4330_v10 }
  0x26   : > { %265 = vperm.xlu2 %2569, %v2774_v6   ;;  %261 = vperm.xlu1 %2570, %v2756_v2  }
  0x28   : > { %418 = vperm.xlu0 %2576, %v2787_v8  }
  0x2e   : > { %273 = vperm.xlu2 %2569, %v2769_v5   ;;  %269 = vperm.xlu1 %2570, %v2749_v0  }
  0x30   : > { %2579 = vset.pattern.permute.xlu0 %v4324_v12 }
  0x31   : > { %455 = vperm.xlu0 %2579, %v2756_v2  }
  0x36   : > { %2571 = vset.pattern.permute.xlu2 %v4328_v3  ;;  %281 = vperm.xlu1 %2570, %v2787_v8  }
  0x37   : > { %301 = vperm.xlu2 %2571, %v2792_v9  }
  0x3e   : > { %2573 = vset.pattern.permute.xlu1 %v4328_v3 }
  0x3f   : > { %313 = vperm.xlu2 %2571, %v2774_v6   ;;  %309 = vperm.xlu1 %2573, %v2756_v2  }
  0x47   : > { %321 = vperm.xlu2 %2571, %v2769_v5   ;;  %317 = vperm.xlu1 %2573, %v2749_v0  }
  0x4f   : > { %2575 = vset.pattern.permute.xlu2 %v4326_v11  ;;  %329 = vperm.xlu1 %2573, %v2787_v8  }
  0x50   : > { %394 = vperm.xlu2 %2575, %v2764_v4  }
  0x57   : > { %2574 = vset.pattern.permute.xlu1 %v4326_v11 }
  0x58   : > { %406 = vperm.xlu2 %2575, %v2749_v0   ;;  %390 = vperm.xlu1 %2574, %v2792_v9  }
  0x60   : > { %414 = vperm.xlu2 %2575, %v2780_v7   ;;  %402 = vperm.xlu1 %2574, %v2774_v6  }
  0x67   : > { %v2824_v13 = vpop.permute.xlu2 %220 }
  0x68   : > { %2578 = vset.pattern.permute.xlu2 %v4324_v12  ;;  %410 = vperm.xlu1 %2574, %v2769_v5  }
  0x69   : > { %451 = vperm.xlu2 %2578, %v2764_v4  }
  0x6f   : > { %v2829_v14 = vpop.permute.xlu2 %224 }
  0x70   : > { %2577 = vset.pattern.permute.xlu1 %v4324_v12  ;;  %v2992_v12 = vld [vmem:[%s2851_s6 + $0x170] sm:$0xff] }
  0x71   : > { %463 = vperm.xlu2 %2578, %v2749_v0   ;;  %447 = vperm.xlu1 %2577, %v2792_v9  }
  0x78   : > { %v2836_v15 = vpop.permute.xlu2 %253 }
  0x79   : > { %459 = vperm.xlu1 %2577, %v2774_v6  }
  0x7f   : > { %v2844_v16 = vpop.permute.xlu1 %212 }
  0x80   : > { %v2846_v17 = vpop.permute.xlu2 %265 }
  0x81   : > { %v306_v19 = vpop.permute.xlu0 %305 }
  0x82   : > { %v333_v20 = vmul.f32 %v306_v19, %v2854_v18 }
  0x84   : > { %350 = vrot.lane.b32.xlu0 %v333_v20, %s2710_s7 }
  0x87   : > { %v2858_v21 = vpop.permute.xlu1 %216 }
  0x88   : > { %v2860_v22 = vpop.permute.xlu2 %273 }
  0x89   : > { %v326_v31 = vpop.permute.xlu0 %325 }
  0x8a   : > { %v338_v33 = vmul.f32 %v326_v31, %v2877_v32 }
  0x8f   : > { %v2865_v24 = vpop.permute.xlu1 %232 }
  0x91   : > { %v302_v25 = vpop.permute.xlu2 %301 }
  0x92   : > { %v332_v26 = vmul.f32 %v302_v25, %v2863_v23  ;;  %v2941_v60 = vpop.permute.xlu0 %398 }
  0x94   : > { %348 = vrot.lane.b32.xlu2 %v332_v26, %s2710_s7  ;;  %v2955_v26 = vld [vmem:[%s2851_s6 + $0x140] sm:$0xff] }
  0x98   : > { %v2872_v28 = vpop.permute.xlu1 %261 }
  0x99   : > { %v314_v29 = vpop.permute.xlu2 %313 }
  0x9a   : > { %v335_v30 = vmul.f32 %v314_v29, %v2870_v27  ;;  %v2949_v20 = vpop.permute.xlu0 %418 }
  0x9c   : > { %354 = vrot.lane.b32.xlu2 %v335_v30, %s2710_s7 }
  0xa0   : > { %v2880_v34 = vpop.permute.xlu1 %269 }
  0xa1   : > { %v322_v39 = vpop.permute.xlu2 %321 }
  0xa2   : > { %v337_v44 = vmul.f32 %v322_v39, %v2897_v42 }
  0xa3   : > { %v2959_v31 = vpop.permute.xlu0 %455 }
  0xa4   : > { %360 = vrot.lane.b32.xlu2 %v338_v33, %s2710_s7 }
  0xa8   : > { %v2883_v35 = vpop.permute.xlu1 %281 }
  0xaa   : > { %v2901_v46 = vpop.permute.xlu2 %394 }
  0xac   : > { %471 = vperm.xlu2 %2578, %v2780_v7  }
  0xb1   : > { %v310_v37 = vpop.permute.xlu1 %309 }
  0xb2   : > { %v334_v38 = vmul.f32 %v310_v37, %v2887_v36  ;;  %v2908_v47 = vpop.permute.xlu2 %406 }
  0xb4   : > { %2581 = vset.pattern.permute.xlu2 %v4320_v40  ;;  %352 = vrot.lane.b32.xlu1 %v334_v38, %s2710_s7 }
  0xb5   : > { %499 = vperm.xlu2 %2581, %v2764_v4  }
  0xb9   : > { %v318_v43 = vpop.permute.xlu1 %317 }
  0xba   : > { %v336_v45 = vmul.f32 %v318_v43, %v2894_v41  ;;  %v2915_v48 = vpop.permute.xlu2 %414 }
  0xbc   : > { %358 = vrot.lane.b32.xlu1 %v337_v44, %s2710_s7  ;;  %356 = vrot.lane.b32.xlu0 %v336_v45, %s2710_s7  ;;  %v4322_v44 = vmov 6  }
  0xbd   : > { %511 = vperm.xlu2 %2581, %v2749_v0  }
  0xc1   : > { %v330_v49 = vpop.permute.xlu1 %329 }
  0xc2   : > { %v339_v52 = vmul.f32 %v330_v49, %v2922_v51 }
  0xc3   : > { %v2919_v50 = vpop.permute.xlu2 %451 }
  0xc4   : > { %467 = vperm.xlu1 %2577, %v2769_v5   ;;  %475 = vperm.xlu0 %2579, %v2787_v8  }
  0xc5   : > { %519 = vperm.xlu2 %2581, %v2780_v7  }
  0xca   : > { %v2933_v56 = vpop.permute.xlu1 %390 }
  0xcb   : > { %v2927_v53 = vpop.permute.xlu2 %463 }
  0xcc   : > { %2580 = vset.pattern.permute.xlu1 %v4320_v40  ;;  %2582 = vset.pattern.permute.xlu0 %v4320_v40  ;;  %4353 = vst [vmem:[#allocation4_spill] sm:$0xff] %v2927_v53 }
  0xcd   : > { %495 = vperm.xlu1 %2580, %v2792_v9   ;;  %503 = vperm.xlu0 %2582, %v2756_v2  }
  0xce   : > { %2585 = vset.pattern.permute.xlu2 %v4322_v44 }
  0xd2   : > { %v2937_v58 = vpop.permute.xlu1 %402 }
  0xd5   : > { %507 = vperm.xlu1 %2580, %v2774_v6   ;;  %523 = vperm.xlu0 %2582, %v2787_v8  }
  0xda   : > { %v2943_v61 = vpop.permute.xlu1 %410 }
  0xdd   : > { %515 = vperm.xlu1 %2580, %v2769_v5   ;;  %362 = vrot.lane.b32.xlu0 %v339_v52, %s2710_s7  ;;  %v2979_v52 = vld [vmem:[%s2851_s6 + $0x100] sm:$0xff] }
  0xde   : > { %2583 = vset.pattern.permute.xlu0 %v4322_v44 }
  0xe3   : > { %v2952_v25 = vpop.permute.xlu1 %447 }
  0xe5   : > { %2584 = vset.pattern.permute.xlu1 %v4322_v44  ;;  %v2989_v44 = vld [vmem:[%s2851_s6 + $0x130] sm:$0xff] }
  0xeb   : > { %v2961_v33 = vpop.permute.xlu1 %459 }
  0xee   : > { %v2929_v54 = vpop.permute.xlu2 %348 }
  0xf6   : > { %v2931_v55 = vpop.permute.xlu2 %354  ;;  %v2963_v37 = vpop.permute.xlu0 %350 }
  0xfe   : > { %v2935_v57 = vpop.permute.xlu2 %360 }
  0xff   : > { %4354 = vst [vmem:[#allocation5_spill] sm:$0xff] %v2935_v57 }
 0x106   : > { %v2939_v59 = vpop.permute.xlu2 %471 }
 0x107   : > { %4355 = vst [vmem:[#allocation6_spill] sm:$0xff] %v2939_v59  ;;  %v3002_v59 = vld [vmem:[%s2851_s6 + $0x160] sm:$0xff] }
 0x10f   : > { %v500_v63 = vpop.permute.xlu2 %499 }
 0x110   : > { %v527_v19 = vmul.f32 %v2946_v62, %v500_v63  ;;  %v2982_v63 = vld [vmem:[%s2851_s6 + $0x120] sm:$0xff] }
 0x112   : > { %544 = vrot.lane.b32.xlu2 %v527_v19, %s2710_s7 }
 0x117   : > { %v512_v29 = vpop.permute.xlu2 %511 }
 0x118   : > { %v530_v30 = vmul.f32 %v2955_v26, %v512_v29 }
 0x11a   : > { %550 = vrot.lane.b32.xlu2 %v530_v30, %s2710_s7 }
 0x126   : > { %v2965_v38 = vpop.permute.xlu1 %352 }
 0x12e   : > { %v2967_v39 = vpop.permute.xlu1 %358  ;;  %v2969_v43 = vpop.permute.xlu0 %356 }
 0x136   : > { %v2974_v45 = vpop.permute.xlu1 %467  ;;  %v2976_v49 = vpop.permute.xlu0 %475 }
 0x13f   : > { %v496_v19 = vpop.permute.xlu1 %495  ;;  %v504_v29 = vpop.permute.xlu0 %503 }
 0x140   : > { %v526_v30 = vmul.f32 %v2979_v52, %v496_v19  ;;  %v528_v40 = vmul.f32 %v2982_v63, %v504_v29  ;;  %v520_v19 = vpop.permute.xlu2 %519  ;;  %v2999_v29 = vld [vmem:[%s2851_s6 + $0x150] sm:$0xff] }
 0x141   : > { %v532_v53 = vmul.f32 %v3002_v59, %v520_v19  ;;  %v423_v19 = vmul.f32 %v2982_v63, %v2941_v60 }
 0x142   : > { %542 = vrot.lane.b32.xlu1 %v526_v30, %s2710_s7  ;;  %546 = vrot.lane.b32.xlu0 %v528_v40, %s2710_s7 }
 0x147   : > { %v508_v11 = vpop.permute.xlu1 %507  ;;  %v524_v3 = vpop.permute.xlu0 %523 }
 0x148   : > { %v529_v10 = vmul.f32 %v2989_v44, %v508_v11  ;;  %v533_v1 = vmul.f32 %v2992_v12, %v524_v3  ;;  %v4334_v3 = vmov 8  }
 0x14a   : > { %548 = vrot.lane.b32.xlu1 %v529_v10, %s2710_s7  ;;  %556 = vrot.lane.b32.xlu2 %v533_v1, %s2710_s7  ;;  %v4336_v1 = vmov 7   ;;  %v4356_v10 = vmov 0  }
 0x14f   : > { %v516_v30 = vpop.permute.xlu1 %515 }
 0x150   : > { %v531_v40 = vmul.f32 %v2999_v29, %v516_v30 }
 0x152   : > { %552 = vrot.lane.b32.xlu0 %v531_v40, %s2710_s7  ;;  %591 = vperm.xlu2 %2585, %v2756_v2   ;;  %v2496_v40 = vld [vmem:[%s2851_s6 + $0x1a0] sm:$0xff] }
 0x153   : > { %554 = vrot.lane.b32.xlu1 %v532_v53, %s2710_s7  ;;  %v2485_v53 = vld [vmem:[%s2851_s6 + $0xf0] sm:$0xff] }
 0x15a   : > { %583 = vperm.xlu0 %2583, %v2792_v9   ;;  %599 = vperm.xlu2 %2585, %v2749_v0  }
 0x15b   : > { %587 = vperm.xlu1 %2584, %v2764_v4  }
 0x162   : > { %603 = vperm.xlu0 %2583, %v2769_v5   ;;  %611 = vperm.xlu2 %2585, %v2787_v8  }
 0x163   : > { %595 = vperm.xlu1 %2584, %v2774_v6  }
 0x16a   : > { %2586 = vset.pattern.permute.xlu0 %v4336_v1  ;;  %2588 = vset.pattern.permute.xlu2 %v4336_v1 }
 0x16b   : > { %607 = vperm.xlu1 %2584, %v2780_v7   ;;  %639 = vperm.xlu0 %2586, %v2792_v9  }
 0x16c   : > { %647 = vperm.xlu2 %2588, %v2756_v2   ;;  %v3037_v11 = vpop.permute.xlu2 %544 }
 0x173   : > { %2587 = vset.pattern.permute.xlu1 %v4336_v1  ;;  %659 = vperm.xlu0 %2586, %v2769_v5  }
 0x174   : > { %655 = vperm.xlu2 %2588, %v2749_v0   ;;  %643 = vperm.xlu1 %2587, %v2764_v4  }
 0x17b   : > { %2589 = vset.pattern.permute.xlu0 %v4334_v3 }
 0x17c   : > { %667 = vperm.xlu2 %2588, %v2787_v8   ;;  %651 = vperm.xlu1 %2587, %v2774_v6  }
 0x17d   : > { %687 = vperm.xlu0 %2589, %v2792_v9  }
 0x184   : > { %2591 = vset.pattern.permute.xlu2 %v4334_v3  ;;  %663 = vperm.xlu1 %2587, %v2780_v7  }
 0x185   : > { %707 = vperm.xlu0 %2589, %v2769_v5   ;;  %695 = vperm.xlu2 %2591, %v2756_v2   ;;  %v3042_v2 = vpop.permute.xlu2 %550  ;;  %v2480_v5 = vld [vmem:[%s2851_s6 + $0xa0] sm:$0xff] }
 0x186   : > { %4357 = vst [vmem:[#allocation7_spill] sm:$0xff] %v3042_v2  ;;  %v291_v2 = vmul.f32 %v2485_v53, %v2883_v35  ;;  %v428_v35 = vmul.f32 %v2992_v12, %v2949_v20  ;;  %v2483_v12 = vld [vmem:[%s2851_s6 + $0xd0] sm:$0xff] }
 0x18c   : > { %2590 = vset.pattern.permute.xlu1 %v4334_v3  ;;  %v363_v3 = vpop.permute.xlu0 %362 }
 0x18d   : > { %2592 = vset.pattern.permute.xlu0 %v4356_v10  ;;  %691 = vperm.xlu1 %2590, %v2764_v4  }
 0x18e   : > { %204 = vperm.xlu0 %2592, %v2792_v9   ;;  %703 = vperm.xlu2 %2591, %v2749_v0   ;;  %v286_v9 = vmul.f32 %v2480_v5, %v2872_v28  ;;  %v480_v28 = vmul.f32 %v2496_v40, %v2959_v31  ;;  %v2501_v31 = vld [vmem:[%s2851_s6 + $0x1f0] sm:$0xff] }
 0x195   : > { %699 = vperm.xlu1 %2590, %v2774_v6   ;;  %v237_v6 = vmul.f32 %v2844_v16, %v2887_v36  ;;  %v242_v16 = vmul.f32 %v2865_v24, %v2922_v51  ;;  %v576_v36 = vld [vmem:[%s2851_s6 + $0x21] sm:$0xff]  ;;  %v485_v51 = vmul.f32 %v2501_v31, %v2976_v49  ;;  %v238_v49 = vmul.f32 %v2858_v21, %v2870_v27  ;;  %v2497_v21 = vld [vmem:[%s2851_s6 + $0x1b0] sm:$0xff] }
 0x196   : > { %715 = vperm.xlu2 %2591, %v2787_v8   ;;  %208 = vperm.xlu0 %2592, %v2764_v4  }
 0x197   : > { %v294_v8 = vadd.f32 %v286_v9, %v237_v6  ;;  %v299_v9 = vadd.f32 %v291_v2, %v242_v16 }
 0x199   : > { %v374_v30 = vadd.f32 %v2965_v38, %v294_v8  ;;  %v379_v60 = vadd.f32 %v363_v3, %v299_v9 }
 0x19b   : > { %v431_v5 = vadd.f32 %v423_v19, %v374_v30  ;;  %v436_v24 = vadd.f32 %v428_v35, %v379_v60 }
 0x19d   : > { %711 = vperm.xlu1 %2590, %v2780_v7   ;;  %v493_v3 = vadd.f32 %v485_v51, %v436_v24 }
 0x19e   : > { %228 = vperm.xlu0 %2592, %v2780_v7   ;;  %2593 = vset.pattern.permute.xlu2 %v4356_v10 }
 0x1a4   : > { %v557_v0 = vpop.permute.xlu2 %556 }
 0x1a5   : > { %2594 = vset.pattern.permute.xlu1 %v4356_v10  ;;  %v488_v10 = vadd.f32 %v480_v28, %v431_v5  ;;  %v573_v30 = vadd.f32 %v557_v0, %v493_v3  ;;  %v2481_v28 = vld [vmem:[%s2851_s6 + $0xb0] sm:$0xff]  ;;  %v289_v0 = vmul.f32 %v2483_v12, %v2860_v22 }
 0x1a6   : > { %v287_v16 = vmul.f32 %v2481_v28, %v2846_v17  ;;  %v2499_v17 = vld [vmem:[%s2851_s6 + $0x1d0] sm:$0xff] }
 0x1a8   : > { %v295_v60 = vadd.f32 %v287_v16, %v238_v49 }
 0x1aa   : > { %v375_v35 = vadd.f32 %v2931_v55, %v295_v60  ;;  %v579_v55 = vld [vmem:[%s2851_s6 + $0x51] sm:$0xff] }
 0x1ac   : > { %v592_v1 = vpop.permute.xlu2 %591 }
 0x1ad   : > { %v616_v6 = vmul.f32 %v592_v1, %v576_v36  ;;  %v3073_v1 = vld [vmem:[%s2851_s6 + $0x71] sm:$0xff] }
 0x1b4   : > { %v3062_v63 = vpop.permute.xlu1 %542  ;;  %v547_v38 = vpop.permute.xlu0 %546 }
 0x1b5   : > { %v568_v8 = vadd.f32 %v547_v38, %v488_v10  ;;  %v3064_v57 = vpop.permute.xlu2 %599 }
 0x1b7   : > { %v3069_v53 = vadd.f32 %v616_v6, %v568_v8  ;;  %v240_v6 = vmul.f32 %v2829_v14, %v2897_v42  ;;  %v424_v8 = vmul.f32 %v2989_v44, %v2937_v58  ;;  %v426_v14 = vmul.f32 %v2999_v29, %v2943_v61 }
 0x1b8   : > { %v483_v42 = vmul.f32 %v2499_v17, %v2974_v45  ;;  %v481_v58 = vmul.f32 %v2497_v21, %v2961_v33 }
 0x1b9   : > { %v297_v38 = vadd.f32 %v289_v0, %v240_v6  ;;  %v432_v51 = vadd.f32 %v424_v8, %v375_v35  ;;  %v574_v8 = vld [vmem:[%s2851_s6 + $0x1] sm:$0xff] }
 0x1bb   : > { %v377_v27 = vadd.f32 %v2967_v39, %v297_v38 }
 0x1bc   : > { %v549_v2 = vpop.permute.xlu1 %548 }
 0x1bd   : > { %v612_v19 = vpop.permute.xlu2 %611  ;;  %v434_v44 = vadd.f32 %v426_v14, %v377_v27 }
 0x1be   : > { %v621_v10 = vmul.f32 %v612_v19, %v3073_v1  ;;  %v577_v19 = vld [vmem:[%s2851_s6 + $0x31] sm:$0xff] }
 0x1bf   : > { %v491_v3 = vadd.f32 %v483_v42, %v434_v44  ;;  %v3134_v42 = vld [vmem:[%s2851_s6 + $0x11] sm:$0xff] }
 0x1c0   : > { %v3076_v40 = vadd.f32 %v621_v10, %v573_v30  ;;  %v489_v30 = vadd.f32 %v481_v58, %v432_v51 }
 0x1c2   : > { %v569_v16 = vadd.f32 %v549_v2, %v489_v30 }
 0x1c4   : > { %v553_v20 = vpop.permute.xlu0 %552 }
 0x1c5   : > { %v3080_v5 = vpop.permute.xlu1 %554  ;;  %v571_v28 = vadd.f32 %v553_v20, %v491_v3  ;;  %v3139_v3 = vld [vmem:[%s2851_s6 + $0x41] sm:$0xff] }
 0x1c6   : > { %v3085_v9 = vpop.permute.xlu2 %647 }
 0x1cc   : > { %v3094_v31 = vpop.permute.xlu0 %583 }
 0x1cd   : > { %v3098_v24 = vpop.permute.xlu1 %587 }
 0x1ce   : > { %v3100_v22 = vpop.permute.xlu2 %655 }
 0x1d4   : > { %v604_v10 = vpop.permute.xlu0 %603 }
 0x1d5   : > { %v619_v39 = vmul.f32 %v604_v10, %v579_v55  ;;  %v596_v12 = vpop.permute.xlu1 %595 }
 0x1d6   : > { %v617_v49 = vmul.f32 %v596_v12, %v577_v19  ;;  %v3108_v0 = vpop.permute.xlu2 %667  ;;  %v2659_v12 = vld [vmem:[%s4318_s2 + $0x5] ss:$0 sm:$0xff] }
 0x1d7   : > { %v3110_v61 = vadd.f32 %v619_v39, %v571_v28 }
 0x1d8   : > { %v3112_v45 = vadd.f32 %v617_v49, %v569_v16  ;;  %v3151_v16 = vld [vmem:[%s2851_s6 + $0x61] sm:$0xff] }
 0x1dd   : > { %v3114_v29 = vpop.permute.xlu1 %607  ;;  %v3116_v33 = vpop.permute.xlu0 %639 }
 0x1df   : > { %v696_v6 = vpop.permute.xlu2 %695 }
 0x1e0   : > { %v720_v60 = vmul.f32 %v696_v6, %v576_v36  ;;  %v2657_v36 = vld [vmem:[%s4318_s2] ss:$0 sm:$0xff] }
 0x1e2   : > { %738 = vrot.lane.b32.xlu2 %v720_v60, %s2710_s7 }
 0x1e5   : > { %v3119_v20 = vpop.permute.xlu0 %659 }
 0x1e6   : > { %v3121_v38 = vpop.permute.xlu1 %643 }
 0x1e8   : > { %v704_v44 = vpop.permute.xlu2 %703 }
 0x1e9   : > { %v722_v30 = vmul.f32 %v704_v44, %v3139_v3 }
 0x1ee   : > { %v3123_v2 = vpop.permute.xlu1 %651 }
 0x1ef   : > { %v688_v35 = vpop.permute.xlu0 %687 }
 0x1f0   : > { %v718_v17 = vmul.f32 %v688_v35, %v574_v8  ;;  %v716_v39 = vpop.permute.xlu2 %715  ;;  %v2661_v35 = vld [vmem:[%s4318_s2 + $0x2] ss:$0 sm:$0xff] }
 0x1f1   : > { %v725_v60 = vmul.f32 %v716_v39, %v3073_v1  ;;  %v2662_v1 = vld [vmem:[%s4318_s2 + $0x6] ss:$0 sm:$0xff] }
 0x1f2   : > { %734 = vrot.lane.b32.xlu0 %v718_v17, %s2710_s7  ;;  %v2663_v17 = vld [vmem:[%s4318_s2 + $0x4] ss:$0 sm:$0xff] }
 0x1f3   : > { %v2494_v39 = vld [vmem:[%s2851_s6 + $0x180] sm:$0xff] }
 0x1f6   : > { %v3127_v21 = vpop.permute.xlu1 %663 }
 0x1f7   : > { %v708_v27 = vpop.permute.xlu0 %707 }
 0x1f8   : > { %v723_v14 = vmul.f32 %v708_v27, %v579_v55  ;;  %v2658_v55 = vld [vmem:[%s4318_s2 + $0x3] ss:$0 sm:$0xff]  ;;  %v2664_v27 = vld [vmem:[%s4318_s2 + $0x7] ss:$0 sm:$0xff] }
 0x1fa   : > { %744 = vrot.lane.b32.xlu2 %v723_v14, %s2710_s7  ;;  %v4358_v14 = vmov 1  }
 0x1ff   : > { %v692_v51 = vpop.permute.xlu1 %691 }
 0x200   : > { %v719_v58 = vmul.f32 %v692_v51, %v3134_v42  ;;  %v2478_v51 = vld [vmem:[%s2851_s6 + $0x80] sm:$0xff] }
 0x201   : > { %v284_v44 = vmul.f32 %v2478_v51, %v2836_v15  ;;  %v614_v15 = vmul.f32 %v3094_v31, %v574_v8 }
 0x202   : > { %736 = vrot.lane.b32.xlu1 %v719_v58, %s2710_s7  ;;  %809 = vperm.xlu2 %2593, %v2657_v36   ;;  %v205_v36 = vpop.permute.xlu0 %204 }
 0x203   : > { %v235_v58 = vmul.f32 %v205_v36, %v2863_v23 }
 0x207   : > { %v700_v10 = vpop.permute.xlu1 %699 }
 0x208   : > { %v721_v28 = vmul.f32 %v700_v10, %v577_v19  ;;  %v2660_v19 = vld [vmem:[%s4318_s2 + $0x1] ss:$0 sm:$0xff] }
 0x20a   : > { %740 = vrot.lane.b32.xlu0 %v721_v28, %s2710_s7  ;;  %821 = vperm.xlu2 %2593, %v2658_v55   ;;  %v292_v55 = vadd.f32 %v284_v44, %v235_v58  ;;  %v209_v10 = vpop.permute.xlu0 %208  ;;  %v421_v28 = vmul.f32 %v2979_v52, %v2933_v56 }
 0x20b   : > { %742 = vrot.lane.b32.xlu1 %v722_v30, %s2710_s7 }
 0x20c   : > { %v372_v30 = vadd.f32 %v2929_v54, %v292_v55  ;;  %v2504_v55 = vld [vmem:[%s2851_s6 + $0xa1] sm:$0xff] }
 0x20f   : > { %v712_v49 = vpop.permute.xlu1 %711 }
 0x210   : > { %v724_v6 = vmul.f32 %v712_v49, %v3151_v16 }
 0x212   : > { %746 = vrot.lane.b32.xlu0 %v724_v6, %s2710_s7  ;;  %829 = vperm.xlu2 %2593, %v2659_v12   ;;  %v429_v12 = vadd.f32 %v421_v28, %v372_v30  ;;  %v3183_v6 = vpop.permute.xlu0 %228 }
 0x213   : > { %748 = vrot.lane.b32.xlu1 %v725_v60, %s2710_s7 }
 0x21a   : > { %813 = vperm.xlu0 %2592, %v2660_v19   ;;  %v2502_v19 = vld [vmem:[%s2851_s6 + $0x81] sm:$0xff] }
 0x21b   : > { %817 = vperm.xlu1 %2594, %v2661_v35   ;;  %v670_v35 = vmul.f32 %v2502_v19, %v3116_v33 }
 0x222   : > { %833 = vperm.xlu0 %2592, %v2662_v1  }
 0x223   : > { %825 = vperm.xlu1 %2594, %v2663_v17  }
 0x22a   : > { %2595 = vset.pattern.permute.xlu0 %v4358_v14 }
 0x22b   : > { %837 = vperm.xlu1 %2594, %v2664_v27   ;;  %257 = vperm.xlu0 %2595, %v2764_v4   ;;  %v478_v4 = vmul.f32 %v2494_v39, %v2952_v25  ;;  %v2505_v25 = vld [vmem:[%s2851_s6 + $0xb1] sm:$0xff]  ;;  %v672_v39 = vmul.f32 %v2504_v55, %v3085_v9  ;;  %v615_v55 = vmul.f32 %v3098_v24, %v3134_v42  ;;  %v4359_v24 = vld [vmem:[#allocation5_spill] sm:$0xff] }
 0x233   : > { %277 = vperm.xlu0 %2595, %v2780_v7   ;;  %v486_v7 = vadd.f32 %v478_v4, %v429_v12 }
 0x235   : > { %v566_v23 = vadd.f32 %v3062_v63, %v486_v7  ;;  %v673_v63 = vmul.f32 %v2505_v25, %v3123_v2  ;;  %v680_v2 = vadd.f32 %v672_v39, %v3069_v53  ;;  %v2479_v53 = vld [vmem:[%s2851_s6 + $0x90] sm:$0xff]  ;;  %v422_v25 = vmul.f32 %v2946_v62, %v2901_v46 }
 0x236   : > { %v241_v62 = vmul.f32 %v3183_v6, %v2877_v32  ;;  %v2500_v6 = vld [vmem:[%s2851_s6 + $0x1e0] sm:$0xff] }
 0x237   : > { %v622_v54 = vadd.f32 %v614_v15, %v566_v23  ;;  %v681_v31 = vadd.f32 %v673_v63, %v3112_v45  ;;  %v2507_v45 = vld [vmem:[%s2851_s6 + $0xd1] sm:$0xff] }
 0x238   : > { %v675_v23 = vmul.f32 %v2507_v45, %v3119_v20  ;;  %v3219_v20 = vld [vmem:[%s4317_s1 + $0x8] ss:$0 sm:$0xff]  ;;  %v2495_v63 = vld [vmem:[%s2851_s6 + $0x190] sm:$0xff] }
 0x239   : > { %v678_v1 = vadd.f32 %v670_v35, %v622_v54 }
 0x23a   : > { %v683_v19 = vadd.f32 %v675_v23, %v3110_v61 }
 0x23c   : > { %v739_v49 = vpop.permute.xlu2 %738 }
 0x23d   : > { %v760_v12 = vadd.f32 %v739_v49, %v680_v2  ;;  %v2482_v49 = vld [vmem:[%s2851_s6 + $0xc0] sm:$0xff] }
 0x254   : > { %v745_v60 = vpop.permute.xlu2 %744 }
 0x255   : > { %v763_v35 = vadd.f32 %v745_v60, %v683_v19 }
 0x25c   : > { %v810_v17 = vpop.permute.xlu2 %809 }
 0x264   : > { %v735_v56 = vpop.permute.xlu0 %734  ;;  %v822_v58 = vpop.permute.xlu2 %821 }
 0x265   : > { %v758_v52 = vadd.f32 %v735_v56, %v678_v1 }
 0x267   : > { %v840_v27 = vadd.f32 %v810_v17, %v758_v52  ;;  %v236_v52 = vmul.f32 %v209_v10, %v2854_v18  ;;  %v288_v17 = vmul.f32 %v2482_v49, %v2880_v34  ;;  %v2484_v18 = vld [vmem:[%s2851_s6 + $0xe0] sm:$0xff]  ;;  %v2716_v10 = vmov 0.0  }
 0x268   : > { %767 = vst.msk [vmem:[#allocation2] sm:$0xff] %vm766_vm0, %v2716_v10  ;;  %v479_v34 = vmul.f32 %v2495_v63, %v2919_v50 }
 0x269   : > { %856 = vrot.lane.b32.xlu2 %v840_v27, %s2715_s26  ;;  %v239_v27 = vmul.f32 %v2824_v13, %v2894_v41  ;;  %v3237_v13 = vld [vmem:[%s4317_s1 + $0xb] ss:$0 sm:$0xff]  ;;  %769 = vst.msk [vmem:[#allocation2 + $0x8] sm:$0x3] %vm768_vm1, %v2716_v10 }
 0x26a   : > { %770 = vst.msk [vmem:[#allocation2 + $0x10] sm:$0xff] %vm766_vm0, %v2716_v10 }
 0x26b   : > { %771 = vst.msk [vmem:[#allocation2 + $0x18] sm:$0x3] %vm768_vm1, %v2716_v10 }
 0x26c   : > { %v830_v54 = vpop.permute.xlu2 %829  ;;  %772 = vst.msk [vmem:[#allocation2 + $0x20] sm:$0xff] %vm766_vm0, %v2716_v10 }
 0x26d   : > { %v845_v9 = vadd.f32 %v830_v54, %v763_v35  ;;  %773 = vst.msk [vmem:[#allocation2 + $0x28] sm:$0x3] %vm768_vm1, %v2716_v10  ;;  %v618_v54 = vmul.f32 %v3064_v57, %v3139_v3 }
 0x26e   : > { %774 = vst.msk [vmem:[#allocation2 + $0x30] sm:$0xff] %vm766_vm0, %v2716_v10 }
 0x26f   : > { %775 = vst.msk [vmem:[#allocation2 + $0x38] sm:$0x3] %vm768_vm1, %v2716_v10 }
 0x270   : > { %776 = vst.msk [vmem:[#allocation2 + $0x40] sm:$0xff] %vm766_vm0, %v2716_v10 }
 0x271   : > { %777 = vst.msk [vmem:[#allocation2 + $0x48] sm:$0x3] %vm768_vm1, %v2716_v10 }
 0x272   : > { %778 = vst.msk [vmem:[#allocation2 + $0x50] sm:$0xff] %vm766_vm0, %v2716_v10 }
 0x273   : > { %779 = vst.msk [vmem:[#allocation2 + $0x58] sm:$0x3] %vm768_vm1, %v2716_v10 }
 0x274   : > { %v3191_v36 = vpop.permute.xlu1 %736  ;;  %780 = vst.msk [vmem:[#allocation2 + $0x60] sm:$0xff] %vm766_vm0, %v2716_v10 }
 0x275   : > { %781 = vst.msk [vmem:[#allocation2 + $0x68] sm:$0x3] %vm768_vm1, %v2716_v10 }
 0x276   : > { %782 = vst.msk [vmem:[#allocation2 + $0x70] sm:$0xff] %vm766_vm0, %v2716_v10 }
 0x277   : > { %783 = vst.msk [vmem:[#allocation2 + $0x78] sm:$0x3] %vm768_vm1, %v2716_v10 }
 0x278   : > { %1554 = vst.msk [vmem:[#allocation3] sm:$0xff] %vm766_vm0, %v2716_v10 }
 0x279   : > { %1555 = vst.msk [vmem:[#allocation3 + $0x8] sm:$0x3] %vm768_vm1, %v2716_v10 }
 0x27a   : > { %1556 = vst.msk [vmem:[#allocation3 + $0x10] sm:$0xff] %vm766_vm0, %v2716_v10 }
 0x27b   : > { %1557 = vst.msk [vmem:[#allocation3 + $0x18] sm:$0x3] %vm768_vm1, %v2716_v10 }
 0x27c   : > { %v741_v8 = vpop.permute.xlu0 %740  ;;  %1558 = vst.msk [vmem:[#allocation3 + $0x20] sm:$0xff] %vm766_vm0, %v2716_v10 }
 0x27d   : > { %v761_v51 = vadd.f32 %v741_v8, %v681_v31  ;;  %v3195_v33 = vpop.permute.xlu1 %742  ;;  %v296_v8 = vadd.f32 %v288_v17, %v239_v27  ;;  %1559 = vst.msk [vmem:[#allocation3 + $0x28] sm:$0x3] %vm768_vm1, %v2716_v10 }
 0x27e   : > { %1560 = vst.msk [vmem:[#allocation3 + $0x30] sm:$0xff] %vm766_vm0, %v2716_v10 }
 0x27f   : > { %v843_v44 = vadd.f32 %v822_v58, %v761_v51  ;;  %v376_v41 = vadd.f32 %v2969_v43, %v296_v8  ;;  %v425_v58 = vmul.f32 %v2955_v26, %v2908_v47  ;;  %v2498_v43 = vld [vmem:[%s2851_s6 + $0x1c0] sm:$0xff]  ;;  %v427_v47 = vmul.f32 %v3002_v59, %v2915_v48  ;;  %v3277_v48 = vld [vmem:[%s4317_s1 + $0xe] ss:$0 sm:$0xff]  ;;  %1561 = vst.msk [vmem:[#allocation3 + $0x38] sm:$0x3] %vm768_vm1, %v2716_v10 }
 0x280   : > { %1562 = vst.msk [vmem:[#allocation3 + $0x40] sm:$0xff] %vm766_vm0, %v2716_v10  ;;  %v3369_v8 = vld [vmem:[%s4317_s1 + $0xd] ss:$0 sm:$0xff] }
 0x281   : > { %862 = vrot.lane.b32.xlu2 %v843_v44, %s2715_s26  ;;  %v2503_v44 = vld [vmem:[%s2851_s6 + $0x91] sm:$0xff]  ;;  %v433_v2 = vadd.f32 %v425_v58, %v376_v41  ;;  %1563 = vst.msk [vmem:[#allocation3 + $0x48] sm:$0x3] %vm768_vm1, %v2716_v10 }
 0x282   : > { %v671_v26 = vmul.f32 %v2503_v44, %v3121_v38  ;;  %1564 = vst.msk [vmem:[#allocation3 + $0x50] sm:$0xff] %vm766_vm0, %v2716_v10 }
 0x283   : > { %1565 = vst.msk [vmem:[#allocation3 + $0x58] sm:$0x3] %vm768_vm1, %v2716_v10 }
 0x284   : > { %v3199_v30 = vpop.permute.xlu0 %746  ;;  %1566 = vst.msk [vmem:[#allocation3 + $0x60] sm:$0xff] %vm766_vm0, %v2716_v10 }
 0x285   : > { %v3201_v28 = vpop.permute.xlu1 %748  ;;  %1567 = vst.msk [vmem:[#allocation3 + $0x68] sm:$0x3] %vm768_vm1, %v2716_v10 }
 0x286   : > { %1568 = vst.msk [vmem:[#allocation3 + $0x70] sm:$0xff] %vm766_vm0, %v2716_v10 }
 0x287   : > { %1569 = vst.msk [vmem:[#allocation3 + $0x78] sm:$0x3] %vm768_vm1, %v2716_v10  ;;  %v4363_v10 = vmov 2  }
 0x28c   : > { %v3206_v4 = vpop.permute.xlu0 %813 }
 0x28d   : > { %v818_v7 = vpop.permute.xlu1 %817 }
 0x28e   : > { %v842_v15 = vadd.f32 %v818_v7, %v760_v12  ;;  %v4361_v7 = vld [vmem:[#allocation6_spill] sm:$0xff] }
 0x28f   : > { %v484_v23 = vmul.f32 %v2500_v6, %v4361_v7 }
 0x290   : > { %860 = vrot.lane.b32.xlu1 %v842_v15, %s2715_s26  ;;  %v2506_v15 = vld [vmem:[%s2851_s6 + $0xc1] sm:$0xff] }
 0x294   : > { %v3211_v1 = vpop.permute.xlu0 %833 }
 0x298   : > { %866 = vrot.lane.b32.xlu1 %v845_v9, %s2715_s26 }
 0x29d   : > { %v258_v56 = vpop.permute.xlu0 %257 }
 0x29e   : > { %v285_v61 = vmul.f32 %v2479_v53, %v258_v56  ;;  %v4362_v53 = vld [vmem:[#allocation7_spill] sm:$0xff]  ;;  %v674_v56 = vmul.f32 %v2506_v15, %v3100_v22 }
 0x2a0   : > { %v293_v60 = vadd.f32 %v285_v61, %v236_v52  ;;  %923 = vperm.xlu1 %2594, %v3219_v20   ;;  %v2508_v52 = vld [vmem:[%s2851_s6 + $0xe1] sm:$0xff]  ;;  %v620_v61 = vmul.f32 %v3114_v29, %v3151_v16 }
 0x2a2   : > { %v373_v31 = vadd.f32 %v2963_v37, %v293_v60 }
 0x2a4   : > { %v430_v51 = vadd.f32 %v422_v25, %v373_v31 }
 0x2a5   : > { %v278_v46 = vpop.permute.xlu0 %277 }
 0x2a6   : > { %v487_v50 = vadd.f32 %v479_v34, %v430_v51  ;;  %v290_v37 = vmul.f32 %v2484_v18, %v278_v46  ;;  %v3374_v18 = vld [vmem:[%s4317_s1 + $0xf] ss:$0 sm:$0xff]  ;;  %v3382_v34 = vld [vmem:[%s4317_s1 + $0xa] ss:$0 sm:$0xff] }
 0x2a8   : > { %v567_v39 = vadd.f32 %v3037_v11, %v487_v50  ;;  %v298_v32 = vadd.f32 %v290_v37, %v241_v62  ;;  %935 = vperm.xlu1 %2594, %v3237_v13   ;;  %v4360_v11 = vld [vmem:[#allocation4_spill] sm:$0xff] }
 0x2a9   : > { %v482_v12 = vmul.f32 %v2498_v43, %v4360_v11 }
 0x2aa   : > { %v378_v42 = vadd.f32 %v4359_v24, %v298_v32  ;;  %v623_v45 = vadd.f32 %v615_v55, %v567_v39 }
 0x2ab   : > { %v490_v38 = vadd.f32 %v482_v12, %v433_v2 }
 0x2ac   : > { %v435_v19 = vadd.f32 %v427_v47, %v378_v42  ;;  %v679_v59 = vadd.f32 %v671_v26, %v623_v45 }
 0x2ad   : > { %v570_v49 = vadd.f32 %v4362_v53, %v490_v38 }
 0x2ae   : > { %v492_v35 = vadd.f32 %v484_v23, %v435_v19  ;;  %v759_v9 = vadd.f32 %v3191_v36, %v679_v59  ;;  %v676_v36 = vmul.f32 %v2508_v52, %v3127_v21  ;;  %v3314_v21 = vld [vmem:[%s4317_s1 + $0x9] ss:$0 sm:$0xff] }
 0x2af   : > { %v626_v22 = vadd.f32 %v618_v54, %v570_v49 }
 0x2b0   : > { %v572_v57 = vadd.f32 %v3080_v5, %v492_v35  ;;  %947 = vperm.xlu1 %2594, %v3277_v48   ;;  %v841_v3 = vadd.f32 %v3206_v4, %v759_v9  ;;  %v826_v5 = vpop.permute.xlu1 %825  ;;  %v2509_v4 = vld [vmem:[%s2851_s6 + $0xf1] sm:$0xff] }
 0x2b1   : > { %v682_v29 = vadd.f32 %v674_v56, %v626_v22  ;;  %v677_v25 = vmul.f32 %v2509_v4, %v3108_v0  ;;  %v4368_v22 = vmov 3  }
 0x2b2   : > { %858 = vrot.lane.b32.xlu0 %v841_v3, %s2715_s26  ;;  %v628_v17 = vadd.f32 %v620_v61, %v572_v57 }
 0x2b3   : > { %v762_v60 = vadd.f32 %v3195_v33, %v682_v29  ;;  %v685_v0 = vadd.f32 %v677_v25, %v3076_v40 }
 0x2b4   : > { %v684_v16 = vadd.f32 %v676_v36, %v628_v17 }
 0x2b5   : > { %v844_v63 = vadd.f32 %v826_v5, %v762_v60 }
 0x2b6   : > { %v764_v27 = vadd.f32 %v3199_v30, %v684_v16  ;;  %v765_v30 = vadd.f32 %v3201_v28, %v685_v0  ;;  %v3361_v28 = vld [vmem:[%s4317_s1 + $0xc] ss:$0 sm:$0xff] }
 0x2b8   : > { %2596 = vset.pattern.permute.xlu1 %v4358_v14  ;;  %v846_v31 = vadd.f32 %v3211_v1, %v764_v27  ;;  %v838_v33 = vpop.permute.xlu1 %837 }
 0x2b9   : > { %967 = vperm.xlu1 %2596, %v3314_v21   ;;  %v847_v1 = vadd.f32 %v838_v33, %v765_v30 }
 0x2ba   : > { %864 = vrot.lane.b32.xlu0 %v844_v63, %s2715_s26  ;;  %868 = vrot.lane.b32.xlu2 %v846_v31, %s2715_s26 }
 0x2c1   : > { %975 = vperm.xlu1 %2596, %v3237_v13  }
 0x2c2   : > { %870 = vrot.lane.b32.xlu0 %v847_v1, %s2715_s26  ;;  %927 = vperm.xlu2 %2593, %v3314_v21  }
 0x2c3   : > { %v857_v40 = vpop.permute.xlu2 %856 }
 0x2c4   : > { %881 = vst.msk [vmem:[#allocation2 + $0x1] sm:$0xff] %vm880_vm2, %v857_v40 }
 0x2c9   : > { %987 = vperm.xlu1 %2596, %v3277_v48  }
 0x2ca   : > { %963 = vperm.xlu0 %2595, %v3219_v20   ;;  %939 = vperm.xlu2 %2593, %v3361_v28  }
 0x2cb   : > { %v3417_v11 = vld [vmem:[#allocation2] sm:$0xff] }
 0x2d1   : > { %2600 = vset.pattern.permute.xlu1 %v4363_v10 }
 0x2d2   : > { %983 = vperm.xlu0 %2595, %v3369_v8   ;;  %951 = vperm.xlu2 %2593, %v3374_v18  }
 0x2da   : > { %2597 = vset.pattern.permute.xlu2 %v4358_v14  ;;  %2599 = vset.pattern.permute.xlu0 %v4363_v10 }
 0x2db   : > { %971 = vperm.xlu2 %2597, %v3382_v34   ;;  %v863_v51 = vpop.permute.xlu2 %862 }
 0x2dc   : > { %884 = vst.msk [vmem:[#allocation2 + $0x31] sm:$0xff] %vm880_vm2, %v863_v51 }
 0x2e3   : > { %979 = vperm.xlu2 %2597, %v3361_v28   ;;  %v3425_v38 = vld [vmem:[#allocation2 + $0x30] sm:$0xff] }
 0x2eb   : > { %991 = vperm.xlu2 %2597, %v3374_v18  }
 0x2f3   : > { %2598 = vset.pattern.permute.xlu2 %v4363_v10 }
 0x302   : > { %v861_v41 = vpop.permute.xlu1 %860 }
 0x303   : > { %883 = vst.msk [vmem:[#allocation2 + $0x21] sm:$0xff] %vm880_vm2, %v861_v41 }
 0x30a   : > { %v867_v46 = vpop.permute.xlu1 %866  ;;  %v3413_v24 = vld [vmem:[#allocation2 + $0x20] sm:$0xff] }
 0x30b   : > { %886 = vst.msk [vmem:[#allocation2 + $0x51] sm:$0xff] %vm880_vm2, %v867_v46 }
 0x312   : > { %v3393_v62 = vpop.permute.xlu1 %923  ;;  %v3427_v35 = vld [vmem:[#allocation2 + $0x50] sm:$0xff] }
 0x314   : > { %v869_v50 = vpop.permute.xlu2 %868 }
 0x315   : > { %887 = vst.msk [vmem:[#allocation2 + $0x61] sm:$0xff] %vm880_vm2, %v869_v50 }
 0x31a   : > { %v3396_v37 = vpop.permute.xlu1 %935 }
 0x31c   : > { %v3398_v58 = vpop.permute.xlu2 %927  ;;  %v3437_v57 = vld [vmem:[#allocation2 + $0x60] sm:$0xff] }
 0x31d   : > { %4367 = vst [vmem:[#allocation7_spill] sm:$0xff] %v3437_v57 }
 0x322   : > { %v3400_v44 = vpop.permute.xlu1 %947 }
 0x323   : > { %4364 = vst [vmem:[#allocation5_spill] sm:$0xff] %v3400_v44 }
 0x324   : > { %v859_v43 = vpop.permute.xlu0 %858  ;;  %v3402_v55 = vpop.permute.xlu2 %939 }
 0x325   : > { %882 = vst.msk [vmem:[#allocation2 + $0x11] sm:$0xff] %vm880_vm2, %v859_v43 }
 0x32b   : > { %v968_v39 = vpop.permute.xlu1 %967 }
 0x32c   : > { %v3405_v32 = vld [vmem:[#allocation2 + $0x10] sm:$0xff]  ;;  %v865_v6 = vpop.permute.xlu0 %864  ;;  %v3407_v2 = vpop.permute.xlu2 %951 }
 0x32d   : > { %4365 = vst [vmem:[#allocation4_spill] sm:$0xff] %v3407_v2  ;;  %v995_v47 = vmul.f32 %v968_v39, %v3405_v32 }
 0x32e   : > { %885 = vst.msk [vmem:[#allocation2 + $0x41] sm:$0xff] %vm880_vm2, %v865_v6 }
 0x32f   : > { %1012 = vrot.lane.b32.xlu1 %v995_v47, %s2710_s7 }
 0x333   : > { %v976_v59 = vpop.permute.xlu1 %975 }
 0x334   : > { %v871_v26 = vpop.permute.xlu0 %870  ;;  %v997_v9 = vmul.f32 %v976_v59, %v3425_v38 }
 0x335   : > { %888 = vst.msk [vmem:[#allocation2 + $0x71] sm:$0xff] %vm880_vm2, %v871_v26  ;;  %v972_v42 = vpop.permute.xlu2 %971  ;;  %v3420_v23 = vld [vmem:[#allocation2 + $0x40] sm:$0xff]  ;;  %v4371_v26 = vmov 4  }
 0x336   : > { %v996_v45 = vmul.f32 %v972_v42, %v3413_v24  ;;  %v4372_v42 = vmov 5  }
 0x338   : > { %1014 = vrot.lane.b32.xlu2 %v996_v45, %s2710_s7 }
 0x33b   : > { %v988_v61 = vpop.permute.xlu1 %987 }
 0x33c   : > { %v964_v12 = vpop.permute.xlu0 %963  ;;  %v3431_v49 = vld [vmem:[#allocation2 + $0x70] sm:$0xff]  ;;  %v1000_v3 = vmul.f32 %v988_v61, %v3437_v57 }
 0x33d   : > { %v994_v7 = vmul.f32 %v964_v12, %v3417_v11  ;;  %v980_v15 = vpop.permute.xlu2 %979  ;;  %4366 = vst [vmem:[#allocation6_spill] sm:$0xff] %v3431_v49 }
 0x33e   : > { %v998_v19 = vmul.f32 %v980_v15, %v3420_v23 }
 0x33f   : > { %1010 = vrot.lane.b32.xlu0 %v994_v7, %s2710_s7 }
 0x340   : > { %1018 = vrot.lane.b32.xlu1 %v998_v19, %s2710_s7 }
 0x344   : > { %v984_v54 = vpop.permute.xlu0 %983 }
 0x345   : > { %v999_v53 = vmul.f32 %v984_v54, %v3427_v35  ;;  %v992_v56 = vpop.permute.xlu2 %991 }
 0x346   : > { %v1001_v52 = vmul.f32 %v992_v56, %v3431_v49 }
 0x347   : > { %1016 = vrot.lane.b32.xlu0 %v997_v9, %s2710_s7  ;;  %1020 = vrot.lane.b32.xlu2 %v999_v53, %s2710_s7 }
 0x348   : > { %1024 = vrot.lane.b32.xlu1 %v1001_v52, %s2710_s7 }
 0x34f   : > { %1022 = vrot.lane.b32.xlu0 %v1000_v3, %s2710_s7  ;;  %1043 = vperm.xlu2 %2598, %v3219_v20   ;;  %v3530_v3 = vld [vmem:[#allocation2 + $0x11] sm:$0xff] }
 0x350   : > { %1051 = vperm.xlu1 %2600, %v3382_v34  }
 0x357   : > { %1047 = vperm.xlu0 %2599, %v3314_v21   ;;  %1055 = vperm.xlu2 %2598, %v3237_v13  }
 0x358   : > { %1059 = vperm.xlu1 %2600, %v3361_v28  }
 0x35f   : > { %1067 = vperm.xlu0 %2599, %v3277_v48   ;;  %1063 = vperm.xlu2 %2598, %v3369_v8  }
 0x360   : > { %1071 = vperm.xlu1 %2600, %v3374_v18  }
 0x367   : > { %2602 = vset.pattern.permute.xlu2 %v4368_v22  ;;  %2603 = vset.pattern.permute.xlu0 %v4368_v22 }
 0x368   : > { %2601 = vset.pattern.permute.xlu1 %v4368_v22 }
 0x392   : > { %v3452_v36 = vpop.permute.xlu2 %1014 }
 0x3a1   : > { %v3454_v17 = vpop.permute.xlu2 %1020  ;;  %v3456_v29 = vpop.permute.xlu1 %1012 }
 0x3a9   : > { %v1044_v5 = vpop.permute.xlu2 %1043 }
 0x3aa   : > { %v1074_v16 = vmul.f32 %v1044_v5, %v3417_v11 }
 0x3ac   : > { %1090 = vrot.lane.b32.xlu2 %v1074_v16, %s2717_s19 }
 0x3b1   : > { %v3460_v4 = vpop.permute.xlu0 %1010  ;;  %v1056_v60 = vpop.permute.xlu2 %1055 }
 0x3b2   : > { %v1077_v27 = vmul.f32 %v1056_v60, %v3425_v38  ;;  %v3463_v25 = vpop.permute.xlu1 %1018 }
 0x3b4   : > { %1096 = vrot.lane.b32.xlu2 %v1077_v27, %s2717_s19 }
 0x3b9   : > { %v3466_v63 = vpop.permute.xlu0 %1016  ;;  %v1064_v1 = vpop.permute.xlu2 %1063 }
 0x3ba   : > { %v3468_v31 = vpop.permute.xlu1 %1024  ;;  %v1079_v41 = vmul.f32 %v1064_v1, %v3427_v35 }
 0x3bb   : > { %4369 = vst [vmem:[#allocation8_spill] sm:$0xff] %v3468_v31 }
 0x3c1   : > { %v3470_v0 = vpop.permute.xlu0 %1022 }
 0x3c2   : > { %4370 = vst [vmem:[#allocation9_spill] sm:$0xff] %v3470_v0  ;;  %v1052_v33 = vpop.permute.xlu1 %1051 }
 0x3c3   : > { %v1076_v30 = vmul.f32 %v1052_v33, %v3413_v24  ;;  %v3538_v33 = vld [vmem:[#allocation2 + $0x41] sm:$0xff] }
 0x3c4   : > { %4378 = vst [vmem:[#allocation15_spill] sm:$0xff] %v3538_v33 }
 0x3c5   : > { %1094 = vrot.lane.b32.xlu1 %v1076_v30, %s2717_s19 }
 0x3c9   : > { %v1048_v40 = vpop.permute.xlu0 %1047 }
 0x3ca   : > { %v1075_v51 = vmul.f32 %v1048_v40, %v3405_v32  ;;  %v1060_v46 = vpop.permute.xlu1 %1059 }
 0x3cb   : > { %v1078_v43 = vmul.f32 %v1060_v46, %v3420_v23 }
 0x3cc   : > { %1092 = vrot.lane.b32.xlu0 %v1075_v51, %s2717_s19 }
 0x3cd   : > { %1100 = vrot.lane.b32.xlu1 %v1079_v41, %s2717_s19  ;;  %v3546_v41 = vld [vmem:[#allocation2 + $0x1] sm:$0xff] }
 0x3d1   : > { %v1068_v50 = vpop.permute.xlu0 %1067 }
 0x3d2   : > { %v1080_v39 = vmul.f32 %v1068_v50, %v3437_v57  ;;  %v1072_v6 = vpop.permute.xlu1 %1071  ;;  %v3679_v57 = vld [vmem:[#allocation2 + $0x62] sm:$0xff] }
 0x3d3   : > { %v1081_v47 = vmul.f32 %v1072_v6, %v3431_v49  ;;  %v3552_v6 = vld [vmem:[#allocation2 + $0x31] sm:$0xff] }
 0x3d4   : > { %1098 = vrot.lane.b32.xlu0 %v1078_v43, %s2717_s19  ;;  %1102 = vrot.lane.b32.xlu2 %v1080_v39, %s2717_s19  ;;  %v3550_v43 = vld [vmem:[#allocation2 + $0x21] sm:$0xff]  ;;  %v3673_v49 = vld [vmem:[#allocation2 + $0x12] sm:$0xff] }
 0x3d5   : > { %1131 = vperm.xlu1 %2601, %v3219_v20  }
 0x3dc   : > { %1104 = vrot.lane.b32.xlu0 %v1081_v47, %s2717_s19  ;;  %1135 = vperm.xlu2 %2602, %v3314_v21  }
 0x3dd   : > { %1143 = vperm.xlu1 %2601, %v3237_v13  }
 0x3e4   : > { %1139 = vperm.xlu0 %2603, %v3382_v34   ;;  %1147 = vperm.xlu2 %2602, %v3361_v28  }
 0x3e5   : > { %1151 = vperm.xlu1 %2601, %v3369_v8  }
 0x3ec   : > { %1159 = vperm.xlu0 %2603, %v3374_v18   ;;  %1155 = vperm.xlu2 %2602, %v3277_v48  }
 0x3ed   : > { %2604 = vset.pattern.permute.xlu1 %v4371_v26 }
 0x3ee   : > { %1179 = vperm.xlu1 %2604, %v3219_v20  }
 0x3f4   : > { %2606 = vset.pattern.permute.xlu0 %v4371_v26  ;;  %2605 = vset.pattern.permute.xlu2 %v4371_v26 }
 0x3f5   : > { %1187 = vperm.xlu0 %2606, %v3382_v34   ;;  %1183 = vperm.xlu2 %2605, %v3314_v21  }
 0x3f6   : > { %1191 = vperm.xlu1 %2604, %v3237_v13  }
 0x3fd   : > { %1207 = vperm.xlu0 %2606, %v3374_v18   ;;  %1195 = vperm.xlu2 %2605, %v3361_v28  }
 0x3fe   : > { %1199 = vperm.xlu1 %2604, %v3369_v8  }
 0x405   : > { %1203 = vperm.xlu2 %2605, %v3277_v48   ;;  %2607 = vset.pattern.permute.xlu0 %v4372_v42 }
 0x406   : > { %2608 = vset.pattern.permute.xlu1 %v4372_v42  ;;  %v3506_v45 = vpop.permute.xlu2 %1090 }
 0x40d   : > { %2609 = vset.pattern.permute.xlu2 %v4372_v42  ;;  %v3560_v42 = vld [vmem:[#allocation2 + $0x61] sm:$0xff] }
 0x40e   : > { %v3508_v12 = vpop.permute.xlu2 %1096  ;;  %4381 = vst [vmem:[#allocation18_spill] sm:$0xff] %v3560_v42 }
 0x42e   : > { %v3510_v7 = vpop.permute.xlu2 %1102 }
 0x42f   : > { %4373 = vst [vmem:[#allocation10_spill] sm:$0xff] %v3510_v7 }
 0x436   : > { %v3512_v15 = vpop.permute.xlu2 %1135 }
 0x437   : > { %v3514_v19 = vpop.permute.xlu1 %1094 }
 0x43e   : > { %v3516_v59 = vpop.permute.xlu0 %1092  ;;  %v3518_v54 = vpop.permute.xlu2 %1147 }
 0x43f   : > { %4374 = vst [vmem:[#allocation11_spill] sm:$0xff] %v3518_v54  ;;  %v3520_v9 = vpop.permute.xlu1 %1100 }
 0x446   : > { %v3522_v53 = vpop.permute.xlu0 %1098  ;;  %v3524_v56 = vpop.permute.xlu2 %1155 }
 0x447   : > { %4375 = vst [vmem:[#allocation12_spill] sm:$0xff] %v3522_v53  ;;  %v3526_v52 = vpop.permute.xlu1 %1131 }
 0x448   : > { %4376 = vst [vmem:[#allocation13_spill] sm:$0xff] %v3524_v56 }
 0x44e   : > { %v3528_v61 = vpop.permute.xlu0 %1104 }
 0x44f   : > { %4377 = vst [vmem:[#allocation14_spill] sm:$0xff] %v3528_v61  ;;  %v3532_v5 = vpop.permute.xlu1 %1143  ;;  %v1184_v16 = vpop.permute.xlu2 %1183 }
 0x450   : > { %v1211_v60 = vmul.f32 %v1184_v16, %v3530_v3 }
 0x452   : > { %1228 = vrot.lane.b32.xlu2 %v1211_v60, %s2710_s7 }
 0x456   : > { %v3536_v27 = vpop.permute.xlu0 %1139 }
 0x457   : > { %v3540_v30 = vpop.permute.xlu1 %1151  ;;  %v1196_v1 = vpop.permute.xlu2 %1195 }
 0x458   : > { %v1214_v40 = vmul.f32 %v1196_v1, %v3538_v33 }
 0x45a   : > { %1234 = vrot.lane.b32.xlu2 %v1214_v40, %s2710_s7  ;;  %v3558_v40 = vld [vmem:[#allocation2 + $0x71] sm:$0xff] }
 0x45b   : > { %4380 = vst [vmem:[#allocation17_spill] sm:$0xff] %v3558_v40 }
 0x45e   : > { %v3544_v51 = vpop.permute.xlu0 %1159 }
 0x45f   : > { %4379 = vst [vmem:[#allocation16_spill] sm:$0xff] %v3544_v51  ;;  %v1204_v1 = vpop.permute.xlu2 %1203 }
 0x460   : > { %v1180_v46 = vpop.permute.xlu1 %1179 }
 0x461   : > { %v1210_v50 = vmul.f32 %v1180_v46, %v3546_v41 }
 0x463   : > { %1226 = vrot.lane.b32.xlu1 %v1210_v50, %s2710_s7  ;;  %v3562_v50 = vld [vmem:[#allocation2 + $0x51] sm:$0xff] }
 0x467   : > { %v1188_v39 = vpop.permute.xlu0 %1187 }
 0x468   : > { %v1212_v47 = vmul.f32 %v1188_v39, %v3550_v43  ;;  %v1192_v16 = vpop.permute.xlu1 %1191  ;;  %v1216_v39 = vmul.f32 %v1204_v1, %v3560_v42 }
 0x469   : > { %v1213_v60 = vmul.f32 %v1192_v16, %v3552_v6 }
 0x46a   : > { %1230 = vrot.lane.b32.xlu0 %v1212_v47, %s2710_s7 }
 0x46b   : > { %1232 = vrot.lane.b32.xlu1 %v1213_v60, %s2710_s7 }
 0x46f   : > { %v1208_v46 = vpop.permute.xlu0 %1207 }
 0x470   : > { %v1217_v26 = vmul.f32 %v1208_v46, %v3558_v40  ;;  %v1200_v22 = vpop.permute.xlu1 %1199 }
 0x471   : > { %v1215_v10 = vmul.f32 %v1200_v22, %v3562_v50  ;;  %v4382_v22 = vmov 6  }
 0x472   : > { %1240 = vrot.lane.b32.xlu2 %v1217_v26, %s2710_s7 }
 0x473   : > { %1236 = vrot.lane.b32.xlu0 %v1215_v10, %s2710_s7  ;;  %1238 = vrot.lane.b32.xlu1 %v1216_v39, %s2710_s7 }
 0x47a   : > { %1267 = vperm.xlu2 %2609, %v3382_v34  }
 0x47b   : > { %1259 = vperm.xlu0 %2607, %v3219_v20   ;;  %1263 = vperm.xlu1 %2608, %v3314_v21  }
 0x482   : > { %1275 = vperm.xlu2 %2609, %v3361_v28  }
 0x483   : > { %1279 = vperm.xlu0 %2607, %v3369_v8   ;;  %1271 = vperm.xlu1 %2608, %v3237_v13  }
 0x48a   : > { %1287 = vperm.xlu2 %2609, %v3374_v18  }
 0x48b   : > { %1283 = vperm.xlu1 %2608, %v3277_v48   ;;  %2611 = vset.pattern.permute.xlu0 %v4382_v22 }
 0x492   : > { %2610 = vset.pattern.permute.xlu2 %v4382_v22 }
 0x493   : > { %2612 = vset.pattern.permute.xlu1 %v4382_v22 }
 0x4ac   : > { %v3581_v10 = vpop.permute.xlu2 %1228 }
 0x4b4   : > { %v3583_v26 = vpop.permute.xlu2 %1234 }
 0x4b5   : > { %4383 = vst [vmem:[#allocation19_spill] sm:$0xff] %v3583_v26 }
 0x4cc   : > { %v3585_v47 = vpop.permute.xlu2 %1240 }
 0x4cd   : > { %4384 = vst [vmem:[#allocation20_spill] sm:$0xff] %v3585_v47 }
 0x4d4   : > { %v1268_v16 = vpop.permute.xlu2 %1267 }
 0x4d5   : > { %v1292_v60 = vmul.f32 %v1268_v16, %v3550_v43  ;;  %v3588_v1 = vpop.permute.xlu1 %1226 }
 0x4d7   : > { %1310 = vrot.lane.b32.xlu2 %v1292_v60, %s2717_s19 }
 0x4dc   : > { %v3591_v46 = vpop.permute.xlu0 %1230  ;;  %v1276_v16 = vpop.permute.xlu2 %1275 }
 0x4dd   : > { %v3593_v39 = vpop.permute.xlu1 %1232 }
 0x4de   : > { %4385 = vst [vmem:[#allocation21_spill] sm:$0xff] %v3593_v39  ;;  %v1294_v39 = vmul.f32 %v1276_v16, %v3538_v33  ;;  %v3681_v33 = vld [vmem:[#allocation2 + $0x22] sm:$0xff] }
 0x4e5   : > { %v3595_v61 = vpop.permute.xlu0 %1236  ;;  %v3597_v22 = vpop.permute.xlu1 %1238 }
 0x4e6   : > { %4386 = vst [vmem:[#allocation22_spill] sm:$0xff] %v3597_v22 }
 0x4ed   : > { %v1260_v7 = vpop.permute.xlu0 %1259  ;;  %v1264_v51 = vpop.permute.xlu1 %1263 }
 0x4ee   : > { %v1290_v56 = vmul.f32 %v1260_v7, %v3546_v41  ;;  %v1291_v47 = vmul.f32 %v1264_v51, %v3530_v3  ;;  %v1288_v7 = vpop.permute.xlu2 %1287 }
 0x4f0   : > { %1306 = vrot.lane.b32.xlu0 %v1290_v56, %s2717_s19  ;;  %1308 = vrot.lane.b32.xlu1 %v1291_v47, %s2717_s19  ;;  %v1297_v47 = vmul.f32 %v1288_v7, %v3558_v40  ;;  %v3657_v40 = vld [vmem:[#allocation2 + $0x2] sm:$0xff] }
 0x4f5   : > { %v1280_v60 = vpop.permute.xlu0 %1279  ;;  %v1272_v26 = vpop.permute.xlu1 %1271 }
 0x4f6   : > { %v1295_v0 = vmul.f32 %v1280_v60, %v3562_v50  ;;  %v1293_v31 = vmul.f32 %v1272_v26, %v3552_v6 }
 0x4f8   : > { %1312 = vrot.lane.b32.xlu0 %v1293_v31, %s2717_s19  ;;  %1316 = vrot.lane.b32.xlu2 %v1295_v0, %s2717_s19  ;;  %v4387_v31 = vmov 7   ;;  %v4388_v0 = vmov 8  }
 0x4f9   : > { %1314 = vrot.lane.b32.xlu1 %v1294_v39, %s2717_s19 }
 0x4fd   : > { %v1284_v51 = vpop.permute.xlu1 %1283 }
 0x4fe   : > { %v1296_v56 = vmul.f32 %v1284_v51, %v3560_v42 }
 0x500   : > { %1318 = vrot.lane.b32.xlu0 %v1296_v56, %s2717_s19  ;;  %1347 = vperm.xlu2 %2610, %v3219_v20  }
 0x501   : > { %1320 = vrot.lane.b32.xlu1 %v1297_v47, %s2717_s19 }
 0x508   : > { %1351 = vperm.xlu0 %2611, %v3314_v21   ;;  %1359 = vperm.xlu2 %2610, %v3237_v13  }
 0x509   : > { %1355 = vperm.xlu1 %2612, %v3382_v34  }
 0x510   : > { %1371 = vperm.xlu0 %2611, %v3277_v48   ;;  %1367 = vperm.xlu2 %2610, %v3369_v8  }
 0x511   : > { %1363 = vperm.xlu1 %2612, %v3361_v28  }
 0x518   : > { %2614 = vset.pattern.permute.xlu0 %v4387_v31  ;;  %2613 = vset.pattern.permute.xlu2 %v4387_v31 }
 0x519   : > { %1375 = vperm.xlu1 %2612, %v3374_v18   ;;  %1399 = vperm.xlu0 %2614, %v3314_v21  }
 0x51a   : > { %1395 = vperm.xlu2 %2613, %v3219_v20  }
 0x521   : > { %2615 = vset.pattern.permute.xlu1 %v4387_v31  ;;  %1419 = vperm.xlu0 %2614, %v3277_v48  }
 0x522   : > { %1407 = vperm.xlu2 %2613, %v3237_v13   ;;  %1403 = vperm.xlu1 %2615, %v3382_v34  }
 0x529   : > { %2618 = vset.pattern.permute.xlu0 %v4388_v0 }
 0x52a   : > { %1415 = vperm.xlu2 %2613, %v3369_v8   ;;  %1411 = vperm.xlu1 %2615, %v3361_v28  }
 0x531   : > { %v3635_v26 = vpop.permute.xlu2 %1310 }
 0x532   : > { %1423 = vperm.xlu1 %2615, %v3374_v18   ;;  %2617 = vset.pattern.permute.xlu2 %v4388_v0 }
 0x53a   : > { %2616 = vset.pattern.permute.xlu1 %v4388_v0 }
 0x552   : > { %v3637_v39 = vpop.permute.xlu2 %1316 }
 0x553   : > { %4389 = vst [vmem:[#allocation23_spill] sm:$0xff] %v3637_v39 }
 0x55a   : > { %v3639_v16 = vpop.permute.xlu2 %1347 }
 0x562   : > { %v3641_v60 = vpop.permute.xlu0 %1306  ;;  %v3643_v7 = vpop.permute.xlu1 %1308 }
 0x563   : > { %4390 = vst [vmem:[#allocation24_spill] sm:$0xff] %v3643_v7  ;;  %v3645_v51 = vpop.permute.xlu2 %1359 }
 0x564   : > { %4391 = vst [vmem:[#allocation25_spill] sm:$0xff] %v3645_v51 }
 0x56a   : > { %v3647_v56 = vpop.permute.xlu0 %1312 }
 0x56b   : > { %4392 = vst [vmem:[#allocation26_spill] sm:$0xff] %v3647_v56  ;;  %v3649_v47 = vpop.permute.xlu1 %1314  ;;  %v3651_v31 = vpop.permute.xlu2 %1367  ;;  %v3665_v56 = vld [vmem:[#allocation2 + $0x32] sm:$0xff] }
 0x56c   : > { %4393 = vst [vmem:[#allocation27_spill] sm:$0xff] %v3649_v47 }
 0x56d   : > { %4394 = vst [vmem:[#allocation28_spill] sm:$0xff] %v3651_v31 }
 0x572   : > { %v3653_v22 = vpop.permute.xlu0 %1318 }
 0x573   : > { %4395 = vst [vmem:[#allocation29_spill] sm:$0xff] %v3653_v22  ;;  %v3655_v0 = vpop.permute.xlu1 %1320 }
 0x574   : > { %4396 = vst [vmem:[#allocation30_spill] sm:$0xff] %v3655_v0  ;;  %v1396_v42 = vpop.permute.xlu2 %1395 }
 0x575   : > { %v1426_v39 = vmul.f32 %v1396_v42, %v3657_v40 }
 0x577   : > { %1442 = vrot.lane.b32.xlu2 %v1426_v39, %s2710_s7 }
 0x57a   : > { %v3661_v2 = vpop.permute.xlu0 %1351 }
 0x57b   : > { %v3663_v51 = vpop.permute.xlu1 %1355 }
 0x57c   : > { %v1408_v47 = vpop.permute.xlu2 %1407 }
 0x57d   : > { %v1429_v31 = vmul.f32 %v1408_v47, %v3665_v56 }
 0x57f   : > { %1448 = vrot.lane.b32.xlu2 %v1429_v31, %s2710_s7 }
 0x582   : > { %v3669_v22 = vpop.permute.xlu0 %1371 }
 0x583   : > { %4397 = vst [vmem:[#allocation31_spill] sm:$0xff] %v3669_v22  ;;  %v3671_v0 = vpop.permute.xlu1 %1363 }
 0x584   : > { %4398 = vst [vmem:[#allocation32_spill] sm:$0xff] %v3671_v0  ;;  %v3687_v0 = vld [vmem:[#allocation2 + $0x52] sm:$0xff] }
 0x58b   : > { %v3675_v42 = vpop.permute.xlu1 %1375  ;;  %v1400_v39 = vpop.permute.xlu0 %1399 }
 0x58c   : > { %4399 = vst [vmem:[#allocation33_spill] sm:$0xff] %v3675_v42  ;;  %v1427_v44 = vmul.f32 %v1400_v39, %v3673_v49  ;;  %v1416_v42 = vpop.permute.xlu2 %1415  ;;  %v3689_v39 = vld [vmem:[#allocation2 + $0x42] sm:$0xff] }
 0x58d   : > { %v1431_v7 = vmul.f32 %v1416_v42, %v3687_v0 }
 0x58e   : > { %1444 = vrot.lane.b32.xlu0 %v1427_v44, %s2710_s7 }
 0x593   : > { %v1420_v54 = vpop.permute.xlu0 %1419 }
 0x594   : > { %v1432_v31 = vmul.f32 %v1420_v54, %v3679_v57  ;;  %v1404_v47 = vpop.permute.xlu1 %1403  ;;  %v3696_v54 = vld [vmem:[#allocation2 + $0x72] sm:$0xff] }
 0x595   : > { %v1428_v22 = vmul.f32 %v1404_v47, %v3681_v33 }
 0x596   : > { %1454 = vrot.lane.b32.xlu2 %v1432_v31, %s2710_s7 }
 0x597   : > { %1446 = vrot.lane.b32.xlu1 %v1428_v22, %s2710_s7 }
 0x59c   : > { %v1412_v44 = vpop.permute.xlu1 %1411 }
 0x59d   : > { %v1430_v53 = vmul.f32 %v1412_v44, %v3689_v39 }
 0x59e   : > { %1479 = vperm.xlu2 %2617, %v3314_v21   ;;  %v4400_v21 = vmov 0  }
 0x59f   : > { %1450 = vrot.lane.b32.xlu0 %v1430_v53, %s2710_s7  ;;  %1452 = vrot.lane.b32.xlu1 %v1431_v7, %s2710_s7 }
 0x5a4   : > { %v1424_v31 = vpop.permute.xlu1 %1423 }
 0x5a5   : > { %v1433_v22 = vmul.f32 %v1424_v31, %v3696_v54 }
 0x5a6   : > { %1491 = vperm.xlu2 %2617, %v3361_v28  }
 0x5a7   : > { %1456 = vrot.lane.b32.xlu0 %v1433_v22, %s2710_s7  ;;  %1475 = vperm.xlu1 %2616, %v3219_v20  }
 0x5ae   : > { %1499 = vperm.xlu2 %2617, %v3277_v48  }
 0x5af   : > { %1483 = vperm.xlu0 %2618, %v3382_v34   ;;  %1487 = vperm.xlu1 %2616, %v3237_v13  }
 0x5b6   : > { %2621 = vset.pattern.permute.xlu2 %v4400_v21 }
 0x5b7   : > { %1503 = vperm.xlu0 %2618, %v3374_v18   ;;  %1495 = vperm.xlu1 %2616, %v3369_v8  }
 0x5bf   : > { %2619 = vset.pattern.permute.xlu0 %v4400_v21  ;;  %2620 = vset.pattern.permute.xlu1 %v4400_v21 }
 0x5c0   : > { %931 = vperm.xlu0 %2619, %v3382_v34  }
 0x5c8   : > { %943 = vperm.xlu0 %2619, %v3369_v8  }
 0x5d1   : > { %v3712_v20 = vpop.permute.xlu2 %1442 }
 0x5d9   : > { %v3714_v48 = vpop.permute.xlu2 %1448 }
 0x5da   : > { %4401 = vst [vmem:[#allocation34_spill] sm:$0xff] %v3714_v48 }
 0x5f0   : > { %v3716_v28 = vpop.permute.xlu2 %1454 }
 0x5f1   : > { %4402 = vst [vmem:[#allocation35_spill] sm:$0xff] %v3716_v28 }
 0x5f8   : > { %v1480_v13 = vpop.permute.xlu2 %1479 }
 0x5f9   : > { %v1507_v53 = vmul.f32 %v1480_v13, %v3673_v49 }
 0x5fb   : > { %1524 = vrot.lane.b32.xlu2 %v1507_v53, %s2717_s19 }
 0x600   : > { %v1492_v18 = vpop.permute.xlu2 %1491  ;;  %v3722_v42 = vpop.permute.xlu0 %1444 }
 0x601   : > { %v1510_v7 = vmul.f32 %v1492_v18, %v3689_v39 }
 0x603   : > { %1530 = vrot.lane.b32.xlu2 %v1510_v7, %s2717_s19 }
 0x608   : > { %v1500_v21 = vpop.permute.xlu2 %1499 }
 0x609   : > { %v1447_v34 = vpop.permute.xlu1 %1446 }
 0x611   : > { %v3724_v8 = vpop.permute.xlu0 %1450  ;;  %v3726_v47 = vpop.permute.xlu1 %1452 }
 0x612   : > { %4403 = vst [vmem:[#allocation36_spill] sm:$0xff] %v3724_v8 }
 0x619   : > { %v3728_v44 = vpop.permute.xlu0 %1456  ;;  %v1476_v31 = vpop.permute.xlu1 %1475 }
 0x61a   : > { %4404 = vst [vmem:[#allocation37_spill] sm:$0xff] %v3728_v44  ;;  %v1506_v22 = vmul.f32 %v1476_v31, %v3657_v40  ;;  %v1512_v31 = vmul.f32 %v1500_v21, %v3679_v57  ;;  %v2676_v21 = vld [vmem:[%s4318_s2 + $0xd] ss:$0 sm:$0xff] }
 0x61c   : > { %1522 = vrot.lane.b32.xlu1 %v1506_v22, %s2717_s19  ;;  %v2673_v22 = vld [vmem:[%s4318_s2 + $0x8] ss:$0 sm:$0xff] }
 0x621   : > { %v1484_v13 = vpop.permute.xlu0 %1483  ;;  %v1488_v53 = vpop.permute.xlu1 %1487 }
 0x622   : > { %v1508_v18 = vmul.f32 %v1484_v13, %v3681_v33  ;;  %v1509_v7 = vmul.f32 %v1488_v53, %v3665_v56  ;;  %v2674_v13 = vld [vmem:[%s4318_s2 + $0xa] ss:$0 sm:$0xff]  ;;  %v2680_v53 = vld [vmem:[%s4318_s2 + $0xe] ss:$0 sm:$0xff] }
 0x624   : > { %1526 = vrot.lane.b32.xlu0 %v1508_v18, %s2717_s19  ;;  %1528 = vrot.lane.b32.xlu1 %v1509_v7, %s2717_s19 }
 0x629   : > { %v1504_v28 = vpop.permute.xlu0 %1503  ;;  %v1496_v8 = vpop.permute.xlu1 %1495 }
 0x62a   : > { %v1513_v44 = vmul.f32 %v1504_v28, %v3696_v54  ;;  %v1511_v48 = vmul.f32 %v1496_v8, %v3687_v0  ;;  %v2675_v28 = vld [vmem:[%s4318_s2 + $0x9] ss:$0 sm:$0xff]  ;;  %v2678_v8 = vld [vmem:[%s4318_s2 + $0xb] ss:$0 sm:$0xff] }
 0x62c   : > { %1532 = vrot.lane.b32.xlu0 %v1511_v48, %s2717_s19  ;;  %1536 = vrot.lane.b32.xlu2 %v1513_v44, %s2717_s19  ;;  %v2677_v48 = vld [vmem:[%s4318_s2 + $0xc] ss:$0 sm:$0xff]  ;;  %v2679_v44 = vld [vmem:[%s4318_s2 + $0xf] ss:$0 sm:$0xff] }
 0x62d   : > { %1534 = vrot.lane.b32.xlu1 %v1512_v31, %s2717_s19 }
 0x632   : > { %v932_v18 = vpop.permute.xlu0 %931 }
 0x633   : > { %v956_v7 = vmul.f32 %v932_v18, %v3413_v24  ;;  %v1380_v18 = vmul.f32 %v3663_v51, %v3681_v33 }
 0x634   : > { %1596 = vperm.xlu0 %2619, %v2673_v22   ;;  %1604 = vperm.xlu2 %2621, %v2674_v13  }
 0x635   : > { %1600 = vperm.xlu1 %2620, %v2675_v28   ;;  %v1036_v22 = vadd.f32 %v3452_v36, %v956_v7  ;;  %v1164_v28 = vmul.f32 %v3536_v27, %v3550_v43  ;;  %v954_v27 = vmul.f32 %v3393_v62, %v3417_v11 }
 0x637   : > { %v1116_v13 = vadd.f32 %v3514_v19, %v1036_v22  ;;  %v1034_v7 = vadd.f32 %v3460_v4, %v954_v27  ;;  %v4413_v27 = vld [vmem:[#allocation23_spill] sm:$0xff] }
 0x63c   : > { %1616 = vperm.xlu0 %2619, %v2676_v21   ;;  %1612 = vperm.xlu2 %2621, %v2677_v48   ;;  %v1172_v21 = vadd.f32 %v1164_v28, %v1116_v13 }
 0x63d   : > { %1608 = vperm.xlu1 %2620, %v2678_v8  }
 0x63e   : > { %v1252_v8 = vadd.f32 %v3591_v46, %v1172_v21  ;;  %v955_v46 = vmul.f32 %v3398_v58, %v3405_v32  ;;  %v1167_v58 = vmul.f32 %v3540_v30, %v3562_v50  ;;  %v4406_v21 = vld [vmem:[#allocation24_spill] sm:$0xff] }
 0x640   : > { %v1035_v13 = vadd.f32 %v3456_v29, %v955_v46  ;;  %v958_v29 = vmul.f32 %v3402_v55, %v3420_v23  ;;  %v1379_v23 = vmul.f32 %v3661_v2, %v3673_v49  ;;  %v4409_v49 = vld [vmem:[#allocation7_spill] sm:$0xff]  ;;  %v4414_v46 = vld [vmem:[#allocation21_spill] sm:$0xff] }
 0x644   : > { %1624 = vperm.xlu2 %2621, %v2679_v44   ;;  %2624 = vset.pattern.permute.xlu0 %v4358_v14  ;;  %v944_v44 = vpop.permute.xlu0 %943 }
 0x645   : > { %1620 = vperm.xlu1 %2620, %v2680_v53   ;;  %v1332_v53 = vadd.f32 %v3635_v26, %v1252_v8  ;;  %v959_v36 = vmul.f32 %v944_v44, %v3427_v35  ;;  %v1162_v26 = vmul.f32 %v3526_v52, %v3546_v41  ;;  %v1114_v35 = vadd.f32 %v3506_v45, %v1034_v7 }
 0x646   : > { %v1163_v52 = vmul.f32 %v3512_v15, %v3530_v3  ;;  %v1165_v15 = vmul.f32 %v3532_v5, %v3552_v6  ;;  %v4407_v6 = vld [vmem:[#allocation15_spill] sm:$0xff] }
 0x647   : > { %v1388_v19 = vadd.f32 %v1380_v18, %v1332_v53  ;;  %v1039_v43 = vadd.f32 %v3454_v17, %v959_v36  ;;  %v1115_v17 = vadd.f32 %v3516_v59, %v1035_v13  ;;  %v1170_v32 = vadd.f32 %v1162_v26, %v1114_v35  ;;  %v4410_v18 = vld [vmem:[#allocation5_spill] sm:$0xff] }
 0x648   : > { %v957_v59 = vmul.f32 %v3396_v37, %v3425_v38  ;;  %v960_v36 = vmul.f32 %v4410_v18, %v4409_v49  ;;  %v4431_v49 = vld [vmem:[#allocation20_spill] sm:$0xff] }
 0x649   : > { %v1468_v22 = vadd.f32 %v1447_v34, %v1388_v19  ;;  %v1119_v62 = vadd.f32 %v3520_v9, %v1039_v43  ;;  %v1250_v41 = vadd.f32 %v3588_v1, %v1170_v32  ;;  %v1171_v9 = vadd.f32 %v1163_v52, %v1115_v17  ;;  %v4419_v32 = vld [vmem:[#allocation26_spill] sm:$0xff] }
 0x64a   : > { %v1038_v34 = vadd.f32 %v3463_v25, %v958_v29  ;;  %v1037_v50 = vadd.f32 %v3466_v63, %v957_v59  ;;  %v1378_v1 = vmul.f32 %v3639_v16, %v3657_v40  ;;  %v4411_v40 = vld [vmem:[#allocation6_spill] sm:$0xff]  ;;  %v4412_v16 = vld [vmem:[#allocation4_spill] sm:$0xff] }
 0x64b   : > { %v1175_v45 = vadd.f32 %v1167_v58, %v1119_v62  ;;  %v1330_v30 = vadd.f32 %v3641_v60, %v1250_v41  ;;  %v1251_v55 = vadd.f32 %v3581_v10, %v1171_v9  ;;  %v4405_v60 = vld [vmem:[#allocation12_spill] sm:$0xff]  ;;  %v4408_v10 = vld [vmem:[#allocation11_spill] sm:$0xff]  ;;  %v4423_v9 = vld [vmem:[#allocation17_spill] sm:$0xff] }
 0x64c   : > { %v1117_v25 = vadd.f32 %v3508_v12, %v1037_v50  ;;  %v1118_v63 = vadd.f32 %v4405_v60, %v1038_v34  ;;  %v1166_v44 = vmul.f32 %v4408_v10, %v4407_v6  ;;  %v4417_v62 = vld [vmem:[#allocation28_spill] sm:$0xff]  ;;  %v4428_v60 = vld [vmem:[#allocation14_spill] sm:$0xff] }
 0x64d   : > { %v1255_v37 = vadd.f32 %v3595_v61, %v1175_v45  ;;  %v1331_v8 = vadd.f32 %v4406_v21, %v1251_v55  ;;  %v1386_v5 = vadd.f32 %v1378_v1, %v1330_v30  ;;  %v961_v61 = vmul.f32 %v4412_v16, %v4411_v40  ;;  %v4421_v45 = vld [vmem:[#allocation18_spill] sm:$0xff]  ;;  %v4424_v34 = vld [vmem:[#allocation16_spill] sm:$0xff] }
 0x64e   : > { %v1173_v53 = vadd.f32 %v1165_v15, %v1117_v25  ;;  %v1174_v43 = vadd.f32 %v1166_v44, %v1118_v63  ;;  %v1169_v30 = vmul.f32 %v4424_v34, %v4423_v9  ;;  %v4427_v25 = vld [vmem:[#allocation10_spill] sm:$0xff]  ;;  %v4439_v9 = vmov 1  }
 0x64f   : > { %v1387_v2 = vadd.f32 %v1379_v23, %v1331_v8  ;;  %v1466_v19 = vadd.f32 %v3712_v20, %v1386_v5  ;;  %v1335_v12 = vadd.f32 %v4413_v27, %v1255_v37  ;;  %v4420_v20 = vld [vmem:[#allocation32_spill] sm:$0xff]  ;;  %v4426_v23 = vld [vmem:[#allocation27_spill] sm:$0xff]  ;;  %v4429_v44 = vld [vmem:[#allocation34_spill] sm:$0xff]  ;;  %v4440_v34 = vmov 2  }
 0x650   : > { %v1253_v7 = vadd.f32 %v4414_v46, %v1173_v53  ;;  %v1382_v52 = vmul.f32 %v4420_v20, %v3689_v39  ;;  %v4430_v53 = vld [vmem:[#allocation36_spill] sm:$0xff]  ;;  %v4434_v27 = vld [vmem:[#allocation33_spill] sm:$0xff] }
 0x651   : > { %v1467_v26 = vadd.f32 %v3722_v42, %v1387_v2  ;;  %v4422_v42 = vld [vmem:[#allocation13_spill] sm:$0xff] }
 0x652   : > { %v1168_v59 = vmul.f32 %v4422_v42, %v4421_v45  ;;  %v3902_v45 = vld [vmem:[%s4317_s1 + $0x17] ss:$0 sm:$0xff]  ;;  %v3907_v42 = vld [vmem:[%s4317_s1 + $0x15] ss:$0 sm:$0xff] }
 0x655   : > { %v3768_v31 = vpop.permute.xlu2 %1524 }
 0x656   : > { %v1547_v29 = vadd.f32 %v3768_v31, %v1467_v26 }
 0x65d   : > { %v3774_v48 = vpop.permute.xlu2 %1530 }
 0x686   : > { %v3778_v14 = vpop.permute.xlu2 %1536 }
 0x68e   : > { %v1523_v24 = vpop.permute.xlu1 %1522  ;;  %v1605_v28 = vpop.permute.xlu2 %1604 }
 0x68f   : > { %v1546_v17 = vadd.f32 %v1523_v24, %v1466_v19  ;;  %v4425_v24 = vld [vmem:[#allocation25_spill] sm:$0xff] }
 0x690   : > { %v1381_v55 = vmul.f32 %v4425_v24, %v3665_v56 }
 0x696   : > { %v1527_v33 = vpop.permute.xlu0 %1526  ;;  %v3792_v51 = vpop.permute.xlu1 %1528 }
 0x697   : > { %v1548_v11 = vadd.f32 %v1527_v33, %v1468_v22  ;;  %v4415_v22 = vld [vmem:[#allocation8_spill] sm:$0xff]  ;;  %v4416_v33 = vld [vmem:[#allocation9_spill] sm:$0xff]  ;;  %v1613_v6 = vpop.permute.xlu2 %1612 }
 0x698   : > { %v1041_v13 = vadd.f32 %v4415_v22, %v961_v61  ;;  %v1040_v35 = vadd.f32 %v4416_v33, %v960_v36  ;;  %v4432_v36 = vld [vmem:[#allocation22_spill] sm:$0xff]  ;;  %v4433_v61 = vld [vmem:[#allocation31_spill] sm:$0xff]  ;;  %v4435_v22 = vld [vmem:[#allocation29_spill] sm:$0xff] }
 0x699   : > { %v1629_v4 = vadd.f32 %v1605_v28, %v1548_v11  ;;  %v1383_v11 = vmul.f32 %v4417_v62, %v3687_v0  ;;  %v4418_v28 = vld [vmem:[#allocation19_spill] sm:$0xff]  ;;  %v1384_v19 = vmul.f32 %v4433_v61, %v3679_v57  ;;  %v4436_v33 = vld [vmem:[#allocation30_spill] sm:$0xff] }
 0x69a   : > { %v1254_v58 = vadd.f32 %v4418_v28, %v1174_v43  ;;  %v1120_v39 = vadd.f32 %v4427_v25, %v1040_v35  ;;  %v1121_v31 = vadd.f32 %v4428_v60, %v1041_v13 }
 0x69b   : > { %1647 = vrot.lane.b32.xlu2 %v1629_v4, %s2715_s26  ;;  %v1333_v4 = vadd.f32 %v4419_v32, %v1253_v7  ;;  %v1391_v50 = vadd.f32 %v1383_v11, %v1335_v12  ;;  %v1385_v12 = vmul.f32 %v4434_v27, %v3696_v54  ;;  %v4437_v54 = vld [vmem:[#allocation35_spill] sm:$0xff] }
 0x69c   : > { %v1334_v1 = vadd.f32 %v4426_v23, %v1254_v58  ;;  %v1177_v8 = vadd.f32 %v1169_v30, %v1121_v31  ;;  %v1176_v5 = vadd.f32 %v1168_v59, %v1120_v39  ;;  %v3874_v58 = vld [vmem:[%s4317_s1 + $0x10] ss:$0 sm:$0xff]  ;;  %v3915_v59 = vld [vmem:[%s4317_s1 + $0x11] ss:$0 sm:$0xff]  ;;  %v3925_v30 = vld [vmem:[%s4317_s1 + $0x14] ss:$0 sm:$0xff] }
 0x69d   : > { %v1389_v63 = vadd.f32 %v1381_v55, %v1333_v4  ;;  %v1471_v10 = vadd.f32 %v3726_v47, %v1391_v50 }
 0x69e   : > { %v1533_v3 = vpop.permute.xlu0 %1532  ;;  %v1390_v21 = vadd.f32 %v1382_v52, %v1334_v1  ;;  %v1257_v18 = vadd.f32 %v4431_v49, %v1177_v8  ;;  %v1256_v40 = vadd.f32 %v4432_v36, %v1176_v5 }
 0x69f   : > { %v3818_v38 = vpop.permute.xlu1 %1534  ;;  %v1469_v56 = vadd.f32 %v4429_v44, %v1389_v63  ;;  %v1551_v16 = vadd.f32 %v1533_v3, %v1471_v10  ;;  %v1625_v28 = vpop.permute.xlu2 %1624 }
 0x6a0   : > { %v1470_v2 = vadd.f32 %v4430_v53, %v1390_v21  ;;  %v1336_v13 = vadd.f32 %v4435_v22, %v1256_v40  ;;  %v1337_v35 = vadd.f32 %v4436_v33, %v1257_v18 }
 0x6a1   : > { %v1549_v46 = vadd.f32 %v3792_v51, %v1469_v56  ;;  %v4438_v51 = vld [vmem:[#allocation37_spill] sm:$0xff] }
 0x6a2   : > { %v1550_v43 = vadd.f32 %v3774_v48, %v1470_v2  ;;  %v1392_v3 = vadd.f32 %v1384_v19, %v1336_v13  ;;  %v1393_v57 = vadd.f32 %v1385_v12, %v1337_v35  ;;  %v4441_v13 = vmov 3  }
 0x6a4   : > { %v1631_v62 = vadd.f32 %v1613_v6, %v1550_v43  ;;  %v1472_v48 = vadd.f32 %v4437_v54, %v1392_v3 }
 0x6a6   : > { %v1597_v41 = vpop.permute.xlu0 %1596  ;;  %v1552_v4 = vadd.f32 %v3818_v38, %v1472_v48  ;;  %v3897_v38 = vld [vmem:[%s4317_s1 + $0x16] ss:$0 sm:$0xff] }
 0x6a7   : > { %v1627_v15 = vadd.f32 %v1597_v41, %v1546_v17  ;;  %v1601_v0 = vpop.permute.xlu1 %1600  ;;  %v1473_v17 = vadd.f32 %v4438_v51, %v1393_v57  ;;  %v3884_v41 = vld [vmem:[%s4317_s1 + $0x13] ss:$0 sm:$0xff] }
 0x6a8   : > { %v1628_v37 = vadd.f32 %v1601_v0, %v1547_v29 }
 0x6a9   : > { %1643 = vrot.lane.b32.xlu0 %v1627_v15, %s2715_s26  ;;  %v1553_v32 = vadd.f32 %v3778_v14, %v1473_v17  ;;  %v3889_v14 = vld [vmem:[%s4317_s1 + $0x12] ss:$0 sm:$0xff] }
 0x6aa   : > { %1645 = vrot.lane.b32.xlu1 %v1628_v37, %s2715_s26 }
 0x6ab   : > { %v1634_v52 = vadd.f32 %v1625_v28, %v1553_v32 }
 0x6ae   : > { %v1617_v47 = vpop.permute.xlu0 %1616 }
 0x6af   : > { %v1632_v7 = vadd.f32 %v1617_v47, %v1551_v16  ;;  %v1609_v26 = vpop.permute.xlu1 %1608 }
 0x6b0   : > { %v1630_v11 = vadd.f32 %v1609_v26, %v1549_v46 }
 0x6b1   : > { %1653 = vrot.lane.b32.xlu2 %v1632_v7, %s2715_s26 }
 0x6b2   : > { %1649 = vrot.lane.b32.xlu0 %v1630_v11, %s2715_s26  ;;  %1651 = vrot.lane.b32.xlu1 %v1631_v62, %s2715_s26 }
 0x6b7   : > { %v1621_v20 = vpop.permute.xlu1 %1620 }
 0x6b8   : > { %v1633_v29 = vadd.f32 %v1621_v20, %v1552_v4 }
 0x6b9   : > { %1709 = vperm.xlu2 %2621, %v3874_v58  }
 0x6ba   : > { %1655 = vrot.lane.b32.xlu0 %v1633_v29, %s2715_s26  ;;  %1657 = vrot.lane.b32.xlu1 %v1634_v52, %s2715_s26 }
 0x6c1   : > { %1721 = vperm.xlu2 %2621, %v3884_v41  }
 0x6c2   : > { %1757 = vperm.xlu0 %2624, %v3889_v14   ;;  %1717 = vperm.xlu1 %2620, %v3889_v14  }
 0x6c9   : > { %1733 = vperm.xlu2 %2621, %v3897_v38  }
 0x6ca   : > { %1777 = vperm.xlu0 %2624, %v3902_v45   ;;  %1729 = vperm.xlu1 %2620, %v3907_v42  }
 0x6d1   : > { %2623 = vset.pattern.permute.xlu2 %v4439_v9 }
 0x6d2   : > { %2622 = vset.pattern.permute.xlu1 %v4439_v9  ;;  %1753 = vperm.xlu2 %2623, %v3915_v59  }
 0x6d3   : > { %1749 = vperm.xlu1 %2622, %v3874_v58   ;;  %2625 = vset.pattern.permute.xlu0 %v4440_v34 }
 0x6da   : > { %1765 = vperm.xlu2 %2623, %v3925_v30  }
 0x6db   : > { %1761 = vperm.xlu1 %2622, %v3884_v41  }
 0x6e2   : > { %1773 = vperm.xlu2 %2623, %v3897_v38  }
 0x6e3   : > { %1769 = vperm.xlu1 %2622, %v3907_v42  }
 0x6ea   : > { %2627 = vset.pattern.permute.xlu2 %v4440_v34 }
 0x6eb   : > { %2626 = vset.pattern.permute.xlu1 %v4440_v34 }
 0x6f5   : > { %v1648_v50 = vpop.permute.xlu2 %1647 }
 0x6f6   : > { %1669 = vst.msk [vmem:[#allocation3 + $0x21] sm:$0xff] %vm880_vm2, %v1648_v50 }
 0x6fd   : > { %v1677_v5 = vld [vmem:[#allocation3 + $0x20] sm:$0xff] }
 0x70b   : > { %v1654_v15 = vpop.permute.xlu2 %1653 }
 0x70c   : > { %1672 = vst.msk [vmem:[#allocation3 + $0x51] sm:$0xff] %vm880_vm2, %v1654_v15 }
 0x713   : > { %v3935_v0 = vpop.permute.xlu2 %1709  ;;  %v1680_v46 = vld [vmem:[#allocation3 + $0x50] sm:$0xff] }
 0x71b   : > { %v1644_v24 = vpop.permute.xlu0 %1643  ;;  %v3937_v55 = vpop.permute.xlu2 %1721 }
 0x71c   : > { %1667 = vst.msk [vmem:[#allocation3 + $0x1] sm:$0xff] %vm880_vm2, %v1644_v24  ;;  %v1646_v23 = vpop.permute.xlu1 %1645 }
 0x71d   : > { %1668 = vst.msk [vmem:[#allocation3 + $0x11] sm:$0xff] %vm880_vm2, %v1646_v23 }
 0x723   : > { %v3941_v1 = vpop.permute.xlu2 %1733  ;;  %v1675_v40 = vld [vmem:[#allocation3] sm:$0xff] }
 0x724   : > { %v1650_v37 = vpop.permute.xlu0 %1649  ;;  %v1652_v25 = vpop.permute.xlu1 %1651  ;;  %v3946_v31 = vld [vmem:[#allocation3 + $0x10] sm:$0xff]  ;;  %v1740_v51 = vmul.f32 %v3935_v0, %v1675_v40 }
 0x725   : > { %1670 = vst.msk [vmem:[#allocation3 + $0x31] sm:$0xff] %vm880_vm2, %v1650_v37 }
 0x726   : > { %1671 = vst.msk [vmem:[#allocation3 + $0x41] sm:$0xff] %vm880_vm2, %v1652_v25 }
 0x72c   : > { %v1656_v39 = vpop.permute.xlu0 %1655  ;;  %v1658_v60 = vpop.permute.xlu1 %1657  ;;  %v1678_v19 = vld [vmem:[#allocation3 + $0x30] sm:$0xff] }
 0x72d   : > { %1673 = vst.msk [vmem:[#allocation3 + $0x61] sm:$0xff] %vm880_vm2, %v1656_v39  ;;  %v1754_v63 = vpop.permute.xlu2 %1753  ;;  %v3951_v44 = vld [vmem:[#allocation3 + $0x40] sm:$0xff]  ;;  %v1743_v32 = vmul.f32 %v3937_v55, %v1678_v19 }
 0x72e   : > { %1674 = vst.msk [vmem:[#allocation3 + $0x71] sm:$0xff] %vm880_vm2, %v1658_v60  ;;  %v1781_v21 = vmul.f32 %v1754_v63, %v3946_v31 }
 0x730   : > { %1798 = vrot.lane.b32.xlu2 %v1781_v21, %s2710_s7 }
 0x734   : > { %v1758_v8 = vpop.permute.xlu0 %1757  ;;  %v1718_v6 = vpop.permute.xlu1 %1717  ;;  %v1681_v7 = vld [vmem:[#allocation3 + $0x60] sm:$0xff] }
 0x735   : > { %v1782_v10 = vmul.f32 %v1758_v8, %v1677_v5  ;;  %v1766_v56 = vpop.permute.xlu2 %1765  ;;  %v3956_v49 = vld [vmem:[#allocation3 + $0x70] sm:$0xff]  ;;  %v1742_v57 = vmul.f32 %v1718_v6, %v1677_v5  ;;  %v1746_v9 = vmul.f32 %v3941_v1, %v1681_v7 }
 0x736   : > { %v1784_v53 = vmul.f32 %v1766_v56, %v3951_v44 }
 0x737   : > { %1800 = vrot.lane.b32.xlu0 %v1782_v10, %s2710_s7  ;;  %v4442_v10 = vmov 4  }
 0x738   : > { %1804 = vrot.lane.b32.xlu2 %v1784_v53, %s2710_s7 }
 0x73c   : > { %v1778_v2 = vpop.permute.xlu0 %1777  ;;  %v1730_v18 = vpop.permute.xlu1 %1729 }
 0x73d   : > { %v1787_v36 = vmul.f32 %v1778_v2, %v3956_v49  ;;  %v1774_v43 = vpop.permute.xlu2 %1773  ;;  %v1745_v52 = vmul.f32 %v1730_v18, %v1680_v46  ;;  %v4443_v2 = vmov 5  }
 0x73e   : > { %v1786_v22 = vmul.f32 %v1774_v43, %v1681_v7 }
 0x740   : > { %1810 = vrot.lane.b32.xlu2 %v1787_v36, %s2710_s7 }
 0x745   : > { %v1750_v16 = vpop.permute.xlu1 %1749 }
 0x746   : > { %v1780_v61 = vmul.f32 %v1750_v16, %v1675_v40  ;;  %v4021_v16 = vld [vmem:[#allocation3 + $0x1] sm:$0xff] }
 0x748   : > { %1796 = vrot.lane.b32.xlu1 %v1780_v61, %s2710_s7  ;;  %1837 = vperm.xlu2 %2627, %v3889_v14  }
 0x74d   : > { %v1762_v27 = vpop.permute.xlu1 %1761 }
 0x74e   : > { %v1783_v12 = vmul.f32 %v1762_v27, %v1678_v19 }
 0x750   : > { %1802 = vrot.lane.b32.xlu1 %v1783_v12, %s2710_s7  ;;  %1845 = vperm.xlu2 %2627, %v3925_v30  }
 0x755   : > { %v1770_v47 = vpop.permute.xlu1 %1769 }
 0x756   : > { %v1785_v26 = vmul.f32 %v1770_v47, %v1680_v46  ;;  %v4028_v47 = vld [vmem:[#allocation3 + $0x51] sm:$0xff] }
 0x758   : > { %1806 = vrot.lane.b32.xlu0 %v1785_v26, %s2710_s7  ;;  %1857 = vperm.xlu2 %2627, %v3902_v45   ;;  %v4030_v26 = vld [vmem:[#allocation3 + $0x31] sm:$0xff] }
 0x759   : > { %1808 = vrot.lane.b32.xlu1 %v1786_v22, %s2710_s7 }
 0x760   : > { %1829 = vperm.xlu0 %2625, %v3874_v58   ;;  %2628 = vset.pattern.permute.xlu2 %v4441_v13 }
 0x761   : > { %1833 = vperm.xlu1 %2626, %v3915_v59  }
 0x768   : > { %1849 = vperm.xlu0 %2625, %v3907_v42  }
 0x769   : > { %1841 = vperm.xlu1 %2626, %v3884_v41  }
 0x770   : > { %2629 = vset.pattern.permute.xlu0 %v4441_v13 }
 0x771   : > { %1853 = vperm.xlu1 %2626, %v3897_v38  }
 0x779   : > { %2630 = vset.pattern.permute.xlu1 %v4441_v13 }
 0x78a   : > { %v3975_v33 = vpop.permute.xlu2 %1798 }
 0x792   : > { %v3977_v35 = vpop.permute.xlu2 %1804 }
 0x79a   : > { %v3979_v62 = vpop.permute.xlu2 %1810 }
 0x7a2   : > { %v1838_v11 = vpop.permute.xlu2 %1837 }
 0x7a3   : > { %v1862_v3 = vmul.f32 %v1838_v11, %v1677_v5 }
 0x7a5   : > { %1880 = vrot.lane.b32.xlu2 %v1862_v3, %s2717_s19 }
 0x7a9   : > { %v1801_v54 = vpop.permute.xlu0 %1800 }
 0x7aa   : > { %v1822_v48 = vadd.f32 %v1801_v54, %v1742_v57  ;;  %v1846_v55 = vpop.permute.xlu2 %1845 }
 0x7ab   : > { %v1864_v63 = vmul.f32 %v1846_v55, %v3951_v44 }
 0x7b2   : > { %v1858_v21 = vpop.permute.xlu2 %1857 }
 0x7b3   : > { %v1867_v5 = vmul.f32 %v1858_v21, %v3956_v49 }
 0x7ba   : > { %v1797_v17 = vpop.permute.xlu1 %1796 }
 0x7bb   : > { %v1820_v28 = vadd.f32 %v1797_v17, %v1740_v51 }
 0x7c2   : > { %v1803_v4 = vpop.permute.xlu1 %1802 }
 0x7c3   : > { %v3984_v20 = vadd.f32 %v1803_v4, %v1743_v32 }
 0x7ca   : > { %v1807_v29 = vpop.permute.xlu0 %1806 }
 0x7cb   : > { %v1825_v34 = vadd.f32 %v1807_v29, %v1745_v52  ;;  %v1809_v50 = vpop.permute.xlu1 %1808  ;;  %v4046_v29 = vld [vmem:[#allocation3 + $0x21] sm:$0xff] }
 0x7cc   : > { %v3987_v15 = vadd.f32 %v1809_v50, %v1746_v9 }
 0x7d2   : > { %v1830_v24 = vpop.permute.xlu0 %1829 }
 0x7d3   : > { %v1860_v23 = vmul.f32 %v1830_v24, %v1675_v40  ;;  %v1834_v37 = vpop.permute.xlu1 %1833 }
 0x7d4   : > { %v1861_v0 = vmul.f32 %v1834_v37, %v3946_v31 }
 0x7d5   : > { %1876 = vrot.lane.b32.xlu0 %v1860_v23, %s2717_s19  ;;  %v4051_v23 = vld [vmem:[#allocation3 + $0x61] sm:$0xff] }
 0x7d6   : > { %1878 = vrot.lane.b32.xlu1 %v1861_v0, %s2717_s19 }
 0x7da   : > { %v1850_v25 = vpop.permute.xlu0 %1849 }
 0x7db   : > { %v1865_v39 = vmul.f32 %v1850_v25, %v1680_v46  ;;  %v1842_v60 = vpop.permute.xlu1 %1841 }
 0x7dc   : > { %v1863_v1 = vmul.f32 %v1842_v60, %v1678_v19 }
 0x7dd   : > { %1886 = vrot.lane.b32.xlu2 %v1865_v39, %s2717_s19  ;;  %v4058_v39 = vld [vmem:[#allocation3 + $0x11] sm:$0xff] }
 0x7de   : > { %1882 = vrot.lane.b32.xlu0 %v1863_v1, %s2717_s19  ;;  %1884 = vrot.lane.b32.xlu1 %v1864_v63, %s2717_s19 }
 0x7e3   : > { %v1854_v8 = vpop.permute.xlu1 %1853 }
 0x7e4   : > { %v1866_v6 = vmul.f32 %v1854_v8, %v1681_v7 }
 0x7e5   : > { %1917 = vperm.xlu2 %2628, %v3874_v58  }
 0x7e6   : > { %1888 = vrot.lane.b32.xlu0 %v1866_v6, %s2717_s19  ;;  %1890 = vrot.lane.b32.xlu1 %v1867_v5, %s2717_s19 }
 0x7ed   : > { %1929 = vperm.xlu2 %2628, %v3884_v41  }
 0x7ee   : > { %1921 = vperm.xlu0 %2629, %v3915_v59   ;;  %1925 = vperm.xlu1 %2630, %v3889_v14  }
 0x7f5   : > { %1937 = vperm.xlu2 %2628, %v3907_v42  }
 0x7f6   : > { %1941 = vperm.xlu0 %2629, %v3897_v38   ;;  %1933 = vperm.xlu1 %2630, %v3925_v30  }
 0x7fd   : > { %2631 = vset.pattern.permute.xlu2 %v4442_v10 }
 0x7fe   : > { %2632 = vset.pattern.permute.xlu0 %v4442_v10  ;;  %1945 = vperm.xlu1 %2630, %v3902_v45  }
 0x7ff   : > { %1969 = vperm.xlu0 %2632, %v3915_v59   ;;  %1965 = vperm.xlu2 %2631, %v3874_v58   ;;  %v1881_v56 = vpop.permute.xlu2 %1880 }
 0x800   : > { %v1902_v53 = vadd.f32 %v1881_v56, %v1822_v48 }
 0x806   : > { %2633 = vset.pattern.permute.xlu1 %v4442_v10  ;;  %v4066_v10 = vld [vmem:[#allocation3 + $0x41] sm:$0xff] }
 0x807   : > { %1989 = vperm.xlu0 %2632, %v3897_v38   ;;  %1977 = vperm.xlu2 %2631, %v3884_v41  }
 0x808   : > { %1973 = vperm.xlu1 %2633, %v3889_v14  }
 0x80f   : > { %1985 = vperm.xlu2 %2631, %v3907_v42   ;;  %2636 = vset.pattern.permute.xlu0 %v4443_v2 }
 0x810   : > { %1981 = vperm.xlu1 %2633, %v3925_v30  }
 0x817   : > { %2635 = vset.pattern.permute.xlu2 %v4443_v2 }
 0x818   : > { %1993 = vperm.xlu1 %2633, %v3902_v45  }
 0x820   : > { %2634 = vset.pattern.permute.xlu1 %v4443_v2 }
 0x837   : > { %v1887_v18 = vpop.permute.xlu2 %1886 }
 0x838   : > { %v1905_v36 = vadd.f32 %v1887_v18, %v1825_v34  ;;  %v4073_v18 = vld [vmem:[#allocation3 + $0x71] sm:$0xff] }
 0x83f   : > { %v1918_v40 = vpop.permute.xlu2 %1917 }
 0x840   : > { %v1948_v27 = vmul.f32 %v1918_v40, %v4021_v16 }
 0x847   : > { %v1877_v61 = vpop.permute.xlu0 %1876  ;;  %v1930_v19 = vpop.permute.xlu2 %1929 }
 0x848   : > { %v1900_v12 = vadd.f32 %v1877_v61, %v1820_v28  ;;  %v4024_v43 = vpop.permute.xlu1 %1878  ;;  %v1951_v3 = vmul.f32 %v1930_v19, %v4030_v26  ;;  %v4444_v61 = vmov 6  }
 0x84a   : > { %v4026_v46 = vadd.f32 %v1948_v27, %v1900_v12 }
 0x84f   : > { %v1938_v7 = vpop.permute.xlu2 %1937 }
 0x850   : > { %v1883_v22 = vpop.permute.xlu0 %1882  ;;  %v4032_v13 = vpop.permute.xlu1 %1884  ;;  %v1953_v11 = vmul.f32 %v1938_v7, %v4028_v47 }
 0x851   : > { %v1903_v57 = vadd.f32 %v1883_v22, %v3984_v20 }
 0x852   : > { %v4037_v54 = vadd.f32 %v1953_v11, %v1905_v36 }
 0x853   : > { %v1959_v48 = vadd.f32 %v1951_v3, %v1903_v57 }
 0x858   : > { %v1889_v51 = vpop.permute.xlu0 %1888  ;;  %v4039_v17 = vpop.permute.xlu1 %1890 }
 0x859   : > { %v1906_v28 = vadd.f32 %v1889_v51, %v3987_v15  ;;  %v1966_v32 = vpop.permute.xlu2 %1965 }
 0x85a   : > { %v1996_v4 = vmul.f32 %v1966_v32, %v4021_v16 }
 0x85c   : > { %2012 = vrot.lane.b32.xlu2 %v1996_v4, %s2710_s7 }
 0x860   : > { %v4044_v52 = vpop.permute.xlu0 %1921  ;;  %v1926_v9 = vpop.permute.xlu1 %1925 }
 0x861   : > { %v1950_v20 = vmul.f32 %v1926_v9, %v4046_v29  ;;  %v1978_v34 = vpop.permute.xlu2 %1977 }
 0x862   : > { %v1999_v50 = vmul.f32 %v1978_v34, %v4030_v26 }
 0x863   : > { %v1958_v24 = vadd.f32 %v1950_v20, %v1902_v53 }
 0x864   : > { %2018 = vrot.lane.b32.xlu2 %v1999_v50, %s2710_s7 }
 0x868   : > { %v1942_v15 = vpop.permute.xlu0 %1941  ;;  %v4053_v37 = vpop.permute.xlu1 %1933 }
 0x869   : > { %v1954_v0 = vmul.f32 %v1942_v15, %v4051_v23  ;;  %v1986_v6 = vpop.permute.xlu2 %1985 }
 0x86a   : > { %v2001_v53 = vmul.f32 %v1986_v6, %v4028_v47 }
 0x86b   : > { %v1962_v55 = vadd.f32 %v1954_v0, %v1906_v28 }
 0x870   : > { %v4056_v25 = vpop.permute.xlu1 %1945 }
 0x871   : > { %v1970_v60 = vpop.permute.xlu0 %1969 }
 0x872   : > { %v1997_v63 = vmul.f32 %v1970_v60, %v4058_v39 }
 0x874   : > { %2014 = vrot.lane.b32.xlu0 %v1997_v63, %s2710_s7 }
 0x879   : > { %v1990_v1 = vpop.permute.xlu0 %1989 }
 0x87a   : > { %v2002_v21 = vmul.f32 %v1990_v1, %v4051_v23  ;;  %v1974_v8 = vpop.permute.xlu1 %1973 }
 0x87b   : > { %v1998_v5 = vmul.f32 %v1974_v8, %v4046_v29 }
 0x87c   : > { %2024 = vrot.lane.b32.xlu2 %v2002_v21, %s2710_s7 }
 0x87d   : > { %2016 = vrot.lane.b32.xlu1 %v1998_v5, %s2710_s7 }
 0x882   : > { %v1982_v56 = vpop.permute.xlu1 %1981 }
 0x883   : > { %v2000_v2 = vmul.f32 %v1982_v56, %v4066_v10 }
 0x884   : > { %2049 = vperm.xlu2 %2635, %v3915_v59  }
 0x885   : > { %2020 = vrot.lane.b32.xlu0 %v2000_v2, %s2710_s7  ;;  %2022 = vrot.lane.b32.xlu1 %v2001_v53, %s2710_s7  ;;  %v4146_v2 = vld [vmem:[#allocation3 + $0x22] sm:$0xff] }
 0x88a   : > { %v1994_v36 = vpop.permute.xlu1 %1993 }
 0x88b   : > { %v2003_v40 = vmul.f32 %v1994_v36, %v4073_v18 }
 0x88c   : > { %2061 = vperm.xlu2 %2635, %v3925_v30  }
 0x88d   : > { %2026 = vrot.lane.b32.xlu0 %v2003_v40, %s2710_s7  ;;  %2045 = vperm.xlu1 %2634, %v3874_v58  }
 0x894   : > { %2069 = vperm.xlu2 %2635, %v3897_v38  }
 0x895   : > { %2053 = vperm.xlu0 %2636, %v3889_v14   ;;  %2057 = vperm.xlu1 %2634, %v3884_v41  }
 0x89c   : > { %2639 = vset.pattern.permute.xlu2 %v4444_v61 }
 0x89d   : > { %2073 = vperm.xlu0 %2636, %v3902_v45   ;;  %2065 = vperm.xlu1 %2634, %v3907_v42  }
 0x8a5   : > { %2637 = vset.pattern.permute.xlu0 %v4444_v61  ;;  %2638 = vset.pattern.permute.xlu1 %v4444_v61 }
 0x8b6   : > { %v2013_v19 = vpop.permute.xlu2 %2012 }
 0x8b7   : > { %v4088_v27 = vadd.f32 %v2013_v19, %v4026_v46 }
 0x8be   : > { %v2019_v12 = vpop.permute.xlu2 %2018 }
 0x8bf   : > { %v4090_v7 = vadd.f32 %v2019_v12, %v1959_v48 }
 0x8d6   : > { %v2025_v22 = vpop.permute.xlu2 %2024 }
 0x8d7   : > { %v4092_v11 = vadd.f32 %v2025_v22, %v1962_v55 }
 0x8de   : > { %v2050_v3 = vpop.permute.xlu2 %2049 }
 0x8df   : > { %v2077_v57 = vmul.f32 %v2050_v3, %v4058_v39 }
 0x8e1   : > { %2094 = vrot.lane.b32.xlu2 %v2077_v57, %s2717_s19 }
 0x8e6   : > { %v2062_v51 = vpop.permute.xlu2 %2061  ;;  %v4098_v32 = vpop.permute.xlu0 %2014 }
 0x8e7   : > { %v2080_v28 = vmul.f32 %v2062_v51, %v4066_v10 }
 0x8e9   : > { %2100 = vrot.lane.b32.xlu2 %v2080_v28, %s2717_s19 }
 0x8ef   : > { %v2017_v46 = vpop.permute.xlu1 %2016 }
 0x8f0   : > { %v2038_v4 = vadd.f32 %v2017_v46, %v1958_v24  ;;  %v2070_v24 = vpop.permute.xlu2 %2069 }
 0x8f7   : > { %v4100_v9 = vpop.permute.xlu0 %2020  ;;  %v2023_v48 = vpop.permute.xlu1 %2022 }
 0x8f8   : > { %v2041_v20 = vadd.f32 %v2023_v48, %v4037_v54  ;;  %v4157_v48 = vld [vmem:[#allocation3 + $0x2] sm:$0xff] }
 0x8ff   : > { %v4103_v34 = vpop.permute.xlu0 %2026  ;;  %v2046_v50 = vpop.permute.xlu1 %2045 }
 0x900   : > { %v2076_v15 = vmul.f32 %v2046_v50, %v4021_v16  ;;  %v2082_v16 = vmul.f32 %v2070_v24, %v4051_v23  ;;  %v2127_v24 = vld [vmem:[#allocation3 + $0x32] sm:$0xff] }
 0x902   : > { %2092 = vrot.lane.b32.xlu1 %v2076_v15, %s2717_s19 }
 0x907   : > { %v2054_v0 = vpop.permute.xlu0 %2053  ;;  %v2058_v55 = vpop.permute.xlu1 %2057 }
 0x908   : > { %v2078_v60 = vmul.f32 %v2054_v0, %v4046_v29  ;;  %v2079_v63 = vmul.f32 %v2058_v55, %v4030_v26  ;;  %v4446_v26 = vmov 8  }
 0x90a   : > { %2096 = vrot.lane.b32.xlu0 %v2078_v60, %s2717_s19  ;;  %2098 = vrot.lane.b32.xlu1 %v2079_v63, %s2717_s19  ;;  %v4164_v60 = vld [vmem:[#allocation3 + $0x52] sm:$0xff] }
 0x90f   : > { %v2074_v1 = vpop.permute.xlu0 %2073  ;;  %v2066_v54 = vpop.permute.xlu1 %2065 }
 0x910   : > { %v2083_v21 = vmul.f32 %v2074_v1, %v4073_v18  ;;  %v2081_v8 = vmul.f32 %v2066_v54, %v4028_v47  ;;  %v4445_v47 = vmov 7  }
 0x912   : > { %2102 = vrot.lane.b32.xlu0 %v2081_v8, %s2717_s19  ;;  %2106 = vrot.lane.b32.xlu2 %v2083_v21, %s2717_s19  ;;  %v4167_v8 = vld [vmem:[#allocation3 + $0x62] sm:$0xff] }
 0x913   : > { %2104 = vrot.lane.b32.xlu1 %v2082_v16, %s2717_s19 }
 0x91a   : > { %2133 = vperm.xlu0 %2637, %v3874_v58   ;;  %2141 = vperm.xlu2 %2639, %v3889_v14  }
 0x91b   : > { %2137 = vperm.xlu1 %2638, %v3915_v59  }
 0x922   : > { %2153 = vperm.xlu0 %2637, %v3907_v42   ;;  %2149 = vperm.xlu2 %2639, %v3925_v30  }
 0x923   : > { %2145 = vperm.xlu1 %2638, %v3884_v41  }
 0x92a   : > { %2640 = vset.pattern.permute.xlu0 %v4445_v47  ;;  %2161 = vperm.xlu2 %2639, %v3902_v45  }
 0x92b   : > { %2157 = vperm.xlu1 %2638, %v3897_v38   ;;  %2181 = vperm.xlu0 %2640, %v3874_v58  }
 0x932   : > { %2642 = vset.pattern.permute.xlu2 %v4445_v47 }
 0x933   : > { %2641 = vset.pattern.permute.xlu1 %v4445_v47  ;;  %2201 = vperm.xlu0 %2640, %v3907_v42  }
 0x934   : > { %2189 = vperm.xlu2 %2642, %v3889_v14   ;;  %2185 = vperm.xlu1 %2641, %v3915_v59  }
 0x93b   : > { %2644 = vset.pattern.permute.xlu0 %v4446_v26  ;;  %v4139_v29 = vpop.permute.xlu2 %2094 }
 0x93c   : > { %2197 = vperm.xlu2 %2642, %v3925_v30   ;;  %2193 = vperm.xlu1 %2641, %v3884_v41  }
 0x943   : > { %v4141_v23 = vpop.permute.xlu2 %2100 }
 0x944   : > { %2209 = vperm.xlu2 %2642, %v3902_v45   ;;  %2205 = vperm.xlu1 %2641, %v3897_v38  }
 0x94c   : > { %2643 = vset.pattern.permute.xlu2 %v4446_v26  ;;  %2645 = vset.pattern.permute.xlu1 %v4446_v26 }
 0x96c   : > { %v4143_v5 = vpop.permute.xlu2 %2106 }
 0x974   : > { %v2093_v6 = vpop.permute.xlu1 %2092  ;;  %v2142_v56 = vpop.permute.xlu2 %2141 }
 0x975   : > { %v2116_v53 = vadd.f32 %v2093_v6, %v4088_v27  ;;  %v2166_v61 = vmul.f32 %v2142_v56, %v4146_v2 }
 0x97c   : > { %v2097_v36 = vpop.permute.xlu0 %2096  ;;  %v2099_v40 = vpop.permute.xlu1 %2098 }
 0x97d   : > { %v2118_v19 = vadd.f32 %v2097_v36, %v2038_v4  ;;  %v2119_v12 = vadd.f32 %v2099_v40, %v4090_v7  ;;  %v4150_v22 = vpop.permute.xlu2 %2149  ;;  %v4172_v36 = vld [vmem:[#allocation3 + $0x12] sm:$0xff] }
 0x97f   : > { %v4152_v3 = vadd.f32 %v2166_v61, %v2118_v19 }
 0x984   : > { %v2103_v57 = vpop.permute.xlu0 %2102 }
 0x985   : > { %v2121_v51 = vadd.f32 %v2103_v57, %v2041_v20  ;;  %v2105_v28 = vpop.permute.xlu1 %2104  ;;  %v4154_v46 = vpop.permute.xlu2 %2161  ;;  %v4178_v57 = vld [vmem:[#allocation3 + $0x42] sm:$0xff] }
 0x986   : > { %v2122_v27 = vadd.f32 %v2105_v28, %v4092_v11 }
 0x98c   : > { %v2134_v50 = vpop.permute.xlu0 %2133 }
 0x98d   : > { %v2164_v15 = vmul.f32 %v2134_v50, %v4157_v48  ;;  %v4160_v0 = vpop.permute.xlu1 %2137 }
 0x98e   : > { %v2190_v4 = vpop.permute.xlu2 %2189 }
 0x98f   : > { %v2214_v7 = vmul.f32 %v2190_v4, %v4146_v2  ;;  %v2172_v55 = vadd.f32 %v2164_v15, %v2116_v53  ;;  %v4184_v15 = vld [vmem:[#allocation3 + $0x72] sm:$0xff] }
 0x991   : > { %2232 = vrot.lane.b32.xlu2 %v2214_v7, %s2710_s7 }
 0x994   : > { %v2154_v20 = vpop.permute.xlu0 %2153 }
 0x995   : > { %v2169_v63 = vmul.f32 %v2154_v20, %v4164_v60  ;;  %v2146_v11 = vpop.permute.xlu1 %2145 }
 0x996   : > { %v2167_v1 = vmul.f32 %v2146_v11, %v2127_v24 }
 0x997   : > { %v2177_v54 = vadd.f32 %v2169_v63, %v2121_v51 }
 0x998   : > { %v2175_v21 = vadd.f32 %v2167_v1, %v2119_v12  ;;  %v2198_v12 = vpop.permute.xlu2 %2197 }
 0x999   : > { %v2216_v28 = vmul.f32 %v2198_v12, %v4178_v57 }
 0x99d   : > { %v2158_v16 = vpop.permute.xlu1 %2157  ;;  %v2182_v47 = vpop.permute.xlu0 %2181 }
 0x99e   : > { %v2170_v26 = vmul.f32 %v2158_v16, %v4167_v8  ;;  %v2212_v6 = vmul.f32 %v2182_v47, %v4157_v48 }
 0x9a0   : > { %2228 = vrot.lane.b32.xlu0 %v2212_v6, %s2710_s7  ;;  %v2178_v56 = vadd.f32 %v2170_v26, %v2122_v27  ;;  %v2210_v27 = vpop.permute.xlu2 %2209 }
 0x9a1   : > { %v2219_v7 = vmul.f32 %v2210_v27, %v4184_v15 }
 0x9a5   : > { %v2202_v53 = vpop.permute.xlu0 %2201 }
 0x9a6   : > { %v2217_v40 = vmul.f32 %v2202_v53, %v4164_v60  ;;  %v2186_v61 = vpop.permute.xlu1 %2185 }
 0x9a7   : > { %v2213_v19 = vmul.f32 %v2186_v61, %v4172_v36 }
 0x9a8   : > { %2238 = vrot.lane.b32.xlu2 %v2217_v40, %s2710_s7 }
 0x9a9   : > { %2230 = vrot.lane.b32.xlu1 %v2213_v19, %s2710_s7 }
 0x9ae   : > { %v2194_v51 = vpop.permute.xlu1 %2193 }
 0x9af   : > { %v2215_v50 = vmul.f32 %v2194_v51, %v2127_v24 }
 0x9b0   : > { %2261 = vperm.xlu2 %2643, %v3874_v58   ;;  %v4447_v58 = vmov 0  }
 0x9b1   : > { %2234 = vrot.lane.b32.xlu0 %v2215_v50, %s2710_s7  ;;  %2236 = vrot.lane.b32.xlu1 %v2216_v28, %s2710_s7  ;;  %v2690_v50 = vld [vmem:[%s4318_s2 + $0x10] ss:$0 sm:$0xff] }
 0x9b6   : > { %v2206_v4 = vpop.permute.xlu1 %2205 }
 0x9b7   : > { %v2218_v20 = vmul.f32 %v2206_v4, %v4167_v8 }
 0x9b8   : > { %2273 = vperm.xlu2 %2643, %v3884_v41  }
 0x9b9   : > { %2240 = vrot.lane.b32.xlu0 %v2218_v20, %s2710_s7  ;;  %2242 = vrot.lane.b32.xlu1 %v2219_v7, %s2710_s7  ;;  %v1949_v7 = vmul.f32 %v4044_v52, %v4058_v39 }
 0x9c0   : > { %2281 = vperm.xlu2 %2643, %v3907_v42  }
 0x9c1   : > { %2265 = vperm.xlu0 %2644, %v3915_v59   ;;  %2269 = vperm.xlu1 %2645, %v3889_v14  }
 0x9c8   : > { %2648 = vset.pattern.permute.xlu2 %v4447_v58 }
 0x9c9   : > { %2285 = vperm.xlu0 %2644, %v3897_v38   ;;  %2277 = vperm.xlu1 %2645, %v3925_v30  }
 0x9d1   : > { %2646 = vset.pattern.permute.xlu0 %v4447_v58  ;;  %2289 = vperm.xlu1 %2645, %v3902_v45  }
 0x9d2   : > { %1713 = vperm.xlu0 %2646, %v3915_v59  }
 0x9d9   : > { %2647 = vset.pattern.permute.xlu1 %v4447_v58  ;;  %v2691_v58 = vld [vmem:[%s4318_s2 + $0x12] ss:$0 sm:$0xff] }
 0x9da   : > { %1725 = vperm.xlu0 %2646, %v3925_v30  }
 0x9e2   : > { %1737 = vperm.xlu0 %2646, %v3902_v45  }
 0x9eb   : > { %v2233_v41 = vpop.permute.xlu2 %2232 }
 0x9ec   : > { %v4204_v14 = vadd.f32 %v2233_v41, %v4152_v3  ;;  %v2692_v41 = vld [vmem:[%s4318_s2 + $0x14] ss:$0 sm:$0xff] }
 0xa02   : > { %v2239_v42 = vpop.permute.xlu2 %2238 }
 0xa03   : > { %v4206_v38 = vadd.f32 %v2239_v42, %v2177_v54  ;;  %v2693_v42 = vld [vmem:[%s4318_s2 + $0x13] ss:$0 sm:$0xff] }
 0xa0a   : > { %v2262_v63 = vpop.permute.xlu2 %2261 }
 0xa0b   : > { %v2292_v11 = vmul.f32 %v2262_v63, %v4157_v48 }
 0xa0d   : > { %2308 = vrot.lane.b32.xlu2 %v2292_v11, %s2717_s19 }
 0xa12   : > { %v2229_v1 = vpop.permute.xlu0 %2228  ;;  %v2274_v59 = vpop.permute.xlu2 %2273 }
 0xa13   : > { %v4210_v16 = vadd.f32 %v2229_v1, %v2172_v55  ;;  %v2295_v47 = vmul.f32 %v2274_v59, %v2127_v24  ;;  %v1952_v1 = vmul.f32 %v4053_v37, %v4066_v10  ;;  %v2168_v10 = vmul.f32 %v4150_v22, %v4178_v57 }
 0xa14   : > { %v2171_v22 = vmul.f32 %v4154_v46, %v4184_v15 }
 0xa15   : > { %2314 = vrot.lane.b32.xlu2 %v2295_v47, %s2717_s19 }
 0xa1a   : > { %v2282_v24 = vpop.permute.xlu2 %2281 }
 0xa1b   : > { %v2231_v45 = vpop.permute.xlu1 %2230 }
 0xa23   : > { %v2235_v30 = vpop.permute.xlu0 %2234  ;;  %v4213_v26 = vpop.permute.xlu1 %2236 }
 0xa24   : > { %v4215_v3 = vadd.f32 %v2235_v30, %v2175_v21 }
 0xa2b   : > { %v2241_v54 = vpop.permute.xlu0 %2240  ;;  %v4217_v6 = vpop.permute.xlu1 %2242 }
 0xa2c   : > { %v4219_v53 = vadd.f32 %v2241_v54, %v2178_v56  ;;  %v2297_v56 = vmul.f32 %v2282_v24, %v4164_v60 }
 0xa33   : > { %v2266_v48 = vpop.permute.xlu0 %2265  ;;  %v2270_v40 = vpop.permute.xlu1 %2269 }
 0xa34   : > { %v2293_v61 = vmul.f32 %v2266_v48, %v4172_v36  ;;  %v2294_v55 = vmul.f32 %v2270_v40, %v4146_v2  ;;  %v2689_v2 = vld [vmem:[%s4318_s2 + $0x11] ss:$0 sm:$0xff]  ;;  %v1955_v48 = vmul.f32 %v4056_v25, %v4073_v18 }
 0xa36   : > { %2310 = vrot.lane.b32.xlu0 %v2293_v61, %s2717_s19  ;;  %2312 = vrot.lane.b32.xlu1 %v2294_v55, %s2717_s19 }
 0xa3b   : > { %v2286_v19 = vpop.permute.xlu0 %2285  ;;  %v2278_v12 = vpop.permute.xlu1 %2277 }
 0xa3c   : > { %v2298_v21 = vmul.f32 %v2286_v19, %v4167_v8  ;;  %v2296_v51 = vmul.f32 %v2278_v12, %v4178_v57 }
 0xa3e   : > { %2316 = vrot.lane.b32.xlu0 %v2296_v51, %s2717_s19  ;;  %2320 = vrot.lane.b32.xlu2 %v2298_v21, %s2717_s19 }
 0xa3f   : > { %2318 = vrot.lane.b32.xlu1 %v2297_v56, %s2717_s19 }
 0xa43   : > { %v2290_v28 = vpop.permute.xlu1 %2289 }
 0xa44   : > { %v2299_v8 = vmul.f32 %v2290_v28, %v4184_v15  ;;  %v1714_v27 = vpop.permute.xlu0 %1713 }
 0xa45   : > { %v1741_v60 = vmul.f32 %v1714_v27, %v3946_v31 }
 0xa46   : > { %2322 = vrot.lane.b32.xlu0 %v2299_v8, %s2717_s19  ;;  %2370 = vperm.xlu2 %2648, %v2689_v2  }
 0xa47   : > { %v1821_v4 = vadd.f32 %v3975_v33, %v1741_v60  ;;  %2366 = vperm.xlu1 %2647, %v2690_v50  }
 0xa49   : > { %v1901_v20 = vadd.f32 %v4024_v43, %v1821_v4  ;;  %v2165_v43 = vmul.f32 %v4160_v0, %v4172_v36 }
 0xa4b   : > { %v1957_v31 = vadd.f32 %v1949_v7, %v1901_v20 }
 0xa4c   : > { %v1726_v33 = vpop.permute.xlu0 %1725 }
 0xa4d   : > { %v1744_v63 = vmul.f32 %v1726_v33, %v3951_v44  ;;  %v2037_v52 = vadd.f32 %v4098_v32, %v1957_v31  ;;  %v2694_v44 = vld [vmem:[%s4318_s2 + $0x17] ss:$0 sm:$0xff]  ;;  %v2695_v32 = vld [vmem:[%s4318_s2 + $0x16] ss:$0 sm:$0xff] }
 0xa4e   : > { %2374 = vperm.xlu0 %2646, %v2691_v58   ;;  %2382 = vperm.xlu2 %2648, %v2692_v41  }
 0xa4f   : > { %v1824_v39 = vadd.f32 %v3977_v35, %v1744_v63  ;;  %2378 = vperm.xlu1 %2647, %v2693_v42   ;;  %v2117_v11 = vadd.f32 %v4139_v29, %v2037_v52  ;;  %v2696_v35 = vld [vmem:[%s4318_s2 + $0x15] ss:$0 sm:$0xff] }
 0xa51   : > { %v1904_v59 = vadd.f32 %v4032_v13, %v1824_v39  ;;  %v2173_v47 = vadd.f32 %v2165_v43, %v2117_v11 }
 0xa53   : > { %v1960_v0 = vadd.f32 %v1952_v1, %v1904_v59  ;;  %v2253_v29 = vadd.f32 %v2231_v45, %v2173_v47 }
 0xa54   : > { %v1738_v36 = vpop.permute.xlu0 %1737 }
 0xa55   : > { %v1747_v37 = vmul.f32 %v1738_v36, %v3956_v49  ;;  %v2040_v13 = vadd.f32 %v4100_v9, %v1960_v0 }
 0xa56   : > { %2394 = vperm.xlu0 %2646, %v2694_v44   ;;  %2390 = vperm.xlu2 %2648, %v2695_v32  }
 0xa57   : > { %v1827_v30 = vadd.f32 %v3979_v62, %v1747_v37  ;;  %2386 = vperm.xlu1 %2647, %v2696_v35   ;;  %v2120_v54 = vadd.f32 %v4141_v23, %v2040_v13 }
 0xa59   : > { %v1907_v45 = vadd.f32 %v4039_v17, %v1827_v30  ;;  %v2176_v40 = vadd.f32 %v2168_v10, %v2120_v54 }
 0xa5b   : > { %v1963_v49 = vadd.f32 %v1955_v48, %v1907_v45  ;;  %v2256_v9 = vadd.f32 %v4213_v26, %v2176_v40 }
 0xa5d   : > { %v2043_v61 = vadd.f32 %v4103_v34, %v1963_v49 }
 0xa5f   : > { %v2123_v62 = vadd.f32 %v4143_v5, %v2043_v61 }
 0xa61   : > { %v2179_v57 = vadd.f32 %v2171_v22, %v2123_v62 }
 0xa63   : > { %v2259_v55 = vadd.f32 %v4217_v6, %v2179_v57 }
 0xa67   : > { %v2309_v23 = vpop.permute.xlu2 %2308 }
 0xa68   : > { %v2332_v2 = vadd.f32 %v2309_v23, %v4210_v16 }
 0xa6f   : > { %v2315_v24 = vpop.permute.xlu2 %2314 }
 0xa70   : > { %v2335_v27 = vadd.f32 %v2315_v24, %v4215_v3 }
 0xa98   : > { %v2321_v19 = vpop.permute.xlu2 %2320 }
 0xa99   : > { %v2338_v5 = vadd.f32 %v2321_v19, %v4219_v53 }
 0xaa0   : > { %v2371_v25 = vpop.permute.xlu2 %2370 }
 0xaa8   : > { %v2311_v17 = vpop.permute.xlu0 %2310  ;;  %v2313_v18 = vpop.permute.xlu1 %2312 }
 0xaa9   : > { %v2333_v12 = vadd.f32 %v2311_v17, %v2253_v29  ;;  %v2383_v21 = vpop.permute.xlu2 %2382  ;;  %v2334_v53 = vadd.f32 %v2313_v18, %v4204_v14 }
 0xaab   : > { %v2398_v34 = vadd.f32 %v2371_v25, %v2333_v12 }
 0xaad   : > { %2407 = vst.msk [vmem:[%s4290_s23 + $0x8] sm:$0xff] %vm2405_vm3, %v2398_v34 }
 0xab0   : > { %v2317_v46 = vpop.permute.xlu0 %2316 }
 0xab1   : > { %v2336_v15 = vadd.f32 %v2317_v46, %v2256_v9  ;;  %v2319_v26 = vpop.permute.xlu1 %2318  ;;  %v2391_v6 = vpop.permute.xlu2 %2390 }
 0xab2   : > { %v2403_v51 = vadd.f32 %v2391_v6, %v2338_v5  ;;  %v2337_v58 = vadd.f32 %v2319_v26, %v4206_v38 }
 0xab3   : > { %v2401_v56 = vadd.f32 %v2383_v21, %v2336_v15 }
 0xab4   : > { %2412 = vst.msk [vmem:[%s4290_s23 + $0x30] sm:$0xff] %vm2405_vm3, %v2403_v51 }
 0xab5   : > { %2410 = vst.msk [vmem:[%s4290_s23 + $0x20] sm:$0xff] %vm2405_vm3, %v2401_v56 }
 0xab8   : > { %v2323_v28 = vpop.permute.xlu0 %2322 }
 0xab9   : > { %v2367_v50 = vpop.permute.xlu1 %2366  ;;  %v2339_v16 = vadd.f32 %v2323_v28, %v2259_v55 }
 0xaba   : > { %v2397_v8 = vadd.f32 %v2367_v50, %v2332_v2 }
 0xabc   : > { %2406 = vst.msk [vmem:[%s4290_s23] sm:$0xff] %vm2405_vm3, %v2397_v8 }
 0xac0   : > { %v2375_v60 = vpop.permute.xlu0 %2374 }
 0xac1   : > { %v2399_v4 = vadd.f32 %v2375_v60, %v2334_v53  ;;  %v2379_v7 = vpop.permute.xlu1 %2378 }
 0xac2   : > { %v2400_v20 = vadd.f32 %v2379_v7, %v2335_v27 }
 0xac3   : > { %2408 = vst.msk [vmem:[%s4290_s23 + $0x10] sm:$0xff] %vm2405_vm3, %v2399_v4 }
 0xac4   : > { %2409 = vst.msk [vmem:[%s4290_s23 + $0x18] sm:$0xff] %vm2405_vm3, %v2400_v20 }
 0xac8   : > { %v2395_v41 = vpop.permute.xlu0 %2394 }
 0xac9   : > { %v2404_v31 = vadd.f32 %v2395_v41, %v2339_v16  ;;  %v2387_v42 = vpop.permute.xlu1 %2386 }
 0xaca   : > { %v2402_v33 = vadd.f32 %v2387_v42, %v2337_v58 }
 0xacb   : > { %2413 = vst.msk [vmem:[%s4290_s23 + $0x38] sm:$0xff] %vm2405_vm3, %v2404_v31 }
 0xacc   : > { %2411 = vst.msk [vmem:[%s4290_s23 + $0x28] sm:$0xff] %vm2405_vm3, %v2402_v33 }
 0xacd PF: > { %s13_s12 = sadd.s32 1, %s2703_s12  }
 0xace   : > { %p10_p4 = scmp.ge.s32.totalorder %s13_s12, 4  }
 0xad0   :  { %12 = sbr.rel (!%p10_p4) target bundleno = 1 (0x1), region = 69 }

// kernel: hierarchical_spatial_graph.7
= control target key start
LH: loop header
LB: loop body
LE: loop exit
PB: predicated region body
PF: predicated region fallthrough
CT: control target
= control target key end

     0   :  { %s378_s12 = smov 0   ;;  %s450_s0 = inlined_call_operand.vmem [shape: f32[2,4,64], index: 0, kind: input, shape index: {}]   ;;  %s451_s1 = inlined_call_operand.vmem [shape: f32[64,256], index: 1, kind: input, shape index: {}]   ;;  %s452_s2 = inlined_call_operand.vmem [shape: f32[2,4,256], index: 2, kind: input, shape index: {}, may-alias: {2,3}]   ;;  %s453_s3 = inlined_call_operand.vmem [shape: f32[2,4,256], index: 3, kind: output, shape index: {}, may-alias: {2,3}]  }
   0x1 LB: > { %s326_s13 = sadd.s32 4294967295, %s356_s12   ;;  %p330_p0 = scmp.ge.s32.totalorder %s356_s12, 1  ;;  %s356_s12 = sphi %s378_s12, %s13_s12  }
   0x2   : > { %p146_p1 = scmp.lt.s32.totalorder %s356_s12, 3 }
   0x4   : > { %p147_p2 = pnand %p330_p0, %p146_p1 }
   0x5   : > { %p174_p3 = scmp.lt.s32.totalorder (!%p147_p2), %s326_s13, 1 }
   0x6   : > { %150 = sbr.rel (%p147_p2) target bundleno = 161 (0xa1), region = 32 }
   0xb   : > { %v204_v0 = vld [vmem:[%s451_s1 + $0x78] sm:$0xff]  ;;  %v203_v1 = vld [vmem:[%s451_s1 + $0x70] sm:$0xff]  ;;  %v202_v2 = vld [vmem:[%s451_s1 + $0x68] sm:$0xff]  ;;  %s455_s13 = smov (!%p174_p3, %s326_s13), 1  ;;  %vm205_vm0 = vcmask 523264   ;;  %vm253_vm1 = vcmask 1043456  }
   0xc   : > { %237 = vmatpush.msra.mxu1 %v204_v0  ;;  %217 = vmatpush.msra.mxu0 %v203_v1  ;;  %v201_v3 = vld [vmem:[%s451_s1 + $0x60] sm:$0xff]  ;;  %v200_v4 = vld [vmem:[%s451_s1 + $0x58] sm:$0xff]  ;;  %v199_v5 = vld [vmem:[%s451_s1 + $0x50] sm:$0xff]  ;;  %s331_s7 = sshll.u32 %s455_s13, 2  ;;  %s340_s25 = sshll.u32 %s455_s13, 3 }
   0xd   : > { %v198_v6 = vld [vmem:[%s451_s1 + $0x48] sm:$0xff]  ;;  %v197_v7 = vld [vmem:[%s451_s1 + $0x40] sm:$0xff]  ;;  %v196_v8 = vld [vmem:[%s451_s1 + $0x38] sm:$0xff]  ;;  %s177_s20 = scalar_lea.vmem %s450_s0, %s331_s7  ;;  %s182_s28 = scalar_lea.vmem %s452_s2, %s340_s25 }
   0xe   : > { %238 = vmatpush.msra.mxu1 %v202_v2  ;;  %218 = vmatpush.msra.mxu0 %v201_v3  ;;  %v195_v9 = vld [vmem:[%s451_s1 + $0x30] sm:$0xff]  ;;  %v194_v10 = vld [vmem:[%s451_s1 + $0x28] sm:$0xff]  ;;  %v193_v11 = vld [vmem:[%s451_s1 + $0x20] sm:$0xff]  ;;  %s187_s4 = scalar_lea.vmem %s453_s3, %s340_s25 }
   0xf   : > { %v192_v12 = vld [vmem:[%s451_s1 + $0x18] sm:$0xff]  ;;  %v191_v13 = vld [vmem:[%s451_s1 + $0x10] sm:$0xff]  ;;  %v190_v14 = vld [vmem:[%s451_s1 + $0x8] sm:$0xff] }
  0x10   : > { %239 = vmatpush.msra.mxu1 %v200_v4  ;;  %219 = vmatpush.msra.mxu0 %v199_v5  ;;  %v189_v15 = vld [vmem:[%s451_s1] sm:$0xff] }
  0x11   : > { %v188_v16 = vld [vmem:[%s177_s20] sm:$0xf] }
  0x12   : > { %240 = vmatpush.msra.mxu1 %v198_v6  ;;  %220 = vmatpush.msra.mxu0 %v197_v7  ;;  %v249_v20 = vld [vmem:[%s182_s28] sm:$0xff] }
  0x14   : > { %241 = vmatpush.msra.mxu1 %v196_v8  ;;  %221 = vmatpush.msra.mxu0 %v195_v9 }
  0x16   : > { %242 = vmatpush.msra.mxu1 %v194_v10  ;;  %222 = vmatpush.msra.mxu0 %v193_v11 }
  0x18   : > { %243 = vmatpush.msra.mxu1 %v192_v12  ;;  %223 = vmatpush.msra.mxu0 %v191_v13 }
  0x1a   : > { %244 = vmatpush.msra.mxu1 %v190_v14  ;;  %224 = vmatpush.msra.mxu0 %v189_v15 }
  0x1b   : > { %337 = vmatmul.msk.f32.vlgmr.msra.gmra.mxu1 %vm205_vm0, %v188_v16  ;;  %336 = vmatmul.msk.f32.vlgmr.msra.gmra.mxu0 %vm205_vm0, %v188_v16 }
  0x98   : > { %v246_v17 = vpop.f32.mrf.mxu1  ;;  %v226_v18 = vpop.f32.mrf.mxu0 }
  0x99   : > { %v252_v19 = vrot.slane %v246_v17, 4 }
  0x9b   : > { %v254_v21 = vsel %vm253_vm1, %v226_v18, %v252_v19 }
  0x9c   : > { %v256_v22 = vmul.f32 %v254_v21, %v249_v20 }
  0x9e   : > { %v257_v23 = vadd.f32 %v256_v22, %v249_v20 }
  0xa0   : > { %258 = vst [vmem:[%s187_s4] sm:$0xff] %v257_v23 }
  0xa1 PF: > { %s13_s12 = sadd.s32 1, %s356_s12  }
  0xa2   : > { %p10_p4 = scmp.ge.s32.totalorder %s13_s12, 4  }
  0xa4   :  { %12 = sbr.rel (!%p10_p4) target bundleno = 1 (0x1), region = 65 }

// kernel: hierarchical_spatial_graph.6
= control target key start
LH: loop header
LB: loop body
LE: loop exit
PB: predicated region body
PF: predicated region fallthrough
CT: control target
= control target key end

     0   :  { %s589_s21 = smov 0   ;;  %s639_s0 = inlined_call_operand.vmem [shape: f32[2,8,64], index: 0, kind: input, shape index: {}]   ;;  %s640_s1 = inlined_call_operand.vmem [shape: f32[2,4,64], index: 1, kind: input, shape index: {}]   ;;  %s641_s2 = inlined_call_operand.vmem [shape: f32[12,8], index: 2, kind: input, shape index: {}]   ;;  %s642_s3 = inlined_call_operand.vmem [shape: f32[12,1], index: 3, kind: input, shape index: {}]   ;;  %s643_s4 = inlined_call_operand.vmem [shape: f32[4,4], index: 4, kind: input, shape index: {}]   ;;  %s644_s5 = inlined_call_operand.vmem [shape: f32[4,1], index: 5, kind: input, shape index: {}]   ;;  %s645_s6 = inlined_call_operand.vmem [shape: f32[2,4,64], index: 6, kind: output, shape index: {}]  }
   0x1 LB: > { %s511_s22 = sadd.s32 4294967295, %s551_s21   ;;  %p515_p0 = scmp.ge.s32.totalorder %s551_s21, 1  ;;  %s551_s21 = sphi %s589_s21, %s16_s21  }
   0x2   : > { %p220_p1 = scmp.lt.s32.totalorder %s551_s21, 3 }
   0x4   : > { %p221_p2 = pnand %p515_p0, %p220_p1 }
   0x5   : > { %p252_p3 = scmp.lt.s32.totalorder (!%p221_p2), %s511_s22, 1 }
   0x6   : > { %224 = sbr.rel (%p221_p2) target bundleno = 964 (0x3c4), region = 44 }
   0xb   : > { %v268_v0 = vld [vmem:[%s642_s3] sm:$0xff]  ;;  %v553_v1 = vmov 0   ;;  %s647_s22 = smov (!%p252_p3, %s511_s22), 1  ;;  %vm280_vm0 = vcmask 64512   ;;  %vm312_vm1 = vcmask 523264   ;;  %vm337_vm2 = vcmask 27648  }
   0xc   : > { %539 = vset.pattern.permute.xlu0 %v553_v1  ;;  %540 = vset.pattern.permute.xlu2 %v553_v1  ;;  %s516_s25 = sshll.u32 %s647_s22, 3  ;;  %v266_v2 = vld [vmem:[%s641_s2] sm:$0xff]  ;;  %s517_s7 = sshll.u32 %s647_s22, 2  ;;  %vm385_vm3 = vcmask 1043456   ;;  %v267_v19 = vld [vmem:[%s641_s2 + $0x8] sm:$0xf] }
   0xd   : > { %272 = vperm.xlu0 %539, %v268_v0   ;;  %s255_s28 = scalar_lea.vmem %s639_s0, %s516_s25  ;;  %s259_s10 = scalar_lea.vmem %s640_s1, %s517_s7  ;;  %vm381_vm4 = vcmask 31744   ;;  %v269_v21 = vld [vmem:[%s642_s3 + $0x8] sm:$0xf]  ;;  %v410_v22 = vld [vmem:[%s644_s5] sm:$0xf]  ;;  %vm444_vm5 = vcmask 519168  }
   0xe   : > { %v264_v3 = vld [vmem:[%s255_s28] sm:$0xff]  ;;  %277 = vperm.xlu2 %540, %v269_v21   ;;  %s263_s23 = scalar_lea.vmem %s645_s6, %s517_s7 }
   0xf   : > { %302 = vmatpush.msra.mxu0 %v264_v3  ;;  %v265_v15 = vld [vmem:[%s259_s10] sm:$0xf] }
  0x10   : > { %519 = vmatmul.msk.f32.vlgmr.msra.gmra.mxu0 %vm280_vm0, %v266_v2  ;;  %523 = vmatpush.msk.msra.mxu2 %vm385_vm3, %v265_v15  ;;  %v409_v23 = vld [vmem:[%s643_s4] sm:$0xf] }
  0x16   : > { %413 = vperm.xlu2 %540, %v410_v22  }
  0x18   : > { %520 = vmatmul.msk.f32.gmra.mxu0 %vm280_vm0, %v267_v19 }
  0x68   : > { %v278_v25 = vpop.permute.xlu2 %277 }
  0x70   : > { %v414_v27 = vpop.permute.xlu2 %413 }
  0x7f   : > { %v273_v4 = vpop.permute.xlu0 %272 }
  0x8d   : > { %v304_v5 = vpop.f32.mrf.mxu0 }
  0x8e   : > { %v305_v6 = vadd.f32 %v304_v5, %v273_v4 }
  0x90   : > { %v311_v7 = vrot.slane %v305_v6, 4  ;;  %521 = vmatpush.xpose.msk.msra.mxu1 %vm312_vm1, %v305_v6 }
  0x93   : > { %522 = vmatmul.msk.f32.vlgmr.msra.gmra.mxu1 %vm312_vm1, %v311_v7 }
  0x95   : > { %v307_v26 = vpop.f32.mrf.mxu0 }
  0x96   : > { %v308_v29 = vadd.f32 %v307_v26, %v278_v25 }
 0x110   : > { %v334_v8 = vpop.f32.mrf.mxu1 }
 0x111   : > { %v338_v9 = vsel %vm337_vm2, %v334_v8, -inf }
 0x112   : > { %339 = vmax.xlane.f32.xlu0 %v338_v9 }
 0x185   : > { %v340_v10 = vpop.xlane.xlu0 %339 }
 0x186   : > { %v341_v11 = vsub.f32 %v334_v8, %v340_v10 }
 0x188   : > { %v342_v12 = vmul.f32 1.442695, %v341_v11 }
 0x18a   : > { %541 = vpow2.f32 %v342_v12 }
 0x190   : > { %v542_v13 = vpop.eup %541 }
 0x191   : > { %v344_v14 = vsel %vm337_vm2, %v542_v13, 0.0 }
 0x192   : > { %345 = vadd.xlane.f32.xlu1 %v344_v14 }
 0x205   : > { %v346_v16 = vpop.xlane.xlu1 %345 }
 0x206   : > { %543 = vrcp.f32 %v346_v16 }
 0x20c   : > { %v544_v17 = vpop.eup %543 }
 0x20d   : > { %v348_v18 = vmul.f32 %v544_v17, %v542_v13 }
 0x20f   : > { %349 = vxpose.xlu1.b32.start.end [1/1] (short) (narrow) %v348_v18, 8 }
 0x2b3   : > { %v365_v20 = vpop.trf.xlu1 }
 0x2b4   : > { %524 = vmatmul.msk.f32.vlgmr.msra.gmra.mxu2 %vm381_vm4, %v365_v20 }
 0x337   : > { %v406_v24 = vpop.f32.mrf.mxu2 }
 0x338   : > { %525 = vmatpush.msk.msra.mxu3 %vm385_vm3, %v406_v24 }
 0x339   : > { %526 = vmatmul.msk.f32.vlgmr.msra.gmra.mxu3 %vm381_vm4, %v409_v23 }
 0x3bc   : > { %v439_v28 = vpop.f32.mrf.mxu3 }
 0x3bd   : > { %v440_v30 = vadd.f32 %v439_v28, %v414_v27 }
 0x3bf   : > { %v442_v31 = vadd.f32 %v440_v30, %v308_v29 }
 0x3c1   : > { %v443_v32 = vmax.f32 %v442_v31, 0.0 }
 0x3c3   : > { %445 = vst.msk [vmem:[%s263_s23] sm:$0xf] %vm444_vm5, %v443_v32 }
 0x3c4 PF: > { %s16_s21 = sadd.s32 1, %s551_s21  }
 0x3c5   : > { %p13_p4 = scmp.ge.s32.totalorder %s16_s21, 4  }
 0x3c7   :  { %15 = sbr.rel (!%p13_p4) target bundleno = 1 (0x1), region = 77 }

// kernel: hierarchical_spatial_graph.5
= control target key start
LH: loop header
LB: loop body
LE: loop exit
PB: predicated region body
PF: predicated region fallthrough
CT: control target
= control target key end

     0   :  { %s1559_s12 = smov 0   ;;  %s2334_s0 = inlined_call_operand.vmem [shape: f32[2,4,4,9,9], index: 0, kind: input, shape index: {}]   ;;  %s2335_s1 = inlined_call_operand.vmem [shape: f32[3,4,1,9], index: 1, kind: input, shape index: {}]   ;;  %s2336_s2 = inlined_call_operand.vmem [shape: f32[3,4,1,1], index: 2, kind: input, shape index: {}]   ;;  %s2337_s3 = inlined_call_operand.vmem [shape: f32[2,4,8,8], index: 3, kind: output, shape index: {}]  }
   0x1 LB: > { %s1353_s13 = sadd.s32 4294967295, %s1524_s12   ;;  %p1357_p0 = scmp.ge.s32.totalorder %s1524_s12, 1  ;;  %s1524_s12 = sphi %s1559_s12, %s13_s12  }
   0x2   : > { %p137_p1 = scmp.lt.s32.totalorder %s1524_s12, 3 }
   0x4   : > { %p138_p2 = pnand %p1357_p0, %p137_p1 }
   0x5   : > { %p161_p3 = scmp.lt.s32.totalorder (!%p138_p2), %s1353_s13, 1  ;;  %s1535_s26 = smov (!%p138_p2), 127  }
   0x6   : > { %141 = sbr.rel (%p138_p2) target bundleno = 1087 (0x43f), region = 32  ;;  %s1536_s18 = smov (!%p138_p2), 1  }
   0x7   : > { %s1538_s5 = smov (!%p138_p2), 126  }
   0xb   : > { %v1570_v0 = vld [vmem:[%s2335_s1 + $0x2] ss:$0 sm:$0xff]  ;;  %v1526_v1 = vmov 1   ;;  %v1577_v2 = vld [vmem:[%s2335_s1] ss:$0 sm:$0xff]  ;;  %v1527_v3 = vmov 0  }
   0xc   : > { %1421 = vset.pattern.permute.xlu0 %v1526_v1  ;;  %1420 = vset.pattern.permute.xlu2 %v1526_v1  ;;  %v1586_v4 = vld [vmem:[%s2335_s1 + $0x3] ss:$0 sm:$0xff]  ;;  %v1591_v5 = vld [vmem:[%s2335_s1 + $0x1] ss:$0 sm:$0xff]  ;;  %v1528_v6 = vmov 2   ;;  %v1529_v7 = vmov 3  }
   0xd   : > { %1419 = vset.pattern.permute.xlu1 %v1527_v3  ;;  %221 = vperm.xlu0 %1421, %v1570_v0   ;;  %v1530_v8 = vmov 5   ;;  %v1531_v9 = vmov 6   ;;  %v1532_v10 = vmov 4   ;;  %v1533_v11 = vmov 7   ;;  %s2339_s13 = smov (!%p161_p3, %s1353_s13), 1 }
   0xe   : > { %196 = vperm.xlu1 %1419, %v1570_v0   ;;  %213 = vperm.xlu2 %1420, %v1577_v2   ;;  %v1534_v13 = vmov 8   ;;  %s1396_s22 = sshll.u32 %s2339_s13, 8  ;;  %v1498_v62 = vld [vmem:[%s2336_s2] ss:$0 sm:$0xff]  ;;  %vm470_vm0 = vcmask 80896   ;;  %vm472_vm1 = vcmask 74752  }
   0xf   : > { %s1654_s25 = scalar_lea.vmem %s2334_s0, %s1396_s22  ;;  %vm528_vm2 = vcmask 72712   ;;  %vm1293_vm3 = vcmask 64512  }
  0x10   : > { %v1659_v15 = vld [vmem:[%s1654_s25] sm:$0xff]  ;;  %v172_v35 = vld [vmem:[%s1654_s25 + $0x10] sm:$0xff] }
  0x11   : > { %v1364_v18 = vld [vmem:[%s1654_s25 + $0x60] sm:$0xff]  ;;  %v1682_v39 = vld [vmem:[%s1654_s25 + $0x30] sm:$0xff] }
  0x12   : > { %v173_v19 = vld [vmem:[%s1654_s25 + $0x20] sm:$0xff]  ;;  %v1367_v42 = vld [vmem:[%s1654_s25 + $0x90] sm:$0xff] }
  0x13   : > { %v1366_v30 = vld [vmem:[%s1654_s25 + $0x80] sm:$0xff]  ;;  %v1369_v55 = vld [vmem:[%s1654_s25 + $0xb0] sm:$0xff] }
  0x14   : > { %v1368_v52 = vld [vmem:[%s1654_s25 + $0xa0] sm:$0xff]  ;;  %v1702_v58 = vld [vmem:[%s1654_s25 + $0x11] sm:$0xff] }
  0x15   : > { %1425 = vset.pattern.permute.xlu0 %v1528_v6 }
  0x16   : > { %200 = vperm.xlu1 %1419, %v1586_v4   ;;  %217 = vperm.xlu2 %1420, %v1591_v5  }
  0x17   : > { %249 = vperm.xlu0 %1425, %v1586_v4  }
  0x1e   : > { %1422 = vset.pattern.permute.xlu1 %v1526_v1  ;;  %1423 = vset.pattern.permute.xlu2 %v1528_v6 }
  0x1f   : > { %1426 = vset.pattern.permute.xlu0 %v1529_v7  ;;  %225 = vperm.xlu1 %1422, %v1586_v4  }
  0x20   : > { %237 = vperm.xlu2 %1423, %v1577_v2   ;;  %282 = vperm.xlu0 %1426, %v1577_v2  }
  0x27   : > { %1424 = vset.pattern.permute.xlu1 %v1528_v6 }
  0x28   : > { %245 = vperm.xlu2 %1423, %v1570_v0   ;;  %241 = vperm.xlu1 %1424, %v1591_v5  }
  0x29   : > { %1433 = vset.pattern.permute.xlu0 %v1530_v8 }
  0x2a   : > { %343 = vperm.xlu0 %1433, %v1570_v0  }
  0x30   : > { %1428 = vset.pattern.permute.xlu2 %v1529_v7  ;;  %1427 = vset.pattern.permute.xlu1 %v1529_v7 }
  0x31   : > { %290 = vperm.xlu2 %1428, %v1570_v0   ;;  %286 = vperm.xlu1 %1427, %v1591_v5  }
  0x32   : > { %1436 = vset.pattern.permute.xlu0 %v1531_v9 }
  0x33   : > { %387 = vperm.xlu0 %1436, %v1570_v0  }
  0x39   : > { %1429 = vset.pattern.permute.xlu2 %v1532_v10  ;;  %294 = vperm.xlu1 %1427, %v1586_v4  }
  0x3a   : > { %311 = vperm.xlu2 %1429, %v1577_v2  }
  0x3b   : > { %1437 = vset.pattern.permute.xlu0 %v1527_v3 }
  0x3c   : > { %188 = vperm.xlu0 %1437, %v1577_v2  }
  0x41   : > { %1430 = vset.pattern.permute.xlu1 %v1532_v10 }
  0x42   : > { %323 = vperm.xlu2 %1429, %v1586_v4   ;;  %319 = vperm.xlu1 %1430, %v1570_v0  }
  0x44   : > { %192 = vperm.xlu0 %1437, %v1591_v5  }
  0x4a   : > { %1432 = vset.pattern.permute.xlu2 %v1530_v8  ;;  %1431 = vset.pattern.permute.xlu1 %v1530_v8 }
  0x4b   : > { %339 = vperm.xlu2 %1432, %v1591_v5   ;;  %335 = vperm.xlu1 %1431, %v1577_v2  }
  0x53   : > { %347 = vperm.xlu1 %1431, %v1586_v4   ;;  %1435 = vset.pattern.permute.xlu2 %v1531_v9 }
  0x54   : > { %383 = vperm.xlu2 %1435, %v1591_v5  }
  0x5b   : > { %1434 = vset.pattern.permute.xlu1 %v1531_v9 }
  0x5c   : > { %379 = vperm.xlu1 %1434, %v1577_v2   ;;  %1438 = vset.pattern.permute.xlu2 %v1533_v11 }
  0x5d   : > { %407 = vperm.xlu2 %1438, %v1577_v2  }
  0x64   : > { %391 = vperm.xlu1 %1434, %v1586_v4  }
  0x65   : > { %415 = vperm.xlu2 %1438, %v1570_v0  }
  0x68   : > { %v1636_v12 = vpop.permute.xlu2 %213 }
  0x6c   : > { %1439 = vset.pattern.permute.xlu1 %v1533_v11 }
  0x6d   : > { %411 = vperm.xlu1 %1439, %v1591_v5   ;;  %1441 = vset.pattern.permute.xlu2 %v1534_v13 }
  0x6e   : > { %435 = vperm.xlu2 %1441, %v1591_v5  }
  0x70   : > { %v1648_v14 = vpop.permute.xlu2 %217 }
  0x75   : > { %1440 = vset.pattern.permute.xlu1 %v1534_v13 }
  0x76   : > { %431 = vperm.xlu1 %1440, %v1577_v2  }
  0x7a   : > { %v238_v16 = vpop.permute.xlu2 %237 }
  0x7b   : > { %v252_v17 = vmul.f32 %v238_v16, %v1659_v15 }
  0x7e   : > { %260 = vrot.lane.b32.xlu1 %v252_v17, %s1535_s26  ;;  %v374_v17 = vld [vmem:[%s1654_s25 + $0x1] sm:$0xff] }
  0x7f   : > { %v222_v20 = vpop.permute.xlu0 %221 }
  0x80   : > { %v230_v21 = vmul.f32 %v1364_v18, %v222_v20  ;;  %v197_v22 = vpop.permute.xlu1 %196  ;;  %v1362_v20 = vld [vmem:[%s1654_s25 + $0x40] sm:$0xff] }
  0x81   : > { %v205_v23 = vmul.f32 %v197_v22, %v173_v19  ;;  %v228_v22 = vmul.f32 %v1362_v20, %v1636_v12 }
  0x82   : > { %v246_v24 = vpop.permute.xlu2 %245 }
  0x83   : > { %v254_v25 = vmul.f32 %v246_v24, %v173_v19  ;;  %v1665_v26 = vadd.f32 %v230_v21, %v205_v23 }
  0x86   : > { %264 = vrot.lane.b32.xlu1 %v254_v25, %s1535_s26 }
  0x88   : > { %v1668_v27 = vpop.permute.xlu1 %200 }
  0x89   : > { %v250_v28 = vpop.permute.xlu0 %249 }
  0x8a   : > { %v255_v40 = vmul.f32 %v250_v28, %v1682_v39  ;;  %v1363_v28 = vld [vmem:[%s1654_s25 + $0x50] sm:$0xff] }
  0x8b   : > { %v1670_v29 = vpop.permute.xlu2 %290 }
  0x91   : > { %v1673_v31 = vpop.permute.xlu1 %225 }
  0x92   : > { %v283_v32 = vpop.permute.xlu0 %282 }
  0x93   : > { %v297_v33 = vmul.f32 %v1366_v30, %v283_v32 }
  0x94   : > { %v1675_v34 = vpop.permute.xlu2 %311 }
  0x9a   : > { %v242_v36 = vpop.permute.xlu1 %241 }
  0x9b   : > { %v253_v37 = vmul.f32 %v242_v36, %v172_v35 }
  0x9c   : > { %v1678_v38 = vpop.permute.xlu2 %323  ;;  %v344_v53 = vpop.permute.xlu0 %343 }
  0x9d   : > { %262 = vrot.lane.b32.xlu2 %v253_v37, %s1535_s26  ;;  %v352_v54 = vmul.f32 %v1368_v52, %v344_v53  ;;  %v229_v37 = vmul.f32 %v1363_v28, %v1648_v14  ;;  %v299_v53 = vmul.f32 %v1368_v52, %v1670_v29  ;;  %v206_v14 = vmul.f32 %v1668_v27, %v1682_v39  ;;  %v1500_v29 = vld [vmem:[%s2336_s2 + $0x3] ss:$0 sm:$0xff]  ;;  %v1373_v28 = vld [vmem:[%s1654_s25 + $0xf0] sm:$0xff] }
  0xa3   : > { %v287_v41 = vpop.permute.xlu1 %286 }
  0xa5   : > { %v340_v43 = vpop.permute.xlu2 %339  ;;  %266 = vrot.lane.b32.xlu2 %v255_v40, %s1535_s26 }
  0xa6   : > { %v351_v44 = vmul.f32 %v1367_v42, %v340_v43  ;;  %v1365_v43 = vld [vmem:[%s1654_s25 + $0x70] sm:$0xff] }
  0xa8   : > { %360 = vrot.lane.b32.xlu1 %v351_v44, %s1535_s26 }
  0xab   : > { %v295_v45 = vpop.permute.xlu1 %294 }
  0xae   : > { %v1688_v46 = vpop.permute.xlu2 %383 }
  0xb0   : > { %439 = vperm.xlu1 %1440, %v1570_v0   ;;  %v1715_v0 = vpop.permute.xlu0 %387 }
  0xb4   : > { %v1691_v47 = vpop.permute.xlu1 %319 }
  0xb7   : > { %v1693_v48 = vpop.permute.xlu2 %407 }
  0xb8   : > { %1442 = vset.pattern.permute.xlu1 %v1527_v3  ;;  %v189_v16 = vpop.permute.xlu0 %188 }
  0xb9   : > { %v203_v21 = vmul.f32 %v189_v16, %v1659_v15 }
  0xbb   : > { %v232_v23 = vadd.f32 %v228_v22, %v203_v21  ;;  %v1775_v21 = vld [vmem:[%s1654_s25 + $0x31] sm:$0xff] }
  0xbd   : > { %v336_v49 = vpop.permute.xlu1 %335 }
  0xbe   : > { %v350_v50 = vmul.f32 %v1366_v30, %v336_v49  ;;  %v298_v49 = vmul.f32 %v1367_v42, %v287_v41 }
  0xbf   : > { %v1696_v51 = vpop.permute.xlu2 %415 }
  0xc0   : > { %358 = vrot.lane.b32.xlu2 %v350_v50, %s1535_s26  ;;  %v193_v24 = vpop.permute.xlu0 %192 }
  0xc1   : > { %v204_v32 = vmul.f32 %v193_v24, %v172_v35  ;;  %v1784_v24 = vld [vmem:[%s2335_s1 + $0x5] ss:$0 sm:$0xff] }
  0xc3   : > { %v233_v40 = vadd.f32 %v229_v37, %v204_v32 }
  0xc5   : > { %v348_v56 = vpop.permute.xlu1 %347 }
  0xc6   : > { %v353_v57 = vmul.f32 %v1369_v55, %v348_v56 }
  0xc8   : > { %364 = vrot.lane.b32.xlu0 %v353_v57, %s1535_s26  ;;  %362 = vrot.lane.b32.xlu2 %v352_v54, %s1535_s26  ;;  %v436_v59 = vpop.permute.xlu2 %435  ;;  %v231_v54 = vmul.f32 %v1365_v43, %v1673_v31  ;;  %v1743_v31 = vld [vmem:[%s2335_s1 + $0x4] ss:$0 sm:$0xff] }
  0xc9   : > { %v447_v60 = vmul.f32 %v436_v59, %v1702_v58  ;;  %v300_v59 = vmul.f32 %v1369_v55, %v295_v45 }
  0xcb   : > { %456 = vrot.lane.b32.xlu1 %v447_v60, %s1535_s26 }
  0xce   : > { %v380_v61 = vpop.permute.xlu1 %379 }
  0xcf   : > { %v394_v55 = vmul.f32 %v380_v61, %v374_v17  ;;  %v1767_v61 = vld [vmem:[%s2335_s1 + $0x6] ss:$0 sm:$0xff] }
  0xd0   : > { %443 = vperm.xlu2 %1441, %v1586_v4  }
  0xd3   : > { %493 = vperm.xlu1 %1442, %v1498_v62   ;;  %v1752_v62 = vld [vmem:[%s2335_s1 + $0x7] ss:$0 sm:$0xff] }
  0xd6   : > { %v1712_v63 = vpop.permute.xlu1 %391 }
  0xd8   : > { %1443 = vset.pattern.permute.xlu2 %v1527_v3 }
  0xdb   : > { %505 = vperm.xlu1 %1442, %v1500_v29   ;;  %v1376_v29 = vld [vmem:[%s1654_s25 + $0x61] sm:$0xff] }
  0xdf   : > { %v1717_v2 = vpop.permute.xlu1 %411 }
  0xe3   : > { %551 = vperm.xlu1 %1442, %v1743_v31  }
  0xe8   : > { %v432_v18 = vpop.permute.xlu1 %431 }
  0xe9   : > { %v446_v19 = vmul.f32 %v432_v18, %v374_v17  ;;  %v1758_v18 = vld [vmem:[%s1654_s25 + $0x21] sm:$0xff] }
  0xea   : > { %v1499_v17 = vld [vmem:[%s2336_s2 + $0x1] ss:$0 sm:$0xff] }
  0xeb   : > { %454 = vrot.lane.b32.xlu0 %v446_v19, %s1535_s26  ;;  %563 = vperm.xlu1 %1442, %v1752_v62  }
  0xf0   : > { %v261_v25 = vpop.permute.xlu1 %260 }
  0xf1   : > { %v272_v30 = vadd.f32 %v261_v25, %v232_v23  ;;  %v1502_v25 = vld [vmem:[%s2336_s2 + $0x2] ss:$0 sm:$0xff] }
  0xf3   : > { %v301_v36 = vadd.f32 %v297_v33, %v272_v30  ;;  %v235_v33 = vadd.f32 %v231_v54, %v206_v14  ;;  %1446 = vset.pattern.permute.xlu1 %v1526_v1  ;;  %v329_v30 = vmul.f32 %v1373_v28, %v1678_v38  ;;  %v1374_v38 = vld [vmem:[%s1654_s25 + $0x41] sm:$0xff] }
  0xf4   : > { %579 = vperm.xlu1 %1446, %v1767_v61   ;;  %v1372_v14 = vld [vmem:[%s1654_s25 + $0xe0] sm:$0xff] }
  0xf7   : > { %v263_v44 = vpop.permute.xlu2 %262 }
  0xf8   : > { %v273_v50 = vadd.f32 %v263_v44, %v233_v40  ;;  %v265_v15 = vpop.permute.xlu1 %264  ;;  %v422_v44 = vmul.f32 %v1374_v38, %v1693_v48  ;;  %v328_v48 = vmul.f32 %v1372_v14, %v1691_v47  ;;  %v424_v47 = vmul.f32 %v1376_v29, %v1696_v51  ;;  %v1945_v29 = vld [vmem:[%s2335_s1 + $0xa] ss:$0 sm:$0xff] }
  0xf9   : > { %v274_v12 = vadd.f32 %v265_v15, %v1665_v26  ;;  %v1370_v26 = vld [vmem:[%s1654_s25 + $0xc0] sm:$0xff] }
  0xfa   : > { %v1730_v56 = vadd.f32 %v298_v49, %v273_v50  ;;  %v326_v27 = vmul.f32 %v1370_v26, %v1675_v34 }
  0xfb   : > { %v1732_v57 = vadd.f32 %v299_v53, %v274_v12 }
  0xfc   : > { %v330_v39 = vadd.f32 %v326_v27, %v301_v36  ;;  %1448 = vset.pattern.permute.xlu1 %v1528_v6 }
  0xfd   : > { %619 = vperm.xlu1 %1448, %v1767_v61  }
  0xff   : > { %v267_v35 = vpop.permute.xlu2 %266 }
 0x100   : > { %v275_v41 = vadd.f32 %v267_v35, %v235_v33  ;;  %v332_v35 = vadd.f32 %v328_v48, %v1732_v57 }
 0x102   : > { %v304_v42 = vadd.f32 %v300_v59, %v275_v41  ;;  %v396_v41 = vmul.f32 %v1715_v0, %v1758_v18  ;;  %v1371_v0 = vld [vmem:[%s1654_s25 + $0xd0] sm:$0xff] }
 0x104   : > { %v333_v32 = vadd.f32 %v329_v30, %v304_v42 }
 0x105   : > { %1450 = vset.pattern.permute.xlu1 %v1529_v7 }
 0x106   : > { %663 = vperm.xlu1 %1450, %v1767_v61  }
 0x10e   : > { %1451 = vset.pattern.permute.xlu1 %v1532_v10 }
 0x10f   : > { %679 = vperm.xlu1 %1451, %v1743_v31  }
 0x117   : > { %691 = vperm.xlu1 %1451, %v1752_v62  }
 0x11a   : > { %v1747_v45 = vpop.permute.xlu1 %360  ;;  %v359_v52 = vpop.permute.xlu2 %358 }
 0x11b   : > { %v370_v60 = vadd.f32 %v359_v52, %v330_v39 }
 0x11d   : > { %v1754_v16 = vadd.f32 %v394_v55, %v370_v60 }
 0x11f   : > { %1453 = vset.pattern.permute.xlu1 %v1530_v8  ;;  %v426_v50 = vadd.f32 %v422_v44, %v1754_v16 }
 0x120   : > { %719 = vperm.xlu1 %1453, %v1743_v31  }
 0x122   : > { %v440_v19 = vpop.permute.xlu1 %439  ;;  %v1760_v34 = vpop.permute.xlu2 %362 }
 0x123   : > { %v448_v20 = vmul.f32 %v440_v19, %v1758_v18  ;;  %v372_v42 = vadd.f32 %v1760_v34, %v332_v35  ;;  %v1507_v35 = vld [vmem:[%s2336_s2 + $0x5] ss:$0 sm:$0xff] }
 0x125   : > { %458 = vrot.lane.b32.xlu2 %v448_v20, %s1535_s26 }
 0x128   : > { %731 = vperm.xlu1 %1453, %v1752_v62  }
 0x12a   : > { %v444_v22 = vpop.permute.xlu2 %443 }
 0x12b   : > { %v449_v23 = vmul.f32 %v444_v22, %v1775_v21  ;;  %v395_v22 = vmul.f32 %v1688_v46, %v1702_v58 }
 0x12d   : > { %497 = vperm.xlu2 %1443, %v1499_v17   ;;  %460 = vrot.lane.b32.xlu0 %v449_v23, %s1535_s26  ;;  %v1375_v17 = vld [vmem:[%s1654_s25 + $0x51] sm:$0xff] }
 0x130   : > { %1457 = vset.pattern.permute.xlu1 %v1531_v9 }
 0x131   : > { %763 = vperm.xlu1 %1457, %v1743_v31  }
 0x135   : > { %555 = vperm.xlu2 %1443, %v1784_v24   ;;  %501 = vperm.xlu0 %1437, %v1502_v25   ;;  %v423_v25 = vmul.f32 %v1375_v17, %v1717_v2 }
 0x139   : > { %775 = vperm.xlu1 %1457, %v1752_v62  }
 0x13a   : > { %v365_v36 = vpop.permute.xlu0 %364 }
 0x13b   : > { %v1794_v37 = vadd.f32 %v365_v36, %v333_v32 }
 0x13d   : > { %1445 = vset.pattern.permute.xlu2 %v1526_v1  ;;  %1444 = vset.pattern.permute.xlu0 %v1532_v10 }
 0x13e   : > { %571 = vperm.xlu2 %1445, %v1743_v31   ;;  %315 = vperm.xlu0 %1444, %v1591_v5  }
 0x141   : > { %1460 = vset.pattern.permute.xlu1 %v1533_v11 }
 0x146   : > { %583 = vperm.xlu2 %1445, %v1752_v62   ;;  %687 = vperm.xlu0 %1444, %v1767_v61  }
 0x14e   : > { %1447 = vset.pattern.permute.xlu2 %v1528_v6  ;;  %1455 = vset.pattern.permute.xlu0 %v1530_v8 }
 0x14f   : > { %611 = vperm.xlu2 %1447, %v1743_v31   ;;  %727 = vperm.xlu0 %1455, %v1767_v61  }
 0x157   : > { %623 = vperm.xlu2 %1447, %v1752_v62   ;;  %1456 = vset.pattern.permute.xlu0 %v1533_v11 }
 0x158   : > { %419 = vperm.xlu0 %1456, %v1586_v4   ;;  %v457_v4 = vpop.permute.xlu1 %456 }
 0x15d   : > { %v455_v49 = vpop.permute.xlu0 %454 }
 0x15e   : > { %v466_v15 = vadd.f32 %v455_v49, %v426_v50 }
 0x15f   : > { %1449 = vset.pattern.permute.xlu2 %v1529_v7 }
 0x160   : > { %655 = vperm.xlu2 %1449, %v1743_v31   ;;  %799 = vperm.xlu0 %1456, %v1752_v62   ;;  %v494_v43 = vpop.permute.xlu1 %493 }
 0x161   : > { %v508_v54 = vadd.f32 %v494_v43, %v466_v15  ;;  %v397_v43 = vmul.f32 %v1712_v63, %v1775_v21 }
 0x168   : > { %667 = vperm.xlu2 %1449, %v1752_v62   ;;  %1461 = vset.pattern.permute.xlu0 %v1534_v13  ;;  %v1840_v12 = vpop.permute.xlu1 %505 }
 0x169   : > { %827 = vperm.xlu0 %1461, %v1743_v31  }
 0x170   : > { %1452 = vset.pattern.permute.xlu2 %v1532_v10  ;;  %v1848_v59 = vpop.permute.xlu1 %551 }
 0x171   : > { %683 = vperm.xlu2 %1452, %v1784_v24   ;;  %1462 = vset.pattern.permute.xlu0 %v1527_v3 }
 0x172   : > { %559 = vperm.xlu0 %1462, %v1767_v61  }
 0x178   : > { %v1857_v52 = vpop.permute.xlu1 %563 }
 0x179   : > { %1454 = vset.pattern.permute.xlu2 %v1530_v8 }
 0x17a   : > { %723 = vperm.xlu2 %1454, %v1784_v24  }
 0x17f   : > { %v459_v5 = vpop.permute.xlu2 %458 }
 0x180   : > { %v1863_v18 = vpop.permute.xlu1 %579 }
 0x182   : > { %1458 = vset.pattern.permute.xlu2 %v1531_v9 }
 0x183   : > { %767 = vperm.xlu2 %1458, %v1784_v24  }
 0x187   : > { %v498_v40 = vpop.permute.xlu2 %497 }
 0x188   : > { %v1876_v32 = vpop.permute.xlu1 %619 }
 0x18b   : > { %1459 = vset.pattern.permute.xlu2 %v1533_v11 }
 0x18c   : > { %787 = vperm.xlu2 %1459, %v1743_v31   ;;  %v400_v31 = vadd.f32 %v396_v41, %v372_v42  ;;  %v1508_v41 = vld [vmem:[%s2336_s2 + $0x7] ss:$0 sm:$0xff] }
 0x18e   : > { %v428_v39 = vadd.f32 %v424_v47, %v400_v31  ;;  %v1951_v31 = vld [vmem:[%s2335_s1 + $0x9] ss:$0 sm:$0xff] }
 0x18f   : > { %v1838_v53 = vpop.permute.xlu2 %555 }
 0x190   : > { %v468_v57 = vadd.f32 %v459_v5, %v428_v39  ;;  %v1887_v2 = vpop.permute.xlu1 %663 }
 0x194   : > { %516 = vrot.lane.b32.xlu2 %v508_v54, %s1536_s18  ;;  %v1537_v54 = vmov 0.0  }
 0x195   : > { %471 = vst.msk [vmem:[#allocation2] sm:$0xff] %vm470_vm0, %v1537_v54 }
 0x196   : > { %473 = vst.msk [vmem:[#allocation2 + $0x8] sm:$0x3] %vm472_vm1, %v1537_v54 }
 0x197   : > { %474 = vst.msk [vmem:[#allocation2 + $0x10] sm:$0xff] %vm470_vm0, %v1537_v54 }
 0x198   : > { %v1845_v33 = vpop.permute.xlu2 %571  ;;  %v1897_v50 = vpop.permute.xlu1 %679  ;;  %475 = vst.msk [vmem:[#allocation2 + $0x18] sm:$0x3] %vm472_vm1, %v1537_v54 }
 0x199   : > { %476 = vst.msk [vmem:[#allocation2 + $0x20] sm:$0xff] %vm470_vm0, %v1537_v54 }
 0x19a   : > { %477 = vst.msk [vmem:[#allocation2 + $0x28] sm:$0x3] %vm472_vm1, %v1537_v54 }
 0x19b   : > { %478 = vst.msk [vmem:[#allocation2 + $0x30] sm:$0xff] %vm470_vm0, %v1537_v54 }
 0x19c   : > { %479 = vst.msk [vmem:[#allocation2 + $0x38] sm:$0x3] %vm472_vm1, %v1537_v54 }
 0x19d   : > { %866 = vst.msk [vmem:[#allocation3] sm:$0xff] %vm470_vm0, %v1537_v54 }
 0x19e   : > { %867 = vst.msk [vmem:[#allocation3 + $0x8] sm:$0x3] %vm472_vm1, %v1537_v54 }
 0x19f   : > { %v461_v26 = vpop.permute.xlu0 %460  ;;  %868 = vst.msk [vmem:[#allocation3 + $0x10] sm:$0xff] %vm470_vm0, %v1537_v54 }
 0x1a0   : > { %v1854_v27 = vpop.permute.xlu2 %583  ;;  %869 = vst.msk [vmem:[#allocation3 + $0x18] sm:$0x3] %vm472_vm1, %v1537_v54 }
 0x1a1   : > { %870 = vst.msk [vmem:[#allocation3 + $0x20] sm:$0xff] %vm470_vm0, %v1537_v54 }
 0x1a2   : > { %871 = vst.msk [vmem:[#allocation3 + $0x28] sm:$0x3] %vm472_vm1, %v1537_v54 }
 0x1a3   : > { %872 = vst.msk [vmem:[#allocation3 + $0x30] sm:$0xff] %vm470_vm0, %v1537_v54 }
 0x1a4   : > { %873 = vst.msk [vmem:[#allocation3 + $0x38] sm:$0x3] %vm472_vm1, %v1537_v54 }
 0x1a7   : > { %v502_v55 = vpop.permute.xlu0 %501 }
 0x1a8   : > { %v510_v60 = vadd.f32 %v502_v55, %v468_v57  ;;  %v1962_v55 = vld [vmem:[%s2335_s1 + $0x8] ss:$0 sm:$0xff] }
 0x1a9   : > { %v1859_v16 = vpop.permute.xlu2 %611 }
 0x1aa   : > { %520 = vrot.lane.b32.xlu2 %v510_v60, %s1536_s18 }
 0x1b0   : > { %v316_v19 = vpop.permute.xlu0 %315 }
 0x1b1   : > { %v327_v34 = vmul.f32 %v1371_v0, %v316_v19  ;;  %v1865_v20 = vpop.permute.xlu2 %623 }
 0x1b2   : > { %795 = vperm.xlu2 %1459, %v1767_v61  }
 0x1b3   : > { %v331_v51 = vadd.f32 %v327_v34, %v1730_v56 }
 0x1b5   : > { %v371_v23 = vadd.f32 %v1747_v45, %v331_v51  ;;  %v1377_v45 = vld [vmem:[%s1654_s25 + $0x71] sm:$0xff] }
 0x1b7   : > { %v399_v28 = vadd.f32 %v395_v22, %v371_v23 }
 0x1b8   : > { %v1874_v30 = vpop.permute.xlu0 %687 }
 0x1b9   : > { %v427_v36 = vadd.f32 %v423_v25, %v399_v28 }
 0x1ba   : > { %1464 = vset.pattern.permute.xlu2 %v1534_v13  ;;  %v1879_v5 = vpop.permute.xlu2 %655 }
 0x1bb   : > { %835 = vperm.xlu2 %1464, %v1767_v61   ;;  %v467_v56 = vadd.f32 %v457_v4, %v427_v36  ;;  %v401_v4 = vadd.f32 %v397_v43, %v1794_v37  ;;  %v1914_v37 = vpop.permute.xlu1 %691 }
 0x1bd   : > { %v509_v38 = vadd.f32 %v498_v40, %v467_v56 }
 0x1bf   : > { %518 = vrot.lane.b32.xlu1 %v509_v38, %s1536_s18 }
 0x1c1   : > { %v1883_v46 = vpop.permute.xlu0 %727 }
 0x1c2   : > { %v1885_v58 = vpop.permute.xlu2 %667 }
 0x1c3   : > { %1467 = vset.pattern.permute.xlu2 %v1527_v3 }
 0x1c7   : > { %791 = vperm.xlu1 %1460, %v1784_v24  }
 0x1ca   : > { %v420_v44 = vpop.permute.xlu0 %419 }
 0x1cb   : > { %v425_v40 = vmul.f32 %v1377_v45, %v420_v44  ;;  %v1895_v49 = vpop.permute.xlu2 %683 }
 0x1cd   : > { %v429_v15 = vadd.f32 %v425_v40, %v401_v4 }
 0x1cf   : > { %v469_v14 = vadd.f32 %v461_v26, %v429_v15  ;;  %1463 = vset.pattern.permute.xlu1 %v1534_v13 }
 0x1d0   : > { %831 = vperm.xlu1 %1463, %v1784_v24  }
 0x1d1   : > { %v511_v63 = vadd.f32 %v1840_v12, %v469_v14  ;;  %v1506_v12 = vld [vmem:[%s2336_s2 + $0x4] ss:$0 sm:$0xff] }
 0x1d2   : > { %v1974_v34 = vpop.permute.xlu0 %799 }
 0x1d3   : > { %522 = vrot.lane.b32.xlu0 %v511_v63, %s1536_s18 }
 0x1d4   : > { %v1910_v21 = vpop.permute.xlu2 %723 }
 0x1d8   : > { %839 = vperm.xlu1 %1463, %v1752_v62   ;;  %v1933_v62 = vpop.permute.xlu1 %719 }
 0x1db   : > { %888 = vperm.xlu0 %1462, %v1506_v12   ;;  %v1981_v22 = vpop.permute.xlu0 %827 }
 0x1dd   : > { %v1927_v48 = vpop.permute.xlu2 %767 }
 0x1e0   : > { %1466 = vset.pattern.permute.xlu1 %v1527_v3  ;;  %v732_v26 = vpop.permute.xlu1 %731 }
 0x1e1   : > { %892 = vperm.xlu1 %1466, %v1507_v35  }
 0x1e3   : > { %1465 = vset.pattern.permute.xlu0 %v1526_v1 }
 0x1e4   : > { %575 = vperm.xlu0 %1465, %v1784_v24   ;;  %v560_v25 = vpop.permute.xlu0 %559 }
 0x1e6   : > { %v1940_v42 = vpop.permute.xlu2 %787 }
 0x1e8   : > { %v764_v39 = vpop.permute.xlu1 %763 }
 0x1e9   : > { %900 = vperm.xlu1 %1466, %v1508_v41  }
 0x1ec   : > { %973 = vperm.xlu0 %1465, %v1945_v29  }
 0x1ee   : > { %v517_v47 = vpop.permute.xlu2 %516 }
 0x1ef   : > { %529 = vst.msk [vmem:[#allocation2 + $0x1] sm:$0xff] %vm528_vm2, %v517_v47 }
 0x1f0   : > { %v776_v38 = vpop.permute.xlu1 %775 }
 0x1f1   : > { %949 = vperm.xlu1 %1466, %v1951_v31  }
 0x1f4   : > { %1470 = vset.pattern.permute.xlu0 %v1528_v6 }
 0x1f5   : > { %615 = vperm.xlu0 %1470, %v1784_v24  }
 0x1f6   : > { %v1957_v57 = vld [vmem:[#allocation2 + $0x2] sm:$0xff] }
 0x1f7   : > { %v1964_v60 = vld [vmem:[#allocation2 + $0x1] sm:$0xff]  ;;  %v1967_v0 = vmul.f32 %v764_v39, %v1957_v57 }
 0x1f8   : > { %v1972_v19 = vmul.f32 %v1879_v5, %v1964_v60  ;;  %v1977_v51 = vld [vmem:[#allocation2] sm:$0xff] }
 0x1f9   : > { %1468 = vset.pattern.permute.xlu1 %v1526_v1  ;;  %v586_v17 = vmul.f32 %v1845_v33, %v1977_v51  ;;  %v1512_v33 = vld [vmem:[%s2336_s2 + $0x6] ss:$0 sm:$0xff]  ;;  %v626_v12 = vmul.f32 %v1859_v16, %v1977_v51 }
 0x1fa   : > { %965 = vperm.xlu1 %1468, %v1962_v55   ;;  %896 = vperm.xlu2 %1467, %v1512_v33  }
 0x202   : > { %594 = vrot.lane.b32.xlu1 %v586_v17, %s1535_s26  ;;  %953 = vperm.xlu2 %1467, %v1945_v29  }
 0x204   : > { %v521_v23 = vpop.permute.xlu2 %520 }
 0x205   : > { %531 = vst.msk [vmem:[#allocation2 + $0x21] sm:$0xff] %vm528_vm2, %v521_v23 }
 0x20a   : > { %1469 = vset.pattern.permute.xlu2 %v1526_v1 }
 0x20b   : > { %969 = vperm.xlu2 %1469, %v1951_v31  }
 0x20c   : > { %v535_v28 = vld [vmem:[#allocation2 + $0x20] sm:$0xff] }
 0x20d   : > { %v1985_v36 = vmul.f32 %v560_v25, %v535_v28  ;;  %v588_v5 = vmul.f32 %v1863_v18, %v535_v28  ;;  %v628_v56 = vmul.f32 %v1876_v32, %v535_v28  ;;  %v694_v28 = vmul.f32 %v1897_v50, %v1964_v60  ;;  %v2057_v33 = vld [vmem:[#allocation2 + $0x22] sm:$0xff] }
 0x20f   : > { %598 = vrot.lane.b32.xlu0 %v588_v5, %s1535_s26  ;;  %v802_v5 = vmul.f32 %v1940_v42, %v1957_v57  ;;  %v734_v42 = vmul.f32 %v1933_v62, %v1964_v60 }
 0x213   : > { %1472 = vset.pattern.permute.xlu2 %v1528_v6 }
 0x217   : > { %638 = vrot.lane.b32.xlu0 %v628_v56, %s1538_s5 }
 0x231   : > { %v519_v18 = vpop.permute.xlu1 %518 }
 0x232   : > { %530 = vst.msk [vmem:[#allocation2 + $0x11] sm:$0xff] %vm528_vm2, %v519_v18 }
 0x239   : > { %v792_v54 = vpop.permute.xlu1 %791  ;;  %v2017_v63 = vld [vmem:[#allocation2 + $0x10] sm:$0xff] }
 0x23a   : > { %v2026_v41 = vld [vmem:[#allocation2 + $0x12] sm:$0xff] }
 0x245   : > { %v523_v32 = vpop.permute.xlu0 %522 }
 0x246   : > { %532 = vst.msk [vmem:[#allocation2 + $0x31] sm:$0xff] %vm528_vm2, %v523_v32 }
 0x24d   : > { %v2000_v45 = vld [vmem:[#allocation2 + $0x32] sm:$0xff]  ;;  %v2002_v43 = vpop.permute.xlu0 %888 }
 0x24e   : > { %v2004_v44 = vld [vmem:[#allocation2 + $0x30] sm:$0xff]  ;;  %v2015_v15 = vmul.f32 %v776_v38, %v2000_v45 }
 0x24f   : > { %v2006_v4 = vld [vmem:[#allocation2 + $0x31] sm:$0xff]  ;;  %v589_v1 = vmul.f32 %v1854_v27, %v2004_v44  ;;  %v629_v16 = vmul.f32 %v1865_v20, %v2004_v44 }
 0x250   : > { %v697_v40 = vmul.f32 %v1914_v37, %v2006_v4  ;;  %v737_v35 = vmul.f32 %v732_v26, %v2006_v4  ;;  %v832_v37 = vpop.permute.xlu1 %831  ;;  %v2035_v26 = vld [vmem:[#allocation2 + $0x11] sm:$0xff] }
 0x251   : > { %600 = vrot.lane.b32.xlu1 %v589_v1, %s1535_s26  ;;  %v843_v47 = vmul.f32 %v832_v37, %v2026_v41  ;;  %v695_v17 = vmul.f32 %v1895_v49, %v2035_v26  ;;  %v735_v20 = vmul.f32 %v1910_v21, %v2035_v26  ;;  %v652_v49 = vld [vmem:[#allocation2 + $0x21] sm:$0xff]  ;;  %v796_v21 = vpop.permute.xlu2 %795 }
 0x252   : > { %708 = vrot.lane.b32.xlu0 %v697_v40, %s1535_s26  ;;  %v696_v56 = vmul.f32 %v1874_v30, %v652_v49  ;;  %v804_v50 = vmul.f32 %v796_v21, %v2057_v33  ;;  %v736_v40 = vmul.f32 %v1883_v46, %v652_v49  ;;  %v672_v62 = vmul.f32 %v1887_v2, %v652_v49 }
 0x253   : > { %v805_v46 = vmul.f32 %v1974_v34, %v2000_v45 }
 0x256   : > { %v576_v14 = vpop.permute.xlu0 %575 }
 0x257   : > { %v587_v27 = vmul.f32 %v576_v14, %v2017_v63 }
 0x258   : > { %v840_v1 = vpop.permute.xlu1 %839 }
 0x259   : > { %634 = vrot.lane.b32.xlu1 %v626_v12, %s1538_s5  ;;  %596 = vrot.lane.b32.xlu2 %v587_v27, %s1535_s26  ;;  %v836_v18 = vpop.permute.xlu2 %835  ;;  %v842_v27 = vmul.f32 %v1981_v22, %v1957_v57  ;;  %v845_v57 = vmul.f32 %v840_v1, %v2000_v45  ;;  %v567_v1 = vmul.f32 %v1838_v53, %v2017_v63 }
 0x25a   : > { %748 = vrot.lane.b32.xlu0 %v737_v35, %s1538_s5  ;;  %v844_v32 = vmul.f32 %v836_v18, %v2057_v33  ;;  %v779_v53 = vmul.f32 %v1927_v48, %v2026_v41 }
 0x25e   : > { %v2029_v39 = vpop.permute.xlu0 %973 }
 0x260   : > { %v2083_v35 = vpop.permute.xlu1 %892 }
 0x261   : > { %640 = vrot.lane.b32.xlu1 %v629_v16, %s1538_s5 }
 0x262   : > { %852 = vrot.lane.b32.xlu0 %v843_v47, %s1538_s5 }
 0x267   : > { %v616_v23 = vpop.permute.xlu0 %615 }
 0x268   : > { %v627_v25 = vmul.f32 %v616_v23, %v2017_v63  ;;  %v2093_v2 = vpop.permute.xlu1 %900 }
 0x269   : > { %704 = vrot.lane.b32.xlu1 %v695_v17, %s1535_s26 }
 0x26a   : > { %1013 = vperm.xlu0 %1470, %v1945_v29   ;;  %636 = vrot.lane.b32.xlu2 %v627_v25, %s1538_s5 }
 0x271   : > { %744 = vrot.lane.b32.xlu1 %v735_v20, %s1538_s5 }
 0x272   : > { %1473 = vset.pattern.permute.xlu0 %v1529_v7  ;;  %702 = vrot.lane.b32.xlu2 %v694_v28, %s1535_s26 }
 0x273   : > { %659 = vperm.xlu0 %1473, %v1784_v24   ;;  %v2063_v24 = vld [vmem:[%s2335_s1 + $0xb] ss:$0 sm:$0xff] }
 0x279   : > { %810 = vrot.lane.b32.xlu1 %v802_v5, %s1535_s26  ;;  %v569_v5 = vmul.f32 %v1857_v52, %v2004_v44 }
 0x27a   : > { %706 = vrot.lane.b32.xlu2 %v696_v56, %s1535_s26 }
 0x27b   : > { %1057 = vperm.xlu0 %1473, %v1945_v29  }
 0x281   : > { %814 = vrot.lane.b32.xlu1 %v804_v50, %s1535_s26  ;;  %v599_v30 = vpop.permute.xlu0 %598 }
 0x282   : > { %v608_v38 = vadd.f32 %v599_v30, %v1985_v36  ;;  %742 = vrot.lane.b32.xlu2 %v734_v42, %s1538_s5  ;;  %v803_v36 = vmul.f32 %v792_v54, %v2026_v41  ;;  %v2096_v54 = vpop.permute.xlu2 %896 }
 0x283   : > { %1478 = vset.pattern.permute.xlu0 %v1532_v10 }
 0x284   : > { %1085 = vperm.xlu0 %1478, %v2063_v24  }
 0x289   : > { %854 = vrot.lane.b32.xlu1 %v844_v32, %s1538_s5  ;;  %v639_v14 = vpop.permute.xlu0 %638 }
 0x28a   : > { %v648_v12 = vadd.f32 %v639_v14, %v608_v38  ;;  %746 = vrot.lane.b32.xlu2 %v736_v40, %s1538_s5 }
 0x28c   : > { %1479 = vset.pattern.permute.xlu0 %v1530_v8  ;;  %v2079_v60 = vadd.f32 %v672_v62, %v648_v12 }
 0x28d   : > { %1113 = vperm.xlu0 %1479, %v1962_v55  }
 0x291   : > { %977 = vperm.xlu1 %1468, %v2063_v24  }
 0x292   : > { %812 = vrot.lane.b32.xlu2 %v803_v36, %s1535_s26 }
 0x295   : > { %1480 = vset.pattern.permute.xlu0 %v1531_v9 }
 0x296   : > { %771 = vperm.xlu0 %1480, %v1767_v61   ;;  %v2106_v61 = vpop.permute.xlu2 %953 }
 0x299   : > { %1471 = vset.pattern.permute.xlu1 %v1528_v6  ;;  %v2104_v6 = vpop.permute.xlu1 %949 }
 0x29a   : > { %1005 = vperm.xlu1 %1471, %v1962_v55   ;;  %816 = vrot.lane.b32.xlu2 %v805_v46, %s1535_s26 }
 0x29e   : > { %1157 = vperm.xlu0 %1480, %v1962_v55   ;;  %v2115_v22 = vpop.permute.xlu2 %969 }
 0x2a1   : > { %v2113_v34 = vpop.permute.xlu1 %965 }
 0x2a2   : > { %1017 = vperm.xlu1 %1471, %v2063_v24   ;;  %850 = vrot.lane.b32.xlu2 %v842_v27, %s1538_s5 }
 0x2a6   : > { %1486 = vset.pattern.permute.xlu0 %v1533_v11 }
 0x2a7   : > { %1185 = vperm.xlu0 %1486, %v1951_v31  }
 0x2a9   : > { %v595_v37 = vpop.permute.xlu1 %594 }
 0x2aa   : > { %1474 = vset.pattern.permute.xlu1 %v1529_v7  ;;  %1009 = vperm.xlu2 %1472, %v1951_v31  }
 0x2ab   : > { %1049 = vperm.xlu1 %1474, %v1962_v55  }
 0x2af   : > { %1490 = vset.pattern.permute.xlu0 %v1534_v13 }
 0x2b2   : > { %856 = vrot.lane.b32.xlu2 %v845_v57, %s1538_s5 }
 0x2b3   : > { %1061 = vperm.xlu1 %1474, %v2063_v24   ;;  %1475 = vset.pattern.permute.xlu2 %v1529_v7  ;;  %v597_v47 = vpop.permute.xlu2 %596  ;;  %v566_v7 = vmul.f32 %v1848_v59, %v1977_v51  ;;  %v673_v59 = vmul.f32 %v1885_v58, %v2006_v4 }
 0x2b4   : > { %v607_v40 = vadd.f32 %v597_v47, %v567_v1 }
 0x2b5   : > { %v606_v23 = vadd.f32 %v595_v37, %v566_v7 }
 0x2ba   : > { %1053 = vperm.xlu2 %1475, %v1951_v31  }
 0x2bb   : > { %1477 = vset.pattern.permute.xlu1 %v1532_v10 }
 0x2bc   : > { %1077 = vperm.xlu1 %1477, %v1951_v31  }
 0x2c2   : > { %1476 = vset.pattern.permute.xlu2 %v1532_v10 }
 0x2c3   : > { %v601_v16 = vpop.permute.xlu1 %600  ;;  %1073 = vperm.xlu2 %1476, %v1962_v55  }
 0x2c4   : > { %v709_v45 = vpop.permute.xlu0 %708  ;;  %1481 = vset.pattern.permute.xlu1 %v1530_v8  ;;  %v637_v17 = vpop.permute.xlu2 %636  ;;  %v609_v56 = vadd.f32 %v601_v16, %v569_v5 }
 0x2c5   : > { %1117 = vperm.xlu1 %1481, %v1951_v31   ;;  %v647_v62 = vadd.f32 %v637_v17, %v607_v40 }
 0x2cb   : > { %v635_v25 = vpop.permute.xlu1 %634  ;;  %1081 = vperm.xlu2 %1476, %v1945_v29  }
 0x2cc   : > { %v749_v20 = vpop.permute.xlu0 %748  ;;  %v646_v28 = vadd.f32 %v635_v25, %v606_v23  ;;  %v703_v49 = vpop.permute.xlu2 %702 }
 0x2cd   : > { %1125 = vperm.xlu1 %1481, %v2063_v24  }
 0x2ce   : > { %v674_v10 = vadd.f32 %v1972_v19, %v646_v28 }
 0x2d0   : > { %v714_v18 = vadd.f32 %v703_v49, %v674_v10 }
 0x2d3   : > { %v641_v21 = vpop.permute.xlu1 %640  ;;  %1482 = vset.pattern.permute.xlu2 %v1530_v8 }
 0x2d4   : > { %v853_v50 = vpop.permute.xlu0 %852  ;;  %v649_v51 = vadd.f32 %v641_v21, %v609_v56  ;;  %v707_v42 = vpop.permute.xlu2 %706  ;;  %1121 = vperm.xlu2 %1482, %v1945_v29  }
 0x2d5   : > { %1483 = vset.pattern.permute.xlu1 %v1531_v9 }
 0x2d6   : > { %v677_v30 = vadd.f32 %v673_v59, %v649_v51  ;;  %1161 = vperm.xlu1 %1483, %v1951_v31  }
 0x2d8   : > { %v717_v19 = vadd.f32 %v709_v45, %v677_v30 }
 0x2da   : > { %v757_v38 = vadd.f32 %v749_v20, %v717_v19 }
 0x2db   : > { %v705_v52 = vpop.permute.xlu1 %704 }
 0x2dc   : > { %v2140_v44 = vpop.permute.xlu0 %1013  ;;  %v785_v32 = vadd.f32 %v2015_v15, %v757_v38  ;;  %v743_v58 = vpop.permute.xlu2 %742  ;;  %1484 = vset.pattern.permute.xlu2 %v1531_v9 }
 0x2dd   : > { %v754_v8 = vadd.f32 %v743_v58, %v714_v18  ;;  %1165 = vperm.xlu2 %1484, %v1945_v29  }
 0x2de   : > { %1169 = vperm.xlu1 %1483, %v2063_v24  }
 0x2df   : > { %v782_v4 = vadd.f32 %v1967_v0, %v754_v8 }
 0x2e3   : > { %v745_v14 = vpop.permute.xlu1 %744 }
 0x2e4   : > { %v747_v15 = vpop.permute.xlu2 %746 }
 0x2e5   : > { %v660_v12 = vpop.permute.xlu0 %659  ;;  %1485 = vset.pattern.permute.xlu2 %v1533_v11 }
 0x2e6   : > { %v671_v36 = vmul.f32 %v660_v12, %v2035_v26  ;;  %1487 = vset.pattern.permute.xlu1 %v1533_v11  ;;  %1181 = vperm.xlu2 %1485, %v1962_v55  }
 0x2e7   : > { %1189 = vperm.xlu1 %1487, %v1945_v29  }
 0x2e8   : > { %v675_v9 = vadd.f32 %v671_v36, %v647_v62 }
 0x2ea   : > { %v715_v0 = vadd.f32 %v705_v52, %v675_v9 }
 0x2eb   : > { %v811_v46 = vpop.permute.xlu1 %810 }
 0x2ec   : > { %v755_v27 = vadd.f32 %v745_v14, %v715_v0  ;;  %v813_v26 = vpop.permute.xlu2 %812  ;;  %v822_v41 = vadd.f32 %v811_v46, %v782_v4 }
 0x2ed   : > { %v2156_v63 = vpop.permute.xlu0 %1057 }
 0x2ee   : > { %v783_v57 = vadd.f32 %v779_v53, %v755_v27  ;;  %1193 = vperm.xlu2 %1485, %v2063_v24  }
 0x2ef   : > { %1488 = vset.pattern.permute.xlu1 %v1534_v13 }
 0x2f0   : > { %v823_v37 = vadd.f32 %v813_v26, %v783_v57  ;;  %1221 = vperm.xlu1 %1488, %v1962_v55  }
 0x2f2   : > { %v863_v11 = vadd.f32 %v853_v50, %v823_v37 }
 0x2f3   : > { %v815_v16 = vpop.permute.xlu1 %814 }
 0x2f4   : > { %v904_v47 = vadd.f32 %v2083_v35, %v863_v11  ;;  %v817_v48 = vpop.permute.xlu2 %816 }
 0x2f5   : > { %v825_v5 = vadd.f32 %v817_v48, %v785_v32 }
 0x2f6   : > { %v2162_v45 = vpop.permute.xlu0 %1085  ;;  %913 = vrot.lane.b32.xlu0 %v904_v47, %s1536_s18  ;;  %1489 = vset.pattern.permute.xlu2 %v1534_v13 }
 0x2f7   : > { %1225 = vperm.xlu2 %1489, %v1951_v31   ;;  %v716_v31 = vadd.f32 %v707_v42, %v2079_v60 }
 0x2f8   : > { %1233 = vperm.xlu1 %1488, %v2063_v24  }
 0x2fb   : > { %v855_v7 = vpop.permute.xlu1 %854 }
 0x2fc   : > { %v851_v17 = vpop.permute.xlu2 %850 }
 0x2fd   : > { %v862_v23 = vadd.f32 %v851_v17, %v822_v41 }
 0x2fe   : > { %1229 = vperm.xlu0 %1490, %v1945_v29   ;;  %v1514_v29 = vld [vmem:[%s2336_s2 + $0x8] ss:$0 sm:$0xff] }
 0x2ff   : > { %v2169_v25 = vpop.permute.xlu0 %1113  ;;  %v903_v35 = vadd.f32 %v2002_v43, %v862_v23  ;;  %1492 = vset.pattern.permute.xlu2 %v1527_v3  ;;  %v756_v43 = vadd.f32 %v747_v15, %v716_v31 }
 0x300   : > { %1493 = vset.pattern.permute.xlu1 %v1527_v3 }
 0x301   : > { %911 = vrot.lane.b32.xlu2 %v903_v35, %s1536_s18 }
 0x303   : > { %v978_v28 = vpop.permute.xlu1 %977 }
 0x304   : > { %v2176_v13 = vpop.permute.xlu2 %1009 }
 0x306   : > { %1491 = vset.pattern.permute.xlu0 %v1527_v3 }
 0x307   : > { %945 = vperm.xlu0 %1491, %v1962_v55  }
 0x308   : > { %v772_v20 = vpop.permute.xlu0 %771 }
 0x309   : > { %v780_v49 = vmul.f32 %v772_v20, %v2057_v33  ;;  %1274 = vperm.xlu2 %1492, %v1514_v29  }
 0x30b   : > { %v784_v10 = vadd.f32 %v780_v49, %v756_v43 }
 0x30c   : > { %v857_v3 = vpop.permute.xlu2 %856  ;;  %v2187_v59 = vpop.permute.xlu1 %1005 }
 0x30d   : > { %v824_v56 = vadd.f32 %v815_v16, %v784_v10  ;;  %v865_v50 = vadd.f32 %v857_v3, %v825_v5 }
 0x30f   : > { %v864_v21 = vadd.f32 %v855_v7, %v824_v56  ;;  %957 = vperm.xlu0 %1491, %v2063_v24   ;;  %v906_v55 = vadd.f32 %v2093_v2, %v865_v50 }
 0x310   : > { %v1158_v4 = vpop.permute.xlu0 %1157 }
 0x311   : > { %v905_v60 = vadd.f32 %v2096_v54, %v864_v21  ;;  %917 = vrot.lane.b32.xlu2 %v906_v55, %s1536_s18 }
 0x313   : > { %915 = vrot.lane.b32.xlu1 %v905_v60, %s1536_s18 }
 0x314   : > { %v2191_v33 = vpop.permute.xlu2 %1053  ;;  %v1018_v51 = vpop.permute.xlu1 %1017 }
 0x319   : > { %v1186_v14 = vpop.permute.xlu0 %1185 }
 0x31d   : > { %v1074_v42 = vpop.permute.xlu2 %1073  ;;  %v2193_v30 = vpop.permute.xlu1 %1049 }
 0x325   : > { %v1082_v19 = vpop.permute.xlu2 %1081  ;;  %v2195_v38 = vpop.permute.xlu1 %1061 }
 0x32e   : > { %v1122_v24 = vpop.permute.xlu2 %1121  ;;  %v2197_v52 = vpop.permute.xlu1 %1077 }
 0x337   : > { %v2199_v2 = vpop.permute.xlu2 %1165  ;;  %v1118_v18 = vpop.permute.xlu1 %1117 }
 0x33f   : > { %v2203_v58 = vpop.permute.xlu1 %1125 }
 0x340   : > { %v2201_v54 = vpop.permute.xlu2 %1181 }
 0x348   : > { %v1194_v32 = vpop.permute.xlu2 %1193  ;;  %v1162_v1 = vpop.permute.xlu1 %1161 }
 0x350   : > { %v1170_v12 = vpop.permute.xlu1 %1169 }
 0x351   : > { %v2205_v8 = vpop.permute.xlu2 %1225 }
 0x359   : > { %v2221_v27 = vpop.permute.xlu1 %1189 }
 0x35b   : > { %v912_v40 = vpop.permute.xlu2 %911 }
 0x35c   : > { %923 = vst.msk [vmem:[#allocation3 + $0x1] sm:$0xff] %vm528_vm2, %v912_v40 }
 0x362   : > { %v1222_v11 = vpop.permute.xlu1 %1221 }
 0x363   : > { %v2208_v62 = vld [vmem:[#allocation3 + $0x2] sm:$0xff]  ;;  %v2210_v36 = vpop.permute.xlu2 %1274 }
 0x364   : > { %v2212_v15 = vld [vmem:[#allocation3] sm:$0xff]  ;;  %v2217_v0 = vmul.f32 %v1158_v4, %v2208_v62 }
 0x365   : > { %v980_v9 = vmul.f32 %v2113_v34, %v2212_v15  ;;  %v2244_v23 = vld [vmem:[#allocation3 + $0x1] sm:$0xff]  ;;  %v1020_v21 = vmul.f32 %v2187_v59, %v2212_v15  ;;  %v1236_v59 = vmul.f32 %v1222_v11, %v2208_v62 }
 0x366   : > { %v1088_v35 = vmul.f32 %v1074_v42, %v2244_v23 }
 0x367   : > { %988 = vrot.lane.b32.xlu2 %v980_v9, %s1535_s26 }
 0x368   : > { %v914_v46 = vpop.permute.xlu0 %913 }
 0x369   : > { %924 = vst.msk [vmem:[#allocation3 + $0x11] sm:$0xff] %vm528_vm2, %v914_v46 }
 0x36b   : > { %v918_v53 = vpop.permute.xlu2 %917 }
 0x36c   : > { %926 = vst.msk [vmem:[#allocation3 + $0x31] sm:$0xff] %vm528_vm2, %v918_v53 }
 0x370   : > { %v2224_v57 = vld [vmem:[#allocation3 + $0x10] sm:$0xff]  ;;  %v1230_v56 = vpop.permute.xlu0 %1229 }
 0x371   : > { %v2226_v26 = vld [vmem:[#allocation3 + $0x12] sm:$0xff]  ;;  %v981_v34 = vmul.f32 %v2115_v22, %v2224_v57  ;;  %v1021_v17 = vmul.f32 %v2176_v13, %v2224_v57  ;;  %v1234_v22 = vpop.permute.xlu1 %1233 }
 0x372   : > { %v2232_v37 = vmul.f32 %v1162_v1, %v2226_v26  ;;  %v1045_v31 = vld [vmem:[#allocation3 + $0x11] sm:$0xff]  ;;  %v1197_v55 = vmul.f32 %v1186_v14, %v2226_v26  ;;  %v961_v14 = vmul.f32 %v2104_v6, %v2224_v57  ;;  %v1064_v6 = vmul.f32 %v2193_v30, %v2244_v23 }
 0x373   : > { %990 = vrot.lane.b32.xlu1 %v981_v34, %s1535_s26  ;;  %v1155_v47 = vld [vmem:[#allocation3 + $0x32] sm:$0xff]  ;;  %v1129_v20 = vmul.f32 %v1118_v18, %v1045_v31  ;;  %v1128_v18 = vmul.f32 %v2169_v25, %v2244_v23  ;;  %v1237_v25 = vmul.f32 %v2205_v8, %v2226_v26  ;;  %v1065_v8 = vmul.f32 %v2191_v33, %v1045_v31 }
 0x374   : > { %v2234_v16 = vld [vmem:[#allocation3 + $0x30] sm:$0xff]  ;;  %v2237_v41 = vmul.f32 %v1170_v12, %v1155_v47  ;;  %v1199_v10 = vmul.f32 %v1194_v32, %v1155_v47 }
 0x375   : > { %v983_v48 = vmul.f32 %v978_v28, %v2234_v16  ;;  %v1023_v7 = vmul.f32 %v1018_v51, %v2234_v16  ;;  %v1089_v51 = vmul.f32 %v2197_v52, %v1045_v31  ;;  %v1047_v42 = vld [vmem:[#allocation3 + $0x31] sm:$0xff] }
 0x376   : > { %v1131_v52 = vmul.f32 %v2203_v58, %v1047_v42  ;;  %v1517_v58 = vld [vmem:[%s2336_s2 + $0xb] ss:$0 sm:$0xff]  ;;  %v1067_v57 = vmul.f32 %v2195_v38, %v1047_v42 }
 0x377   : > { %994 = vrot.lane.b32.xlu0 %v983_v48, %s1535_s26 }
 0x379   : > { %v946_v4 = vpop.permute.xlu0 %945 }
 0x37a   : > { %v960_v53 = vmul.f32 %v946_v4, %v2212_v15 }
 0x37b   : > { %1030 = vrot.lane.b32.xlu1 %v1021_v17, %s1538_s5 }
 0x37f   : > { %1034 = vrot.lane.b32.xlu0 %v1023_v7, %s1538_s5 }
 0x381   : > { %v958_v1 = vpop.permute.xlu0 %957 }
 0x382   : > { %v963_v26 = vmul.f32 %v958_v1, %v2234_v16 }
 0x383   : > { %1096 = vrot.lane.b32.xlu1 %v1088_v35, %s1535_s26 }
 0x385   : > { %v916_v29 = vpop.permute.xlu1 %915 }
 0x386   : > { %925 = vst.msk [vmem:[#allocation3 + $0x21] sm:$0xff] %vm528_vm2, %v916_v29 }
 0x387   : > { %1138 = vrot.lane.b32.xlu0 %v1129_v20, %s1538_s5 }
 0x38d   : > { %v2251_v13 = vld [vmem:[#allocation3 + $0x21] sm:$0xff] }
 0x38e   : > { %v2253_v43 = vld [vmem:[#allocation3 + $0x20] sm:$0xff]  ;;  %v1090_v28 = vmul.f32 %v1082_v19, %v2251_v13  ;;  %v1130_v3 = vmul.f32 %v1122_v24, %v2251_v13  ;;  %v1239_v19 = vmul.f32 %v1234_v22, %v1155_v47  ;;  %v1091_v24 = vmul.f32 %v2162_v45, %v1047_v42 }
 0x38f   : > { %v982_v49 = vmul.f32 %v2029_v39, %v2253_v43  ;;  %1210 = vrot.lane.b32.xlu0 %v1199_v10, %s1535_s26  ;;  %v2261_v5 = vld [vmem:[#allocation3 + $0x22] sm:$0xff]  ;;  %v1022_v60 = vmul.f32 %v2140_v44, %v2253_v43  ;;  %v1516_v44 = vld [vmem:[%s2336_s2 + $0xa] ss:$0 sm:$0xff]  ;;  %v1196_v45 = vmul.f32 %v2201_v54, %v2208_v62  ;;  %v962_v33 = vmul.f32 %v2106_v61, %v2253_v43 }
 0x390   : > { %1100 = vrot.lane.b32.xlu1 %v1090_v28, %s1535_s26  ;;  %v1238_v50 = vmul.f32 %v1230_v56, %v2261_v5  ;;  %v1515_v39 = vld [vmem:[%s2336_s2 + $0x9] ss:$0 sm:$0xff]  ;;  %v1198_v32 = vmul.f32 %v2221_v27, %v2261_v5  ;;  %v1066_v28 = vmul.f32 %v2156_v63, %v2251_v13  ;;  %v1174_v43 = vmul.f32 %v2199_v2, %v2261_v5 }
 0x391   : > { %992 = vrot.lane.b32.xlu2 %v982_v49, %s1535_s26 }
 0x397   : > { %1248 = vrot.lane.b32.xlu0 %v1238_v50, %s1538_s5 }
 0x398   : > { %1140 = vrot.lane.b32.xlu1 %v1130_v3, %s1538_s5 }
 0x399   : > { %1028 = vrot.lane.b32.xlu2 %v1020_v21, %s1538_s5 }
 0x39f   : > { %1278 = vperm.xlu0 %1491, %v1515_v39  }
 0x3a0   : > { %1206 = vrot.lane.b32.xlu1 %v1197_v55, %s1535_s26 }
 0x3a1   : > { %1032 = vrot.lane.b32.xlu2 %v1022_v60, %s1538_s5 }
 0x3a8   : > { %1244 = vrot.lane.b32.xlu1 %v1236_v59, %s1538_s5 }
 0x3a9   : > { %1098 = vrot.lane.b32.xlu2 %v1089_v51, %s1535_s26 }
 0x3b0   : > { %1250 = vrot.lane.b32.xlu1 %v1239_v19, %s1538_s5 }
 0x3b1   : > { %1102 = vrot.lane.b32.xlu2 %v1091_v24, %s1535_s26 }
 0x3b8   : > { %1282 = vperm.xlu1 %1493, %v1516_v44  }
 0x3b9   : > { %1136 = vrot.lane.b32.xlu2 %v1128_v18, %s1538_s5 }
 0x3c1   : > { %1142 = vrot.lane.b32.xlu2 %v1131_v52, %s1538_s5  ;;  %v989_v54 = vpop.permute.xlu2 %988 }
 0x3c2   : > { %v1000_v11 = vadd.f32 %v989_v54, %v960_v53 }
 0x3c9   : > { %1204 = vrot.lane.b32.xlu2 %v1196_v45, %s1535_s26 }
 0x3d1   : > { %1208 = vrot.lane.b32.xlu2 %v1198_v32, %s1535_s26  ;;  %s1397_s26 = sshll.u32 %s2339_s13, 5 }
 0x3d2   : > { %s170_s22 = scalar_lea.vmem %s2337_s3, %s1397_s26 }
 0x3d9   : > { %1246 = vrot.lane.b32.xlu2 %v1237_v25, %s1538_s5 }
 0x3e1   : > { %1286 = vperm.xlu2 %1492, %v1517_v58  }
 0x3e5   : > { %v991_v40 = vpop.permute.xlu1 %990 }
 0x3e6   : > { %v1001_v9 = vadd.f32 %v991_v40, %v961_v14 }
 0x3e9   : > { %v995_v12 = vpop.permute.xlu0 %994 }
 0x3ea   : > { %v1003_v47 = vadd.f32 %v995_v12, %v963_v26 }
 0x3eb   : > { %v993_v62 = vpop.permute.xlu2 %992 }
 0x3ec   : > { %v1002_v15 = vadd.f32 %v993_v62, %v962_v33 }
 0x3ed   : > { %v1031_v46 = vpop.permute.xlu1 %1030 }
 0x3ee   : > { %v1041_v27 = vadd.f32 %v1031_v46, %v1001_v9 }
 0x3f0   : > { %v1069_v34 = vadd.f32 %v1065_v8, %v1041_v27 }
 0x3f1   : > { %v1035_v48 = vpop.permute.xlu0 %1034 }
 0x3f2   : > { %v1043_v22 = vadd.f32 %v1035_v48, %v1003_v47 }
 0x3f3   : > { %v1029_v17 = vpop.permute.xlu2 %1028 }
 0x3f4   : > { %v1040_v7 = vadd.f32 %v1029_v17, %v1000_v11  ;;  %v1071_v29 = vadd.f32 %v1067_v57, %v1043_v22 }
 0x3f5   : > { %v1097_v31 = vpop.permute.xlu1 %1096 }
 0x3f6   : > { %v1068_v35 = vadd.f32 %v1064_v6, %v1040_v7 }
 0x3f8   : > { %v1108_v60 = vadd.f32 %v1097_v31, %v1068_v35 }
 0x3f9   : > { %v1139_v21 = vpop.permute.xlu0 %1138 }
 0x3fb   : > { %v1033_v16 = vpop.permute.xlu2 %1032 }
 0x3fc   : > { %v1042_v20 = vadd.f32 %v1033_v16, %v1002_v15 }
 0x3fe   : > { %v1070_v49 = vadd.f32 %v1066_v28, %v1042_v20 }
 0x401   : > { %v1211_v18 = vpop.permute.xlu0 %1210 }
 0x402   : > { %v1101_v10 = vpop.permute.xlu1 %1100 }
 0x403   : > { %v1099_v56 = vpop.permute.xlu2 %1098  ;;  %v1110_v23 = vadd.f32 %v1101_v10, %v1070_v49 }
 0x404   : > { %v1109_v3 = vadd.f32 %v1099_v56, %v1069_v34 }
 0x406   : > { %v1149_v30 = vadd.f32 %v1139_v21, %v1109_v3 }
 0x408   : > { %v1177_v38 = vadd.f32 %v2232_v37, %v1149_v30 }
 0x40a   : > { %v1141_v50 = vpop.permute.xlu1 %1140 }
 0x40b   : > { %v1103_v39 = vpop.permute.xlu2 %1102  ;;  %v1150_v61 = vadd.f32 %v1141_v50, %v1110_v23 }
 0x40c   : > { %v1111_v42 = vadd.f32 %v1103_v39, %v1071_v29 }
 0x40d   : > { %v1178_v55 = vadd.f32 %v1174_v43, %v1150_v61 }
 0x412   : > { %v1207_v59 = vpop.permute.xlu1 %1206 }
 0x413   : > { %v1137_v63 = vpop.permute.xlu2 %1136  ;;  %v1217_v54 = vadd.f32 %v1207_v59, %v1177_v38 }
 0x414   : > { %v1148_v13 = vadd.f32 %v1137_v63, %v1108_v60 }
 0x416   : > { %v1176_v51 = vadd.f32 %v2217_v0, %v1148_v13  ;;  %v1249_v0 = vpop.permute.xlu0 %1248 }
 0x41a   : > { %v1245_v19 = vpop.permute.xlu1 %1244 }
 0x41b   : > { %v1143_v24 = vpop.permute.xlu2 %1142 }
 0x41c   : > { %v1151_v44 = vadd.f32 %v1143_v24, %v1111_v42 }
 0x41e   : > { %v1179_v37 = vadd.f32 %v2237_v41, %v1151_v44  ;;  %v1279_v12 = vpop.permute.xlu0 %1278 }
 0x420   : > { %v1219_v9 = vadd.f32 %v1211_v18, %v1179_v37 }
 0x422   : > { %v1251_v32 = vpop.permute.xlu1 %1250 }
 0x423   : > { %v1205_v52 = vpop.permute.xlu2 %1204  ;;  %v1259_v46 = vadd.f32 %v1251_v32, %v1219_v9 }
 0x424   : > { %v1216_v45 = vadd.f32 %v1205_v52, %v1176_v51 }
 0x426   : > { %v1256_v25 = vadd.f32 %v1245_v19, %v1216_v45 }
 0x428   : > { %v1289_v2 = vadd.f32 %v2210_v36, %v1256_v25 }
 0x42a   : > { %1294 = vst.msk [vmem:[%s170_s22] sm:$0xff] %vm1293_vm3, %v1289_v2  ;;  %v1283_v58 = vpop.permute.xlu1 %1282 }
 0x42b   : > { %v1209_v5 = vpop.permute.xlu2 %1208 }
 0x42c   : > { %v1218_v4 = vadd.f32 %v1209_v5, %v1178_v55 }
 0x42e   : > { %v1258_v41 = vadd.f32 %v1249_v0, %v1218_v4 }
 0x430   : > { %v1291_v1 = vadd.f32 %v1283_v58, %v1258_v41 }
 0x432   : > { %1296 = vst.msk [vmem:[%s170_s22 + $0x10] sm:$0xff] %vm1293_vm3, %v1291_v1 }
 0x433   : > { %v1247_v40 = vpop.permute.xlu2 %1246 }
 0x434   : > { %v1257_v14 = vadd.f32 %v1247_v40, %v1217_v54 }
 0x436   : > { %v1290_v62 = vadd.f32 %v1279_v12, %v1257_v14 }
 0x438   : > { %1295 = vst.msk [vmem:[%s170_s22 + $0x8] sm:$0xff] %vm1293_vm3, %v1290_v62 }
 0x43b   : > { %v1287_v36 = vpop.permute.xlu2 %1286 }
 0x43c   : > { %v1292_v27 = vadd.f32 %v1287_v36, %v1259_v46 }
 0x43e   : > { %1297 = vst.msk [vmem:[%s170_s22 + $0x18] sm:$0xff] %vm1293_vm3, %v1292_v27 }
 0x43f PF: > { %s13_s12 = sadd.s32 1, %s1524_s12  }
 0x440   : > { %p10_p4 = scmp.ge.s32.totalorder %s13_s12, 4  }
 0x442   :  { %12 = sbr.rel (!%p10_p4) target bundleno = 1 (0x1), region = 69 }

</bundles_post_ra>
